<compile_context>
chip_gen: v6e
topology: v6e:2x2x1
jax: 0.10.0
libtpu: 0.0.40
codegen_flags: <defaults>
</compile_context>

<pallas_src>
import jax
import jax.numpy as jnp
from jax.experimental import pallas as pl
from jax.experimental.pallas import tpu as pltpu


# ----------------------------------------------------------------------------
# helpers
# ----------------------------------------------------------------------------
def _full_spec(shape):
    """BlockSpec covering the whole array (grid index ignored)."""
    nd = len(shape)
    return pl.BlockSpec(shape, lambda *_: (0,) * nd)


def _num_tensorcores():
    """Best-effort chip detection: 2 TensorCores (megacore split useful) only on v7x."""
    try:
        kind = jax.devices()[0].device_kind.lower()
        if "v7" in kind or "tpu7" in kind or "7x" in kind:
            return 2
    except Exception:
        pass
    return 1


def _vmem_limit_bytes():
    """Per-chip scoped-VMEM limit (half of physical capacity, capped at 64 MiB)."""
    try:
        cap = int(pltpu.get_tpu_info().vmem_capacity_bytes)
        return min(cap // 2, 64 * 1024 * 1024)
    except Exception:
        return 32 * 1024 * 1024


# ----------------------------------------------------------------------------
# Kernel 1: PropNet.  One grid step processes a block of `bb` (seq*batch) samples.
# All MLPs run on batch-flattened operands (M = bb*N or bb*n_rel); the per-sample
# message-passing matmuls use batched einsums.  No activation concats (split weights).
# ----------------------------------------------------------------------------
def _make_propnet_kernel(bb, N, n_rel, F, H, E, n_p, woff, bidx):
    bf16 = jnp.bfloat16
    f32 = jnp.float32

    def kernel(x_ref, rr_ref, rs_ref, pw_ref, pb_ref, out_ref):
        def mm(a, name):
            o, r = woff[name]                       # static offsets into packed weights
            return jnp.dot(a.astype(bf16), pw_ref[o:o + r, :],
                           preferred_element_type=f32)

        def bias(name):
            i = bidx[name]
            return pb_ref[i:i + 1, :]               # (1, H) f32

        relu = lambda v: jnp.maximum(v, 0.0)

        x = x_ref[...]                               # (bb, N, F)      bf16
        Rr = rr_ref[...]                             # (bb, n_rel, N)  bf16
        Rs = rs_ref[...]
        # One in-kernel transpose (hoisted out of the pstep loop) replaces the third
        # relation HBM stream (Rr^T).  Done at 32-bit (standard XLU transpose) then
        # cast back to bf16 for the MXU.
        Rrt = jnp.swapaxes(Rr.astype(f32), 1, 2).astype(bf16)   # (bb, N, n_rel)
        xf = x.reshape(bb * N, F)

        # ---- node encoder: Linear+ReLU x3 (batched over the whole block) ----
        h = relu(mm(xf, "ne0") + bias("ne_b0"))
        h = relu(mm(h, "ne1") + bias("ne_b1"))
        node_encode = relu(mm(h, "ne2") + bias("ne_b2"))        # (bb*N, H) f32
        node_effect = node_encode

        # ---- edge encoder (split-weight: no concat of [x_r, x_s]) -----------
        x_r = jnp.einsum("brn,bnf->brf", Rr, x,
                         preferred_element_type=f32).reshape(bb * n_rel, F)
        x_s = jnp.einsum("brn,bnf->brf", Rs, x,
                         preferred_element_type=f32).reshape(bb * n_rel, F)
        h = relu(mm(x_r, "ee0r") + mm(x_s, "ee0s") + bias("ee_b0"))
        h = relu(mm(h, "ee1") + bias("ee_b1"))
        edge_encode = relu(mm(h, "ee2") + bias("ee_b2"))        # (bb*n_rel, H)

        ep_b = bias("ep_b")                                     # hoisted out of loop
        np_b = bias("np_b")

        # ---- pstep = 2 propagation steps (static unroll) ---------------------
        for _ in range(2):
            ne3 = node_effect.reshape(bb, N, H).astype(bf16)
            ner = jnp.einsum("brn,bnh->brh", Rr, ne3,
                             preferred_element_type=f32).reshape(bb * n_rel, H)
            nes = jnp.einsum("brn,bnh->brh", Rs, ne3,
                             preferred_element_type=f32).reshape(bb * n_rel, H)
            edge_effect = relu(mm(edge_encode, "ep_e") + mm(ner, "ep_r")
                               + mm(nes, "ep_s") + ep_b)
            ee3 = edge_effect.reshape(bb, n_rel, H).astype(bf16)
            agg = jnp.einsum("bnr,brh->bnh", Rrt, ee3,
                             preferred_element_type=f32).reshape(bb * N, H)
            node_effect = relu(mm(node_encode, "np_n") + mm(agg, "np_a")
                               + np_b + node_effect)            # residual Propagator

        # ---- node predictor: particles only (halves predictor M) -------------
        ne_p = node_encode.reshape(bb, N, H)[:, :n_p, :].reshape(bb * n_p, H)
        nf_p = node_effect.reshape(bb, N, H)[:, :n_p, :].reshape(bb * n_p, H)
        h = relu(mm(ne_p, "pd0n") + mm(nf_p, "pd0e") + bias("pd_b0"))
        h = relu(mm(h, "pd1") + bias("pd_b1"))
        out = mm(h, "pd2") + bias("pd_b2")                      # (bb*n_p, E) f32
        out_ref[...] = out.reshape(bb, n_p, E).astype(bf16)     # bf16, GRU layout

    return kernel


def propnet_pallas(x, Rr, Rs, pn_w, pn_b, woff, bidx, n_p):
    SB, N, F = x.shape                   # SB = seq*B (seq-major flattening)
    n_rel = Rr.shape[1]
    H = pn_w.shape[1]
    E = H
    nb = 1
    # Split only when a second TC exists (v7x) and each half keeps M >= 128 rows.
    if _num_tensorcores() >= 2 and SB % 2 == 0 and (SB // 2) * N >= 128:
        nb = 2
    bb = SB // nb
    kernel = _make_propnet_kernel(bb, N, n_rel, F, H, E, n_p, woff, bidx)
    return pl.pallas_call(
        kernel,
        grid=(nb,),
        out_shape=jax.ShapeDtypeStruct((SB, n_p, E), jnp.bfloat16),
        in_specs=[
            pl.BlockSpec((bb, N, F), lambda i: (i, 0, 0)),
            pl.BlockSpec((bb, n_rel, N), lambda i: (i, 0, 0)),
            pl.BlockSpec((bb, n_rel, N), lambda i: (i, 0, 0)),
            pl.BlockSpec(pn_w.shape, lambda i: (0, 0)),
            pl.BlockSpec(pn_b.shape, lambda i: (0, 0)),
        ],
        out_specs=pl.BlockSpec((bb, n_p, E), lambda i: (i, 0, 0)),
        compiler_params=pltpu.CompilerParams(
            dimension_semantics=("parallel",),
            vmem_limit_bytes=_vmem_limit_bytes()),
    )(x, Rr, Rs, pn_w, pn_b)


# ----------------------------------------------------------------------------
# Kernel 2: fused 2-layer bidirectional GRU + heads (position refiner + p_rigid).
#   * Input projections hoisted out of the recurrence; fwd/bwd fused into one MXU
#     push per time step; b_ih + b_hh(r,z) folded into the precomputed gates, b_hn
#     kept inside r*(W_hn h + b_hn) (exact torch.nn.GRU semantics).
#   * bi_output never leaves VMEM; particle-mean pooling done in-kernel.
# ----------------------------------------------------------------------------
def _make_gru_heads_kernel(seq, bn, E, H, n_p, state_dim, n_inst):
    bf16 = jnp.bfloat16
    f32 = jnp.float32
    G, G2 = 3 * H, 6 * H
    Bb = bn // n_p
    unrolled = seq <= 8                     # static unroll only for short sequences

    def kernel(x_ref, gwih_ref, gwhh_ref, gb_ref,
               pw0_ref, pb0_ref, pw1_ref, pb1_ref,
               rw0_ref, rb0_ref, rw1_ref, rb1_ref,
               resid_ref, rigid_ref,
               gi_ref, hfbuf_ref, hbbuf_ref):

        def gate(gi, gh, h):
            r = jax.nn.sigmoid(gi[:, 0:H] + gh[:, 0:H])
            z = jax.nn.sigmoid(gi[:, H:2 * H] + gh[:, H:2 * H])
            n = jnp.tanh(gi[:, 2 * H:G] + r * gh[:, 2 * H:G])   # gh_n includes b_hn
            return n + z * (h - n)                               # == (1-z)*n + z*h

        def run_layer(whh, bhn_full):
            # whh: (H, 6H) bf16 = [Whh_fwd | Whh_bwd]; bhn_full: (2bn, 6H) f32,
            # zero except the n-gate columns (pre-broadcast, hoisted out of the loop).
            def one_step(s, hf, hb):
                tb = seq - 1 - s
                gif = gi_ref[s]                                  # (bn, 6H) bf16
                gib = gi_ref[tb]
                h2 = jnp.concatenate([hf, hb], axis=0).astype(bf16)   # (2bn, H)
                gh = jnp.dot(h2, whh, preferred_element_type=f32) + bhn_full
                hf2 = gate(gif[:, 0:G], gh[0:bn, 0:G], hf)
                hb2 = gate(gib[:, G:G2], gh[bn:2 * bn, G:G2], hb)
                hfbuf_ref[s] = hf2.astype(bf16)                  # full-row stores
                hbbuf_ref[tb] = hb2.astype(bf16)
                return hf2, hb2

            h0 = jnp.zeros((bn, H), f32)
            if unrolled:
                hf, hb = h0, h0
                for s in range(seq):
                    hf, hb = one_step(s, hf, hb)
            else:
                jax.lax.fori_loop(0, seq,
                                  lambda s, c: one_step(s, c[0], c[1]), (h0, h0))

        # ---- layer 0: hoisted input projection (one fused-direction matmul) ----
        x_flat = x_ref[...].reshape(seq * bn, E)                 # bf16
        gi0 = (jnp.dot(x_flat, gwih_ref[0:E, :], preferred_element_type=f32)
               + gb_ref[0:1, :])
        gi_ref[...] = gi0.reshape(seq, bn, G2).astype(bf16)
        bhn0 = jnp.broadcast_to(gb_ref[1:2, :], (2 * bn, G2))
        run_layer(gwhh_ref[0], bhn0)

        # ---- layer 1: hoisted input projection over layer-0 outputs ------------
        hf_flat = hfbuf_ref[...].reshape(seq * bn, H)            # bf16 layer-0 fwd
        hb_flat = hbbuf_ref[...].reshape(seq * bn, H)            # bf16 layer-0 bwd
        gi1 = (jnp.dot(hf_flat, gwih_ref[E:E + H, :], preferred_element_type=f32)
               + jnp.dot(hb_flat, gwih_ref[E + H:E + 2 * H, :],
                         preferred_element_type=f32)
               + gb_ref[2:3, :])
        gi_ref[...] = gi1.reshape(seq, bn, G2).astype(bf16)
        bhn1 = jnp.broadcast_to(gb_ref[3:4, :], (2 * bn, G2))
        run_layer(gwhh_ref[1], bhn1)         # hfbuf/hbbuf reused for layer-1 outputs

        # ---- fused heads (bi_output never leaves VMEM) --------------------------
        bi_f = hfbuf_ref[...].reshape(seq * bn, H)               # bf16
        bi_b = hbbuf_ref[...].reshape(seq * bn, H)

        # position refiner: Linear(2H->H)+ReLU, Linear(H->state_dim)  (split-weight)
        h = jnp.maximum(
            jnp.dot(bi_f, pw0_ref[0:H, :], preferred_element_type=f32)
            + jnp.dot(bi_b, pw0_ref[H:2 * H, :], preferred_element_type=f32)
            + pb0_ref[...], 0.0)
        resid = (jnp.dot(h.astype(bf16), pw1_ref[...], preferred_element_type=f32)
                 + pb1_ref[...])
        resid_ref[...] = resid.reshape(seq, bn, state_dim)

        # p_rigid: per-(t,b) particle mean (no pooling matrix), Linear+ReLU, Linear, sigmoid
        pool_f = jnp.mean(bi_f.astype(f32).reshape(seq * Bb, n_p, H), axis=1)
        pool_b = jnp.mean(bi_b.astype(f32).reshape(seq * Bb, n_p, H), axis=1)
        g = jnp.maximum(
            jnp.dot(pool_f.astype(bf16), rw0_ref[0:H, :], preferred_element_type=f32)
            + jnp.dot(pool_b.astype(bf16), rw0_ref[H:2 * H, :],
                      preferred_element_type=f32)
            + rb0_ref[...], 0.0)
        rigid = jax.nn.sigmoid(
            jnp.dot(g.astype(bf16), rw1_ref[...], preferred_element_type=f32)
            + rb1_ref[...])
        rigid_ref[...] = rigid.reshape(seq, Bb, n_inst)

    return kernel


def gru_heads_pallas(x, gp, hp, n_p, state_dim, n_instance):
    seq, BN, E = x.shape
    H = gp["gw_hh"].shape[1]
    B = BN // n_p
    nb = 1
    # 2-way row split only on a 2-TC chip AND when each half keeps the recurrence
    # matmul filled and particle groups / rigid output blocks stay aligned.
    if (_num_tensorcores() >= 2 and BN % (2 * n_p) == 0 and BN // 2 >= 128
            and (B // 2) % 8 == 0):
        nb = 2
    bn = BN // nb
    Bb = B // nb
    kernel = _make_gru_heads_kernel(seq, bn, E, H, n_p, state_dim, n_instance)
    ins = (x, gp["gw_ih"], gp["gw_hh"], gp["gb"],
           hp["pos_w0"], hp["pos_b0"], hp["pos_w1"], hp["pos_b1"],
           hp["rig_w0"], hp["rig_b0"], hp["rig_w1"], hp["rig_b1"])
    return pl.pallas_call(
        kernel,
        grid=(nb,),
        out_shape=(jax.ShapeDtypeStruct((seq, BN, state_dim), jnp.float32),
                   jax.ShapeDtypeStruct((seq, B, n_instance), jnp.float32)),
        in_specs=[pl.BlockSpec((seq, bn, E), lambda i: (0, i, 0))]
                 + [_full_spec(a.shape) for a in ins[1:]],
        out_specs=(pl.BlockSpec((seq, bn, state_dim), lambda i: (0, i, 0)),
                   pl.BlockSpec((seq, Bb, n_instance), lambda i: (0, i, 0))),
        scratch_shapes=[
            pltpu.VMEM((seq, bn, 6 * H), jnp.bfloat16),   # precomputed gates (bf16)
            pltpu.VMEM((seq, bn, H), jnp.bfloat16),       # fwd hidden buffer (reused l0/l1)
            pltpu.VMEM((seq, bn, H), jnp.bfloat16),       # bwd hidden buffer (reused l0/l1)
        ],
        compiler_params=pltpu.CompilerParams(
            dimension_semantics=("parallel",),
            vmem_limit_bytes=_vmem_limit_bytes()),
    )(*ins)


# ----------------------------------------------------------------------------
# Full forward (glue: reshapes, normalization; hot paths in the two Pallas kernels)
# ----------------------------------------------------------------------------
def position_and_group_refiner_forward(params, attr, state, group_percept,
                                        Rr, Rs, n_p, n_s, n_instance, stat):
    mean_p, std_p, _, _ = stat
    B, seq, N, state_dim = state.shape
    n_group = group_percept.shape[-1]
    n_rel = Rr.shape[2]
    H = params["pn_w"].shape[1]
    E = H

    state_norm = (state - mean_p) / std_p

    # seq-major layout so the PropNet output feeds the GRU directly (no reps transpose).
    state_t = jnp.transpose(state_norm, (1, 0, 2, 3))                 # (seq, B, N, sd)
    attr_rep = jnp.broadcast_to(attr[None], (seq, B, N, attr.shape[-1]))
    gp_t = jnp.transpose(group_percept, (1, 0, 2, 3))                 # (seq, B, n_p, ng)
    pad = jnp.zeros((seq, B, n_s, n_group), jnp.float32)
    x = jnp.concatenate([attr_rep, state_t,
                         jnp.concatenate([gp_t, pad], axis=2)], axis=3)

    SB = seq * B
    x = x.reshape(SB, N, -1).astype(jnp.bfloat16)
    Rr2 = jnp.transpose(Rr, (1, 0, 2, 3)).reshape(SB, n_rel, N).astype(jnp.bfloat16)
    Rs2 = jnp.transpose(Rs, (1, 0, 2, 3)).reshape(SB, n_rel, N).astype(jnp.bfloat16)

    # PropNet (spatial message passing), pstep=2; bf16 particle-only output in GRU layout.
    reps = propnet_pallas(x, Rr2, Rs2, params["pn_w"], params["pn_b"],
                          params["pn_woff"], params["pn_bidx"], n_p)   # (SB, n_p, E) bf16
    gru_in = reps.reshape(seq, B * n_p, E)                             # no transpose/cast

    # fused bi-GRU (temporal message passing) + heads
    resid_flat, p_rigid_sb = gru_heads_pallas(gru_in, params["gru"], params["heads"],
                                              n_p, state_dim, n_instance)

    resid = resid_flat.reshape(seq, B, n_p, state_dim).transpose(1, 0, 2, 3)
    state_refined_norm = state_norm[:, :, :n_p] + resid
    state_refined = state_refined_norm * std_p + mean_p
    state_refined = jnp.concatenate([state_refined, state[:, :, n_p:]], axis=2)

    p_rigid = jnp.transpose(p_rigid_sb, (1, 0, 2))                     # (B, seq, n_inst)

    # p_instance (reference forward just returns group_percept)
    p_instance = group_percept
    # TODO(synk): p_instance_predictor parameters exist in the torch __init__ but are unused in forward.

    return state_refined, p_rigid, p_instance


# ----------------------------------------------------------------------------
# deterministic parameter init (weights packed + bf16; biases f32)
# ----------------------------------------------------------------------------
def init_all_params(key, F, H, E, state_dim, n_instance):
    assert E == H, "nf_pos must equal nf_effect (required by the reference model)"
    ks = iter(jax.random.split(key, 64))

    def rand(shape, scale=0.1):
        return (scale * jax.random.normal(next(ks), shape)).astype(jnp.float32)

    # PropNet: one packed weight slab (all blocks have H output columns) + bias slab.
    pn_blocks = [("ne0", F), ("ne1", H), ("ne2", H),
                 ("ee0r", F), ("ee0s", F), ("ee1", H), ("ee2", H),
                 ("ep_e", H), ("ep_r", H), ("ep_s", H),
                 ("np_n", H), ("np_a", H),
                 ("pd0n", H), ("pd0e", H), ("pd1", H), ("pd2", H)]
    woff, off = {}, 0
    for name, r in pn_blocks:
        woff[name] = (off, r)
        off += r
    pn_w = rand((off, H)).astype(jnp.bfloat16)
    bias_names = ["ne_b0", "ne_b1", "ne_b2", "ee_b0", "ee_b1", "ee_b2",
                  "ep_b", "np_b", "pd_b0", "pd_b1", "pd_b2"]
    bidx = {n: i for i, n in enumerate(bias_names)}
    pn_b = rand((len(bias_names), H))

    # GRU (PyTorch gate order r|z|n; columns are [fwd gates | bwd gates]).
    G2 = 6 * H
    # rows [0:E] = layer-0 W_ih ; [E:E+H] / [E+H:E+2H] = layer-1 W_ih (fwd / bwd input halves)
    gw_ih = rand((E + 2 * H, G2)).astype(jnp.bfloat16)
    gw_hh = rand((2, H, G2)).astype(jnp.bfloat16)        # [layer0, layer1] W_hh
    # bias rows: 0/2 = b_ih + b_hh(r,z) folded (per layer); 1/3 = b_hn only
    # (kept separate so the n-gate sees r*(W_hn h + b_hn), matching torch.nn.GRU).
    nmask = jnp.concatenate([jnp.zeros((1, 2 * H)), jnp.ones((1, H)),
                             jnp.zeros((1, 2 * H)), jnp.ones((1, H))],
                            axis=1).astype(jnp.float32)
    gb = jnp.concatenate([rand((1, G2)), rand((1, G2)) * nmask,
                          rand((1, G2)), rand((1, G2)) * nmask], axis=0)
    gru = dict(gw_ih=gw_ih, gw_hh=gw_hh, gb=gb)

    heads = dict(
        pos_w0=rand((2 * E, E)).astype(jnp.bfloat16), pos_b0=rand((1, E)),
        pos_w1=rand((E, state_dim)).astype(jnp.bfloat16), pos_b1=rand((1, state_dim)),
        rig_w0=rand((2 * E, E)).astype(jnp.bfloat16), rig_b0=rand((1, E)),
        rig_w1=rand((E, n_instance)).astype(jnp.bfloat16), rig_b1=rand((1, n_instance)),
    )

    return dict(pn_w=pn_w, pn_b=pn_b, pn_woff=woff, pn_bidx=bidx,
                gru=gru, heads=heads)


# ----------------------------------------------------------------------------
if __name__ == "__main__":
    # small config: attr_dim=1, state_dim=3, n_group_percept=4,
    # nf_pos = nf_effect = 32 (must be equal for the reference model), n_instance=4.
    B, seq, n_p, n_s = 2, 4, 8, 8
    N = n_p + n_s
    n_rel = 16
    attr_dim, state_dim, n_group = 1, 3, 4
    H = E = 32
    n_instance = 4
    F = attr_dim + state_dim + n_group

    key = jax.random.PRNGKey(0)
    k_attr, k_state, k_gp, k_rr, k_rs = jax.random.split(key, 5)
    attr = jax.random.normal(k_attr, (B, N, attr_dim), jnp.float32)
    state = jax.random.normal(k_state, (B, seq, N, state_dim), jnp.float32)
    group_percept = jax.nn.softmax(
        jax.random.normal(k_gp, (B, seq, n_p, n_group), jnp.float32), axis=-1)
    recv = jax.random.randint(k_rr, (B, seq, n_rel), 0, N)
    send = jax.random.randint(k_rs, (B, seq, n_rel), 0, N)
    Rr = jax.nn.one_hot(recv, N, dtype=jnp.float32)
    Rs = jax.nn.one_hot(send, N, dtype=jnp.float32)

    mean_p = jnp.zeros((state_dim,), jnp.float32)
    std_p = 0.5 * jnp.ones((state_dim,), jnp.float32)
    mean_d = jnp.zeros((state_dim,), jnp.float32)
    std_d = jnp.ones((state_dim,), jnp.float32)
    stat = (mean_p, std_p, mean_d, std_d)

    params = init_all_params(jax.random.PRNGKey(42), F, H, E, state_dim, n_instance)

    state_refined, p_rigid, p_instance = position_and_group_refiner_forward(
        params, attr, state, group_percept, Rr, Rs, n_p, n_s, n_instance, stat)
    jax.block_until_ready((state_refined, p_rigid, p_instance))

    assert state_refined.shape == (B, seq, N, state_dim)
    assert p_rigid.shape == (B, seq, n_instance)
    assert p_instance.shape == (B, seq, n_p, n_group)
    print("KERNEL_OK")
</pallas_src>

<mosaic_0001>
module attributes {stable_mosaic.version = 11 : i64} {
  func.func @kernel(%arg0: i32, %arg1: memref<8x16x8xbf16, #tpu.memory_space<vmem>>, %arg2: memref<8x16x16xbf16, #tpu.memory_space<vmem>>, %arg3: memref<8x16x16xbf16, #tpu.memory_space<vmem>>, %arg4: memref<440x32xbf16, #tpu.memory_space<vmem>>, %arg5: memref<11x32xf32, #tpu.memory_space<vmem>>, %arg6: memref<8x8x32xbf16, #tpu.memory_space<vmem>>) attributes {dimension_semantics = [#tpu.dimension_semantics<parallel>], iteration_bounds = array<i64: 1>, scalar_prefetch = 0 : i64, scratch_operands = 0 : i64, tpu.core_type = #tpu.core_type<tc>, window_params = [{transform_indices = @transform_0, window_bounds = array<i64: 8, 16, 8>}, {transform_indices = @transform_1, window_bounds = array<i64: 8, 16, 16>}, {transform_indices = @transform_2, window_bounds = array<i64: 8, 16, 16>}, {pipeline_mode = #tpu.pipeline_mode<synchronous>, transform_indices = @transform_3, window_bounds = array<i64: 440, 32>}, {pipeline_mode = #tpu.pipeline_mode<synchronous>, transform_indices = @transform_4, window_bounds = array<i64: 11, 32>}, {transform_indices = @transform_5, window_bounds = array<i64: 8, 8, 32>}]} {
    %c0 = arith.constant 0 : index
    %c0_0 = arith.constant 0 : index
    %c0_1 = arith.constant 0 : index
    %0 = vector.load %arg1[%c0, %c0_0, %c0_1] : memref<8x16x8xbf16, #tpu.memory_space<vmem>>, vector<8x16x8xbf16>
    %c0_2 = arith.constant 0 : index
    %c0_3 = arith.constant 0 : index
    %c0_4 = arith.constant 0 : index
    %1 = vector.load %arg2[%c0_2, %c0_3, %c0_4] : memref<8x16x16xbf16, #tpu.memory_space<vmem>>, vector<8x16x16xbf16>
    %c0_5 = arith.constant 0 : index
    %c0_6 = arith.constant 0 : index
    %c0_7 = arith.constant 0 : index
    %2 = vector.load %arg3[%c0_5, %c0_6, %c0_7] : memref<8x16x16xbf16, #tpu.memory_space<vmem>>, vector<8x16x16xbf16>
    %3 = arith.extf %1 : vector<8x16x16xbf16> to vector<8x16x16xf32>
    %4 = tpu.transpose %3, [0, 2, 1] : vector<8x16x16xf32> -> vector<8x16x16xf32>
    %5 = arith.truncf %4 : vector<8x16x16xf32> to vector<8x16x16xbf16>
    %6 = vector.shape_cast %0 : vector<8x16x8xbf16> to vector<128x8xbf16>
    %c0_8 = arith.constant 0 : index
    %c0_9 = arith.constant 0 : index
    %7 = vector.load %arg4[%c0_8, %c0_9] : memref<440x32xbf16, #tpu.memory_space<vmem>>, vector<8x32xbf16>
    %cst = arith.constant dense<0.000000e+00> : vector<128x32xf32>
    %8 = tpu.matmul %6, %7, %cst {dimension_numbers = #tpu.dot_dimension_numbers<[1], [0], [0], [1], [0, 0, 1, 1], [], []>} : vector<128x8xbf16>, vector<8x32xbf16>, vector<128x32xf32> -> vector<128x32xf32>
    %c0_10 = arith.constant 0 : index
    %c0_11 = arith.constant 0 : index
    %9 = vector.load %arg5[%c0_10, %c0_11] : memref<11x32xf32, #tpu.memory_space<vmem>>, vector<1x32xf32>
    %10 = vector.broadcast %9 : vector<1x32xf32> to vector<128x32xf32>
    %11 = arith.addf %8, %10 : vector<128x32xf32>
    %cst_12 = arith.constant 0.000000e+00 : f32
    %12 = vector.broadcast %cst_12 : f32 to vector<128x32xf32>
    %13 = arith.maximumf %11, %12 : vector<128x32xf32>
    %14 = arith.truncf %13 : vector<128x32xf32> to vector<128x32xbf16>
    %c8 = arith.constant 8 : index
    %c0_13 = arith.constant 0 : index
    %15 = vector.load %arg4[%c8, %c0_13] : memref<440x32xbf16, #tpu.memory_space<vmem>>, vector<32x32xbf16>
    %cst_14 = arith.constant dense<0.000000e+00> : vector<128x32xf32>
    %16 = tpu.matmul %14, %15, %cst_14 {dimension_numbers = #tpu.dot_dimension_numbers<[1], [0], [0], [1], [0, 0, 1, 1], [], []>} : vector<128x32xbf16>, vector<32x32xbf16>, vector<128x32xf32> -> vector<128x32xf32>
    %c1 = arith.constant 1 : index
    %c0_15 = arith.constant 0 : index
    %17 = vector.load %arg5[%c1, %c0_15] : memref<11x32xf32, #tpu.memory_space<vmem>>, vector<1x32xf32>
    %18 = vector.broadcast %17 : vector<1x32xf32> to vector<128x32xf32>
    %19 = arith.addf %16, %18 : vector<128x32xf32>
    %cst_16 = arith.constant 0.000000e+00 : f32
    %20 = vector.broadcast %cst_16 : f32 to vector<128x32xf32>
    %21 = arith.maximumf %19, %20 : vector<128x32xf32>
    %22 = arith.truncf %21 : vector<128x32xf32> to vector<128x32xbf16>
    %c40 = arith.constant 40 : index
    %c0_17 = arith.constant 0 : index
    %23 = vector.load %arg4[%c40, %c0_17] : memref<440x32xbf16, #tpu.memory_space<vmem>>, vector<32x32xbf16>
    %cst_18 = arith.constant dense<0.000000e+00> : vector<128x32xf32>
    %24 = tpu.matmul %22, %23, %cst_18 {dimension_numbers = #tpu.dot_dimension_numbers<[1], [0], [0], [1], [0, 0, 1, 1], [], []>} : vector<128x32xbf16>, vector<32x32xbf16>, vector<128x32xf32> -> vector<128x32xf32>
    %c2 = arith.constant 2 : index
    %c0_19 = arith.constant 0 : index
    %25 = vector.load %arg5[%c2, %c0_19] : memref<11x32xf32, #tpu.memory_space<vmem>>, vector<1x32xf32>
    %26 = vector.broadcast %25 : vector<1x32xf32> to vector<128x32xf32>
    %27 = arith.addf %24, %26 : vector<128x32xf32>
    %cst_20 = arith.constant 0.000000e+00 : f32
    %28 = vector.broadcast %cst_20 : f32 to vector<128x32xf32>
    %29 = arith.maximumf %27, %28 : vector<128x32xf32>
    "tpu.trace_start"() <{level = 10 : i32, message = "brn,bnf->brf"}> : () -> ()
    %cst_21 = arith.constant dense<0.000000e+00> : vector<8x16x8xf32>
    %30 = tpu.matmul %1, %0, %cst_21 {dimension_numbers = #tpu.dot_dimension_numbers<[2], [1], [1], [2], [0, 0, 0, 1, 1, 2], [0], [0]>} : vector<8x16x16xbf16>, vector<8x16x8xbf16>, vector<8x16x8xf32> -> vector<8x16x8xf32>
    "tpu.trace_stop"() : () -> ()
    %31 = vector.shape_cast %30 : vector<8x16x8xf32> to vector<128x8xf32>
    "tpu.trace_start"() <{level = 10 : i32, message = "brn,bnf->brf"}> : () -> ()
    %cst_22 = arith.constant dense<0.000000e+00> : vector<8x16x8xf32>
    %32 = tpu.matmul %2, %0, %cst_22 {dimension_numbers = #tpu.dot_dimension_numbers<[2], [1], [1], [2], [0, 0, 0, 1, 1, 2], [0], [0]>} : vector<8x16x16xbf16>, vector<8x16x8xbf16>, vector<8x16x8xf32> -> vector<8x16x8xf32>
    "tpu.trace_stop"() : () -> ()
    %33 = vector.shape_cast %32 : vector<8x16x8xf32> to vector<128x8xf32>
    %34 = arith.truncf %31 : vector<128x8xf32> to vector<128x8xbf16>
    %c72 = arith.constant 72 : index
    %c0_23 = arith.constant 0 : index
    %35 = vector.load %arg4[%c72, %c0_23] : memref<440x32xbf16, #tpu.memory_space<vmem>>, vector<8x32xbf16>
    %cst_24 = arith.constant dense<0.000000e+00> : vector<128x32xf32>
    %36 = tpu.matmul %34, %35, %cst_24 {dimension_numbers = #tpu.dot_dimension_numbers<[1], [0], [0], [1], [0, 0, 1, 1], [], []>} : vector<128x8xbf16>, vector<8x32xbf16>, vector<128x32xf32> -> vector<128x32xf32>
    %37 = arith.truncf %33 : vector<128x8xf32> to vector<128x8xbf16>
    %c80 = arith.constant 80 : index
    %c0_25 = arith.constant 0 : index
    %38 = vector.load %arg4[%c80, %c0_25] : memref<440x32xbf16, #tpu.memory_space<vmem>>, vector<8x32xbf16>
    %cst_26 = arith.constant dense<0.000000e+00> : vector<128x32xf32>
    %39 = tpu.matmul %37, %38, %cst_26 {dimension_numbers = #tpu.dot_dimension_numbers<[1], [0], [0], [1], [0, 0, 1, 1], [], []>} : vector<128x8xbf16>, vector<8x32xbf16>, vector<128x32xf32> -> vector<128x32xf32>
    %40 = arith.addf %36, %39 : vector<128x32xf32>
    %c3 = arith.constant 3 : index
    %c0_27 = arith.constant 0 : index
    %41 = vector.load %arg5[%c3, %c0_27] : memref<11x32xf32, #tpu.memory_space<vmem>>, vector<1x32xf32>
    %42 = vector.broadcast %41 : vector<1x32xf32> to vector<128x32xf32>
    %43 = arith.addf %40, %42 : vector<128x32xf32>
    %cst_28 = arith.constant 0.000000e+00 : f32
    %44 = vector.broadcast %cst_28 : f32 to vector<128x32xf32>
    %45 = arith.maximumf %43, %44 : vector<128x32xf32>
    %46 = arith.truncf %45 : vector<128x32xf32> to vector<128x32xbf16>
    %c88 = arith.constant 88 : index
    %c0_29 = arith.constant 0 : index
    %47 = vector.load %arg4[%c88, %c0_29] : memref<440x32xbf16, #tpu.memory_space<vmem>>, vector<32x32xbf16>
    %cst_30 = arith.constant dense<0.000000e+00> : vector<128x32xf32>
    %48 = tpu.matmul %46, %47, %cst_30 {dimension_numbers = #tpu.dot_dimension_numbers<[1], [0], [0], [1], [0, 0, 1, 1], [], []>} : vector<128x32xbf16>, vector<32x32xbf16>, vector<128x32xf32> -> vector<128x32xf32>
    %c4 = arith.constant 4 : index
    %c0_31 = arith.constant 0 : index
    %49 = vector.load %arg5[%c4, %c0_31] : memref<11x32xf32, #tpu.memory_space<vmem>>, vector<1x32xf32>
    %50 = vector.broadcast %49 : vector<1x32xf32> to vector<128x32xf32>
    %51 = arith.addf %48, %50 : vector<128x32xf32>
    %cst_32 = arith.constant 0.000000e+00 : f32
    %52 = vector.broadcast %cst_32 : f32 to vector<128x32xf32>
    %53 = arith.maximumf %51, %52 : vector<128x32xf32>
    %54 = arith.truncf %53 : vector<128x32xf32> to vector<128x32xbf16>
    %c120 = arith.constant 120 : index
    %c0_33 = arith.constant 0 : index
    %55 = vector.load %arg4[%c120, %c0_33] : memref<440x32xbf16, #tpu.memory_space<vmem>>, vector<32x32xbf16>
    %cst_34 = arith.constant dense<0.000000e+00> : vector<128x32xf32>
    %56 = tpu.matmul %54, %55, %cst_34 {dimension_numbers = #tpu.dot_dimension_numbers<[1], [0], [0], [1], [0, 0, 1, 1], [], []>} : vector<128x32xbf16>, vector<32x32xbf16>, vector<128x32xf32> -> vector<128x32xf32>
    %c5 = arith.constant 5 : index
    %c0_35 = arith.constant 0 : index
    %57 = vector.load %arg5[%c5, %c0_35] : memref<11x32xf32, #tpu.memory_space<vmem>>, vector<1x32xf32>
    %58 = vector.broadcast %57 : vector<1x32xf32> to vector<128x32xf32>
    %59 = arith.addf %56, %58 : vector<128x32xf32>
    %cst_36 = arith.constant 0.000000e+00 : f32
    %60 = vector.broadcast %cst_36 : f32 to vector<128x32xf32>
    %61 = arith.maximumf %59, %60 : vector<128x32xf32>
    %c6 = arith.constant 6 : index
    %c0_37 = arith.constant 0 : index
    %62 = vector.load %arg5[%c6, %c0_37] : memref<11x32xf32, #tpu.memory_space<vmem>>, vector<1x32xf32>
    %c7 = arith.constant 7 : index
    %c0_38 = arith.constant 0 : index
    %63 = vector.load %arg5[%c7, %c0_38] : memref<11x32xf32, #tpu.memory_space<vmem>>, vector<1x32xf32>
    %64 = vector.shape_cast %29 : vector<128x32xf32> to vector<8x16x32xf32>
    %65 = arith.truncf %64 : vector<8x16x32xf32> to vector<8x16x32xbf16>
    "tpu.trace_start"() <{level = 10 : i32, message = "brn,bnh->brh"}> : () -> ()
    %cst_39 = arith.constant dense<0.000000e+00> : vector<8x16x32xf32>
    %66 = tpu.matmul %1, %65, %cst_39 {dimension_numbers = #tpu.dot_dimension_numbers<[2], [1], [1], [2], [0, 0, 0, 1, 1, 2], [0], [0]>} : vector<8x16x16xbf16>, vector<8x16x32xbf16>, vector<8x16x32xf32> -> vector<8x16x32xf32>
    "tpu.trace_stop"() : () -> ()
    %67 = vector.shape_cast %66 : vector<8x16x32xf32> to vector<128x32xf32>
    "tpu.trace_start"() <{level = 10 : i32, message = "brn,bnh->brh"}> : () -> ()
    %cst_40 = arith.constant dense<0.000000e+00> : vector<8x16x32xf32>
    %68 = tpu.matmul %2, %65, %cst_40 {dimension_numbers = #tpu.dot_dimension_numbers<[2], [1], [1], [2], [0, 0, 0, 1, 1, 2], [0], [0]>} : vector<8x16x16xbf16>, vector<8x16x32xbf16>, vector<8x16x32xf32> -> vector<8x16x32xf32>
    "tpu.trace_stop"() : () -> ()
    %69 = vector.shape_cast %68 : vector<8x16x32xf32> to vector<128x32xf32>
    %70 = arith.truncf %61 : vector<128x32xf32> to vector<128x32xbf16>
    %c152 = arith.constant 152 : index
    %c0_41 = arith.constant 0 : index
    %71 = vector.load %arg4[%c152, %c0_41] : memref<440x32xbf16, #tpu.memory_space<vmem>>, vector<32x32xbf16>
    %cst_42 = arith.constant dense<0.000000e+00> : vector<128x32xf32>
    %72 = tpu.matmul %70, %71, %cst_42 {dimension_numbers = #tpu.dot_dimension_numbers<[1], [0], [0], [1], [0, 0, 1, 1], [], []>} : vector<128x32xbf16>, vector<32x32xbf16>, vector<128x32xf32> -> vector<128x32xf32>
    %73 = arith.truncf %67 : vector<128x32xf32> to vector<128x32xbf16>
    %c184 = arith.constant 184 : index
    %c0_43 = arith.constant 0 : index
    %74 = vector.load %arg4[%c184, %c0_43] : memref<440x32xbf16, #tpu.memory_space<vmem>>, vector<32x32xbf16>
    %cst_44 = arith.constant dense<0.000000e+00> : vector<128x32xf32>
    %75 = tpu.matmul %73, %74, %cst_44 {dimension_numbers = #tpu.dot_dimension_numbers<[1], [0], [0], [1], [0, 0, 1, 1], [], []>} : vector<128x32xbf16>, vector<32x32xbf16>, vector<128x32xf32> -> vector<128x32xf32>
    %76 = arith.addf %72, %75 : vector<128x32xf32>
    %77 = arith.truncf %69 : vector<128x32xf32> to vector<128x32xbf16>
    %c216 = arith.constant 216 : index
    %c0_45 = arith.constant 0 : index
    %78 = vector.load %arg4[%c216, %c0_45] : memref<440x32xbf16, #tpu.memory_space<vmem>>, vector<32x32xbf16>
    %cst_46 = arith.constant dense<0.000000e+00> : vector<128x32xf32>
    %79 = tpu.matmul %77, %78, %cst_46 {dimension_numbers = #tpu.dot_dimension_numbers<[1], [0], [0], [1], [0, 0, 1, 1], [], []>} : vector<128x32xbf16>, vector<32x32xbf16>, vector<128x32xf32> -> vector<128x32xf32>
    %80 = arith.addf %76, %79 : vector<128x32xf32>
    %81 = vector.broadcast %62 : vector<1x32xf32> to vector<128x32xf32>
    %82 = arith.addf %80, %81 : vector<128x32xf32>
    %cst_47 = arith.constant 0.000000e+00 : f32
    %83 = vector.broadcast %cst_47 : f32 to vector<128x32xf32>
    %84 = arith.maximumf %82, %83 : vector<128x32xf32>
    %85 = vector.shape_cast %84 : vector<128x32xf32> to vector<8x16x32xf32>
    %86 = arith.truncf %85 : vector<8x16x32xf32> to vector<8x16x32xbf16>
    "tpu.trace_start"() <{level = 10 : i32, message = "bnr,brh->bnh"}> : () -> ()
    %cst_48 = arith.constant dense<0.000000e+00> : vector<8x16x32xf32>
    %87 = tpu.matmul %5, %86, %cst_48 {dimension_numbers = #tpu.dot_dimension_numbers<[2], [1], [1], [2], [0, 0, 0, 1, 1, 2], [0], [0]>} : vector<8x16x16xbf16>, vector<8x16x32xbf16>, vector<8x16x32xf32> -> vector<8x16x32xf32>
    "tpu.trace_stop"() : () -> ()
    %88 = vector.shape_cast %87 : vector<8x16x32xf32> to vector<128x32xf32>
    %89 = arith.truncf %29 : vector<128x32xf32> to vector<128x32xbf16>
    %c248 = arith.constant 248 : index
    %c0_49 = arith.constant 0 : index
    %90 = vector.load %arg4[%c248, %c0_49] : memref<440x32xbf16, #tpu.memory_space<vmem>>, vector<32x32xbf16>
    %cst_50 = arith.constant dense<0.000000e+00> : vector<128x32xf32>
    %91 = tpu.matmul %89, %90, %cst_50 {dimension_numbers = #tpu.dot_dimension_numbers<[1], [0], [0], [1], [0, 0, 1, 1], [], []>} : vector<128x32xbf16>, vector<32x32xbf16>, vector<128x32xf32> -> vector<128x32xf32>
    %92 = arith.truncf %88 : vector<128x32xf32> to vector<128x32xbf16>
    %c280 = arith.constant 280 : index
    %c0_51 = arith.constant 0 : index
    %93 = vector.load %arg4[%c280, %c0_51] : memref<440x32xbf16, #tpu.memory_space<vmem>>, vector<32x32xbf16>
    %cst_52 = arith.constant dense<0.000000e+00> : vector<128x32xf32>
    %94 = tpu.matmul %92, %93, %cst_52 {dimension_numbers = #tpu.dot_dimension_numbers<[1], [0], [0], [1], [0, 0, 1, 1], [], []>} : vector<128x32xbf16>, vector<32x32xbf16>, vector<128x32xf32> -> vector<128x32xf32>
    %95 = arith.addf %91, %94 : vector<128x32xf32>
    %96 = vector.broadcast %63 : vector<1x32xf32> to vector<128x32xf32>
    %97 = arith.addf %95, %96 : vector<128x32xf32>
    %98 = arith.addf %97, %29 : vector<128x32xf32>
    %cst_53 = arith.constant 0.000000e+00 : f32
    %99 = vector.broadcast %cst_53 : f32 to vector<128x32xf32>
    %100 = arith.maximumf %98, %99 : vector<128x32xf32>
    %101 = vector.shape_cast %100 : vector<128x32xf32> to vector<8x16x32xf32>
    %102 = arith.truncf %101 : vector<8x16x32xf32> to vector<8x16x32xbf16>
    "tpu.trace_start"() <{level = 10 : i32, message = "brn,bnh->brh"}> : () -> ()
    %cst_54 = arith.constant dense<0.000000e+00> : vector<8x16x32xf32>
    %103 = tpu.matmul %1, %102, %cst_54 {dimension_numbers = #tpu.dot_dimension_numbers<[2], [1], [1], [2], [0, 0, 0, 1, 1, 2], [0], [0]>} : vector<8x16x16xbf16>, vector<8x16x32xbf16>, vector<8x16x32xf32> -> vector<8x16x32xf32>
    "tpu.trace_stop"() : () -> ()
    %104 = vector.shape_cast %103 : vector<8x16x32xf32> to vector<128x32xf32>
    "tpu.trace_start"() <{level = 10 : i32, message = "brn,bnh->brh"}> : () -> ()
    %cst_55 = arith.constant dense<0.000000e+00> : vector<8x16x32xf32>
    %105 = tpu.matmul %2, %102, %cst_55 {dimension_numbers = #tpu.dot_dimension_numbers<[2], [1], [1], [2], [0, 0, 0, 1, 1, 2], [0], [0]>} : vector<8x16x16xbf16>, vector<8x16x32xbf16>, vector<8x16x32xf32> -> vector<8x16x32xf32>
    "tpu.trace_stop"() : () -> ()
    %106 = vector.shape_cast %105 : vector<8x16x32xf32> to vector<128x32xf32>
    %107 = arith.truncf %61 : vector<128x32xf32> to vector<128x32xbf16>
    %c152_56 = arith.constant 152 : index
    %c0_57 = arith.constant 0 : index
    %108 = vector.load %arg4[%c152_56, %c0_57] : memref<440x32xbf16, #tpu.memory_space<vmem>>, vector<32x32xbf16>
    %cst_58 = arith.constant dense<0.000000e+00> : vector<128x32xf32>
    %109 = tpu.matmul %107, %108, %cst_58 {dimension_numbers = #tpu.dot_dimension_numbers<[1], [0], [0], [1], [0, 0, 1, 1], [], []>} : vector<128x32xbf16>, vector<32x32xbf16>, vector<128x32xf32> -> vector<128x32xf32>
    %110 = arith.truncf %104 : vector<128x32xf32> to vector<128x32xbf16>
    %c184_59 = arith.constant 184 : index
    %c0_60 = arith.constant 0 : index
    %111 = vector.load %arg4[%c184_59, %c0_60] : memref<440x32xbf16, #tpu.memory_space<vmem>>, vector<32x32xbf16>
    %cst_61 = arith.constant dense<0.000000e+00> : vector<128x32xf32>
    %112 = tpu.matmul %110, %111, %cst_61 {dimension_numbers = #tpu.dot_dimension_numbers<[1], [0], [0], [1], [0, 0, 1, 1], [], []>} : vector<128x32xbf16>, vector<32x32xbf16>, vector<128x32xf32> -> vector<128x32xf32>
    %113 = arith.addf %109, %112 : vector<128x32xf32>
    %114 = arith.truncf %106 : vector<128x32xf32> to vector<128x32xbf16>
    %c216_62 = arith.constant 216 : index
    %c0_63 = arith.constant 0 : index
    %115 = vector.load %arg4[%c216_62, %c0_63] : memref<440x32xbf16, #tpu.memory_space<vmem>>, vector<32x32xbf16>
    %cst_64 = arith.constant dense<0.000000e+00> : vector<128x32xf32>
    %116 = tpu.matmul %114, %115, %cst_64 {dimension_numbers = #tpu.dot_dimension_numbers<[1], [0], [0], [1], [0, 0, 1, 1], [], []>} : vector<128x32xbf16>, vector<32x32xbf16>, vector<128x32xf32> -> vector<128x32xf32>
    %117 = arith.addf %113, %116 : vector<128x32xf32>
    %118 = vector.broadcast %62 : vector<1x32xf32> to vector<128x32xf32>
    %119 = arith.addf %117, %118 : vector<128x32xf32>
    %cst_65 = arith.constant 0.000000e+00 : f32
    %120 = vector.broadcast %cst_65 : f32 to vector<128x32xf32>
    %121 = arith.maximumf %119, %120 : vector<128x32xf32>
    %122 = vector.shape_cast %121 : vector<128x32xf32> to vector<8x16x32xf32>
    %123 = arith.truncf %122 : vector<8x16x32xf32> to vector<8x16x32xbf16>
    "tpu.trace_start"() <{level = 10 : i32, message = "bnr,brh->bnh"}> : () -> ()
    %cst_66 = arith.constant dense<0.000000e+00> : vector<8x16x32xf32>
    %124 = tpu.matmul %5, %123, %cst_66 {dimension_numbers = #tpu.dot_dimension_numbers<[2], [1], [1], [2], [0, 0, 0, 1, 1, 2], [0], [0]>} : vector<8x16x16xbf16>, vector<8x16x32xbf16>, vector<8x16x32xf32> -> vector<8x16x32xf32>
    "tpu.trace_stop"() : () -> ()
    %125 = vector.shape_cast %124 : vector<8x16x32xf32> to vector<128x32xf32>
    %126 = arith.truncf %29 : vector<128x32xf32> to vector<128x32xbf16>
    %c248_67 = arith.constant 248 : index
    %c0_68 = arith.constant 0 : index
    %127 = vector.load %arg4[%c248_67, %c0_68] : memref<440x32xbf16, #tpu.memory_space<vmem>>, vector<32x32xbf16>
    %cst_69 = arith.constant dense<0.000000e+00> : vector<128x32xf32>
    %128 = tpu.matmul %126, %127, %cst_69 {dimension_numbers = #tpu.dot_dimension_numbers<[1], [0], [0], [1], [0, 0, 1, 1], [], []>} : vector<128x32xbf16>, vector<32x32xbf16>, vector<128x32xf32> -> vector<128x32xf32>
    %129 = arith.truncf %125 : vector<128x32xf32> to vector<128x32xbf16>
    %c280_70 = arith.constant 280 : index
    %c0_71 = arith.constant 0 : index
    %130 = vector.load %arg4[%c280_70, %c0_71] : memref<440x32xbf16, #tpu.memory_space<vmem>>, vector<32x32xbf16>
    %cst_72 = arith.constant dense<0.000000e+00> : vector<128x32xf32>
    %131 = tpu.matmul %129, %130, %cst_72 {dimension_numbers = #tpu.dot_dimension_numbers<[1], [0], [0], [1], [0, 0, 1, 1], [], []>} : vector<128x32xbf16>, vector<32x32xbf16>, vector<128x32xf32> -> vector<128x32xf32>
    %132 = arith.addf %128, %131 : vector<128x32xf32>
    %133 = vector.broadcast %63 : vector<1x32xf32> to vector<128x32xf32>
    %134 = arith.addf %132, %133 : vector<128x32xf32>
    %135 = arith.addf %134, %100 : vector<128x32xf32>
    %cst_73 = arith.constant 0.000000e+00 : f32
    %136 = vector.broadcast %cst_73 : f32 to vector<128x32xf32>
    %137 = arith.maximumf %135, %136 : vector<128x32xf32>
    %138 = vector.shape_cast %29 : vector<128x32xf32> to vector<8x16x32xf32>
    %139 = vector.extract_strided_slice %138 {offsets = [0, 0, 0], sizes = [8, 8, 32], strides = [1, 1, 1]} : vector<8x16x32xf32> to vector<8x8x32xf32>
    %140 = vector.shape_cast %139 : vector<8x8x32xf32> to vector<64x32xf32>
    %141 = vector.shape_cast %137 : vector<128x32xf32> to vector<8x16x32xf32>
    %142 = vector.extract_strided_slice %141 {offsets = [0, 0, 0], sizes = [8, 8, 32], strides = [1, 1, 1]} : vector<8x16x32xf32> to vector<8x8x32xf32>
    %143 = vector.shape_cast %142 : vector<8x8x32xf32> to vector<64x32xf32>
    %144 = arith.truncf %140 : vector<64x32xf32> to vector<64x32xbf16>
    %c312 = arith.constant 312 : index
    %c0_74 = arith.constant 0 : index
    %145 = vector.load %arg4[%c312, %c0_74] : memref<440x32xbf16, #tpu.memory_space<vmem>>, vector<32x32xbf16>
    %cst_75 = arith.constant dense<0.000000e+00> : vector<64x32xf32>
    %146 = tpu.matmul %144, %145, %cst_75 {dimension_numbers = #tpu.dot_dimension_numbers<[1], [0], [0], [1], [0, 0, 1, 1], [], []>} : vector<64x32xbf16>, vector<32x32xbf16>, vector<64x32xf32> -> vector<64x32xf32>
    %147 = arith.truncf %143 : vector<64x32xf32> to vector<64x32xbf16>
    %c344 = arith.constant 344 : index
    %c0_76 = arith.constant 0 : index
    %148 = vector.load %arg4[%c344, %c0_76] : memref<440x32xbf16, #tpu.memory_space<vmem>>, vector<32x32xbf16>
    %cst_77 = arith.constant dense<0.000000e+00> : vector<64x32xf32>
    %149 = tpu.matmul %147, %148, %cst_77 {dimension_numbers = #tpu.dot_dimension_numbers<[1], [0], [0], [1], [0, 0, 1, 1], [], []>} : vector<64x32xbf16>, vector<32x32xbf16>, vector<64x32xf32> -> vector<64x32xf32>
    %150 = arith.addf %146, %149 : vector<64x32xf32>
    %c8_78 = arith.constant 8 : index
    %c0_79 = arith.constant 0 : index
    %151 = vector.load %arg5[%c8_78, %c0_79] : memref<11x32xf32, #tpu.memory_space<vmem>>, vector<1x32xf32>
    %152 = vector.broadcast %151 : vector<1x32xf32> to vector<64x32xf32>
    %153 = arith.addf %150, %152 : vector<64x32xf32>
    %cst_80 = arith.constant 0.000000e+00 : f32
    %154 = vector.broadcast %cst_80 : f32 to vector<64x32xf32>
    %155 = arith.maximumf %153, %154 : vector<64x32xf32>
    %156 = arith.truncf %155 : vector<64x32xf32> to vector<64x32xbf16>
    %c376 = arith.constant 376 : index
    %c0_81 = arith.constant 0 : index
    %157 = vector.load %arg4[%c376, %c0_81] : memref<440x32xbf16, #tpu.memory_space<vmem>>, vector<32x32xbf16>
    %cst_82 = arith.constant dense<0.000000e+00> : vector<64x32xf32>
    %158 = tpu.matmul %156, %157, %cst_82 {dimension_numbers = #tpu.dot_dimension_numbers<[1], [0], [0], [1], [0, 0, 1, 1], [], []>} : vector<64x32xbf16>, vector<32x32xbf16>, vector<64x32xf32> -> vector<64x32xf32>
    %c9 = arith.constant 9 : index
    %c0_83 = arith.constant 0 : index
    %159 = vector.load %arg5[%c9, %c0_83] : memref<11x32xf32, #tpu.memory_space<vmem>>, vector<1x32xf32>
    %160 = vector.broadcast %159 : vector<1x32xf32> to vector<64x32xf32>
    %161 = arith.addf %158, %160 : vector<64x32xf32>
    %cst_84 = arith.constant 0.000000e+00 : f32
    %162 = vector.broadcast %cst_84 : f32 to vector<64x32xf32>
    %163 = arith.maximumf %161, %162 : vector<64x32xf32>
    %164 = arith.truncf %163 : vector<64x32xf32> to vector<64x32xbf16>
    %c408 = arith.constant 408 : index
    %c0_85 = arith.constant 0 : index
    %165 = vector.load %arg4[%c408, %c0_85] : memref<440x32xbf16, #tpu.memory_space<vmem>>, vector<32x32xbf16>
    %cst_86 = arith.constant dense<0.000000e+00> : vector<64x32xf32>
    %166 = tpu.matmul %164, %165, %cst_86 {dimension_numbers = #tpu.dot_dimension_numbers<[1], [0], [0], [1], [0, 0, 1, 1], [], []>} : vector<64x32xbf16>, vector<32x32xbf16>, vector<64x32xf32> -> vector<64x32xf32>
    %c10 = arith.constant 10 : index
    %c0_87 = arith.constant 0 : index
    %167 = vector.load %arg5[%c10, %c0_87] : memref<11x32xf32, #tpu.memory_space<vmem>>, vector<1x32xf32>
    %168 = vector.broadcast %167 : vector<1x32xf32> to vector<64x32xf32>
    %169 = arith.addf %166, %168 : vector<64x32xf32>
    %170 = vector.shape_cast %169 : vector<64x32xf32> to vector<8x8x32xf32>
    %171 = arith.truncf %170 : vector<8x8x32xf32> to vector<8x8x32xbf16>
    %c0_88 = arith.constant 0 : index
    %c0_89 = arith.constant 0 : index
    %c0_90 = arith.constant 0 : index
    %172 = vector.load %arg6[%c0_88, %c0_89, %c0_90] : memref<8x8x32xbf16, #tpu.memory_space<vmem>>, vector<8x8x32xbf16>
    tpu.vector_store %arg6[%c0_88, %c0_89, %c0_90], %171 {strides = array<i32>} : memref<8x8x32xbf16, #tpu.memory_space<vmem>>, vector<8x8x32xbf16>,
    return
  }
  func.func @transform_0(%arg0: i32) -> (i32, i32, i32) {
    %c0_i32 = arith.constant 0 : i32
    %c0_i32_0 = arith.constant 0 : i32
    %c0_i32_1 = arith.constant 0 : i32
    return %arg0, %c0_i32, %c0_i32_0 : i32, i32, i32
  }
  func.func @transform_1(%arg0: i32) -> (i32, i32, i32) {
    %c0_i32 = arith.constant 0 : i32
    %c0_i32_0 = arith.constant 0 : i32
    %c0_i32_1 = arith.constant 0 : i32
    return %arg0, %c0_i32, %c0_i32_0 : i32, i32, i32
  }
  func.func @transform_2(%arg0: i32) -> (i32, i32, i32) {
    %c0_i32 = arith.constant 0 : i32
    %c0_i32_0 = arith.constant 0 : i32
    %c0_i32_1 = arith.constant 0 : i32
    return %arg0, %c0_i32, %c0_i32_0 : i32, i32, i32
  }
  func.func @transform_3(%arg0: i32) -> (i32, i32) {
    %c0_i32 = arith.constant 0 : i32
    %c0_i32_0 = arith.constant 0 : i32
    %c0_i32_1 = arith.constant 0 : i32
    return %c0_i32, %c0_i32_0 : i32, i32
  }
  func.func @transform_4(%arg0: i32) -> (i32, i32) {
    %c0_i32 = arith.constant 0 : i32
    %c0_i32_0 = arith.constant 0 : i32
    %c0_i32_1 = arith.constant 0 : i32
    return %c0_i32, %c0_i32_0 : i32, i32
  }
  func.func @transform_5(%arg0: i32) -> (i32, i32, i32) {
    %c0_i32 = arith.constant 0 : i32
    %c0_i32_0 = arith.constant 0 : i32
    %c0_i32_1 = arith.constant 0 : i32
    return %arg0, %c0_i32, %c0_i32_0 : i32, i32, i32
  }
}

</mosaic_0001>

<bundles_post_ra>
// kernel: tpu_custom_call.1
= control target key start
LH: loop header
LB: loop body
LE: loop exit
PB: predicated region body
PF: predicated region fallthrough
CT: control target
= control target key end

     0   :  { %vm421_vm0 = vcmask 1043456   ;;  %vm396_vm1 = vcmask 64512   ;;  %s9264_s0 = inlined_call_operand.vmem [shape: bf16[8,16,8], index: 0, kind: input, shape index: {}]   ;;  %s9265_s1 = inlined_call_operand.vmem [shape: bf16[8,16,16], index: 1, kind: input, shape index: {}]   ;;  %s9266_s2 = inlined_call_operand.vmem [shape: bf16[8,16,16], index: 2, kind: input, shape index: {}]   ;;  %s9267_s3 = inlined_call_operand.vmem [shape: bf16[440,32], index: 3, kind: input, shape index: {}]   ;;  %s9268_s4 = inlined_call_operand.vmem [shape: f32[11,32], index: 4, kind: input, shape index: {}]   ;;  %s9269_s5 = inlined_call_operand.hbm [shape: bf16[8,8,32], index: 5, kind: output, shape index: {}]  }
   0x1   :  { %v350_v0 = vld [vmem:[%s9267_s3] sm:$0xf]  ;;  %v7887_v3 = vld [vmem:[%s9264_s0 + $0x8] sm:$0xff]   ;;  %v7892_v4 = vld [vmem:[%s9264_s0 + $0x10] sm:$0xff]  }
   0x2   :  { %v7878_v1 = vld [vmem:[%s9264_s0] sm:$0xff]   ;;  %7695 = vmatprep.subr.msk.bf16.mxu0 %vm421_vm0, %v350_v0  ;;  %v423_v2 = vsel %vm421_vm0, %v350_v0, 0  ;;  %v7901_v5 = vld [vmem:[%s9264_s0 + $0x18] sm:$0xff]   ;;  %v7915_v7 = vld [vmem:[%s9264_s0 + $0x28] sm:$0xff]  }
   0x3   :  { %6930 = vmatpush3.bf16.msra.mxu0 %v423_v2  ;;  %6931 = vmatprep.mubr.msk.bf16.mxu0 %vm396_vm1, %v7878_v1  ;;  %v7906_v6 = vld [vmem:[%s9264_s0 + $0x20] sm:$0xff]   ;;  %v7920_v8 = vld [vmem:[%s9264_s0 + $0x30] sm:$0xff]   ;;  %v7929_v9 = vld [vmem:[%s9264_s0 + $0x38] sm:$0xff]  }
   0x6   :  { %6932 = vmatmul.mubr.msk.bf16.vlgmr.msra.gmra.mxu0 %vm396_vm1, %v7887_v3 }
   0x7   :  { %6935 = vmatprep.mubr.msk.bf16.mxu0 %vm396_vm1, %v7892_v4 }
   0xe   :  { %6936 = vmatmul.mubr.msk.bf16.gmra.mxu0 %vm396_vm1, %v7901_v5 }
   0xf   :  { %6939 = vmatprep.mubr.msk.bf16.mxu0 %vm396_vm1, %v7906_v6 }
  0x16   :  { %6940 = vmatmul.mubr.msk.bf16.gmra.mxu0 %vm396_vm1, %v7915_v7 }
  0x17   :  { %6943 = vmatprep.mubr.msk.bf16.mxu0 %vm396_vm1, %v7920_v8 }
  0x1e   :  { %6944 = vmatmul.mubr.msk.bf16.gmra.mxu0 %vm396_vm1, %v7929_v9 }
  0x1f   :  { %10 = vsyncpa [#allocation3], 0  ;;  %v7739_v10 = vld [vmem:[%s9267_s3 + $0xc] sm:$0xff]   ;;  %v7740_v11 = vld [vmem:[%s9267_s3 + $0x4] sm:$0xff]   ;;  %vm567_vm2 = vcmask 261120   ;;  %vm7838_vm3 = vmmov 0  }
  0x20   :  { %6947 = vmatprep.subr.bf16.mxu1 %v7739_v10  ;;  %v6323_v14 = vld [vmem:[%s9268_s4] ss:$0 sm:$0xff]  ;;  %vm877_vm4 = vcmask 130048   ;;  %vm6298_vm5 = vcmask 257024  }
  0x21   :  { %6948 = vmatpush3.bf16.msra.mxu1 %v7739_v10 }
  0x22   :  { %6949 = vmatprep.subr.bf16.mxu1 %v7740_v11 }
  0x25   :  { %6950 = vmatpush3.bf16.msra.mxu1 %v7740_v11 }
  0xc6   :  { %v6933_v12 = vpop.f32.mrf.mxu0 }
  0xc7   :  { %v468_v18 = vadd.f32 %v6933_v12, %v6323_v14 }
  0xc8   :  { %v459_v13 = vpop.f32.mrf.mxu0 }
  0xc9   :  { %v460_v16 = vadd.f32 %v6323_v14, %v459_v13  ;;  %v524_v25 = vmax.f32 %v468_v18, 0.0  ;;  %v9278_v13 = vmov 0.0   ;;  %v7987_v18 = vld [vmem:[%s9265_s1 + $0x10] sm:$0xff]  }
  0xca   :  { %v6934_v15 = vpop.f32.mrf.mxu0  ;;  %6987 = vmatprep.subr.bf16.mxu1 %v9278_v13  ;;  %9330 = vst [vmem:[#allocation6_spill] sm:$0xff] %v7987_v18 }
  0xcb   :  { %v471_v17 = vadd.f32 %v6934_v15, %v6323_v14  ;;  %v522_v23 = vmax.f32 %v460_v16, 0.0  ;;  %v7955_v15 = vld [vmem:[%s9265_s1] sm:$0xff]   ;;  %v7743_v16 = vld [vmem:[%s9267_s3 + $0x14] sm:$0xff]  }
  0xcc   :  { %v462_v19 = vpop.f32.mrf.mxu0  ;;  %9329 = vst [vmem:[#allocation5_spill] sm:$0xff] %v7955_v15 }
  0xcd   :  { %v463_v20 = vadd.f32 %v6323_v14, %v462_v19  ;;  %v525_v21 = vmax.f32 %v471_v17, 0.0  ;;  %v7975_v17 = vld [vmem:[%s9265_s1 + $0x8] sm:$0xff]   ;;  %v7998_v19 = vld [vmem:[%s9265_s1 + $0x18] sm:$0xff]  }
  0xce   :  { %v6937_v22 = vpop.f32.mrf.mxu0  ;;  %9331 = vst [vmem:[#allocation7_spill] sm:$0xff] %v7998_v19 }
  0xcf   :  { %v523_v24 = vmax.f32 %v463_v20, 0.0  ;;  %v539_v28 = vpack.c.bf16 %v525_v21, %v524_v25  ;;  %v484_v32 = vadd.f32 %v6937_v22, %v6323_v14  ;;  %v8009_v20 = vld [vmem:[%s9265_s1 + $0x28] sm:$0xff]   ;;  %v8020_v21 = vld [vmem:[%s9265_s1 + $0x38] sm:$0xff]   ;;  %v6340_v25 = vld [vmem:[%s9268_s4 + $0x1] ss:$0 sm:$0xff] }
  0xd0   :  { %v475_v26 = vpop.f32.mrf.mxu0  ;;  %9332 = vst [vmem:[#allocation8_spill] sm:$0xff] %v8009_v20  ;;  %9333 = vst [vmem:[#allocation9_spill] sm:$0xff] %v8020_v21  ;;  %v8031_v22 = vld [vmem:[%s9266_s2 + $0x8] sm:$0xff]  }
  0xd1   :  { %v538_v27 = vpack.c.bf16 %v523_v24, %v522_v23  ;;  %v476_v30 = vadd.f32 %v6323_v14, %v475_v26  ;;  %v528_v39 = vmax.f32 %v484_v32, 0.0 }
  0xd2   :  { %v6938_v29 = vpop.f32.mrf.mxu0 }
  0xd3   :  { %v487_v31 = vadd.f32 %v6938_v29, %v6323_v14  ;;  %6951 = vmatprep.mubr.msk.bf16.mxu1 %vm567_vm2, %v538_v27  ;;  %v526_v37 = vmax.f32 %v476_v30, 0.0 }
  0xd4   :  { %v478_v33 = vpop.f32.mrf.mxu0  ;;  %6952 = vmatmul.mubr.msk.bf16.vlgmr.msra.gmra.mxu1 %vm567_vm2, %v539_v28 }
  0xd5   :  { %v479_v34 = vadd.f32 %v6323_v14, %v478_v33  ;;  %v529_v35 = vmax.f32 %v487_v31, 0.0  ;;  %6988 = vmatpush3.bf16.msra.mxu1 %v7878_v1 }
  0xd6   :  { %v6941_v36 = vpop.f32.mrf.mxu0  ;;  %6993 = vmatprep.subr.bf16.mxu1 %v9278_v13 }
  0xd7   :  { %v527_v38 = vmax.f32 %v479_v34, 0.0  ;;  %v541_v42 = vpack.c.bf16 %v529_v35, %v528_v39  ;;  %v500_v46 = vadd.f32 %v6941_v36, %v6323_v14 }
  0xd8   :  { %v491_v40 = vpop.f32.mrf.mxu0 }
  0xd9   :  { %v540_v41 = vpack.c.bf16 %v527_v38, %v526_v37  ;;  %v492_v44 = vadd.f32 %v6323_v14, %v491_v40  ;;  %v532_v53 = vmax.f32 %v500_v46, 0.0 }
  0xda   :  { %v6942_v43 = vpop.f32.mrf.mxu0 }
  0xdb   :  { %v503_v45 = vadd.f32 %v6942_v43, %v6323_v14  ;;  %6955 = vmatprep.mubr.msk.bf16.mxu1 %vm567_vm2, %v540_v41  ;;  %v530_v51 = vmax.f32 %v492_v44, 0.0 }
  0xdc   :  { %v494_v47 = vpop.f32.mrf.mxu0  ;;  %6956 = vmatmul.mubr.msk.bf16.gmra.mxu1 %vm567_vm2, %v541_v42 }
  0xdd   :  { %v495_v48 = vadd.f32 %v6323_v14, %v494_v47  ;;  %v533_v49 = vmax.f32 %v503_v45, 0.0 }
  0xde   :  { %v6945_v50 = vpop.f32.mrf.mxu0 }
  0xdf   :  { %v531_v52 = vmax.f32 %v495_v48, 0.0  ;;  %v543_v56 = vpack.c.bf16 %v533_v49, %v532_v53  ;;  %v516_v60 = vadd.f32 %v6945_v50, %v6323_v14 }
  0xe0   :  { %v507_v54 = vpop.f32.mrf.mxu0 }
  0xe1   :  { %v542_v55 = vpack.c.bf16 %v531_v52, %v530_v51  ;;  %v508_v58 = vadd.f32 %v6323_v14, %v507_v54  ;;  %v536_v10 = vmax.f32 %v516_v60, 0.0 }
  0xe2   :  { %v6946_v57 = vpop.f32.mrf.mxu0 }
  0xe3   :  { %v519_v59 = vadd.f32 %v6946_v57, %v6323_v14  ;;  %6959 = vmatprep.mubr.msk.bf16.mxu1 %vm567_vm2, %v542_v55  ;;  %v534_v0 = vmax.f32 %v508_v58, 0.0 }
  0xe4   :  { %v510_v61 = vpop.f32.mrf.mxu0  ;;  %6960 = vmatmul.mubr.msk.bf16.gmra.mxu1 %vm567_vm2, %v543_v56 }
  0xe5   :  { %v511_v62 = vadd.f32 %v6323_v14, %v510_v61  ;;  %v537_v63 = vmax.f32 %v519_v59, 0.0  ;;  %v7742_v14 = vld [vmem:[%s9267_s3 + $0x1c] sm:$0xff]  }
  0xe6   :  { %6967 = vmatprep.subr.bf16.mxu0 %v7742_v14 }
  0xe7   :  { %v535_v2 = vmax.f32 %v511_v62, 0.0  ;;  %v545_v12 = vpack.c.bf16 %v537_v63, %v536_v10  ;;  %6968 = vmatpush3.bf16.msra.mxu0 %v7742_v14 }
  0xe8   :  { %6969 = vmatprep.subr.bf16.mxu0 %v7743_v16 }
  0xe9   :  { %v544_v11 = vpack.c.bf16 %v535_v2, %v534_v0 }
  0xeb   :  { %6963 = vmatprep.mubr.msk.bf16.mxu1 %vm567_vm2, %v544_v11  ;;  %6970 = vmatpush3.bf16.msra.mxu0 %v7743_v16 }
  0xec   :  { %6964 = vmatmul.mubr.msk.bf16.gmra.mxu1 %vm567_vm2, %v545_v12  ;;  %7011 = vmatprep.subr.bf16.mxu0 %v9278_v13 }
  0xed   :  { %6989 = vmatprep.mubr.msk.bf16.mxu1 %vm7838_vm3, %v9278_v13 }
  0xf4   :  { %6990 = vmatmul.mubr.msk.bf16.vlgmr.msra.gmra.mxu1 %vm877_vm4, %v7955_v15 }
  0xf5   :  { %6994 = vmatpush3.bf16.msra.mxu1 %v7887_v3  ;;  %6995 = vmatprep.mubr.msk.bf16.mxu1 %vm7838_vm3, %v9278_v13 }
  0xf6   :  { %6999 = vmatprep.subr.bf16.mxu1 %v9278_v13 }
  0xfc   :  { %6996 = vmatmul.mubr.msk.bf16.vlgmr.msra.gmra.mxu1 %vm877_vm4, %v7975_v17 }
  0xfd   :  { %7000 = vmatpush3.bf16.msra.mxu1 %v7892_v4  ;;  %7001 = vmatprep.mubr.msk.bf16.mxu1 %vm7838_vm3, %v9278_v13 }
  0xfe   :  { %7005 = vmatprep.subr.bf16.mxu1 %v9278_v13 }
 0x104   :  { %7002 = vmatmul.mubr.msk.bf16.vlgmr.msra.gmra.mxu1 %vm877_vm4, %v7987_v18 }
 0x105   :  { %7006 = vmatpush3.bf16.msra.mxu1 %v7901_v5  ;;  %7007 = vmatprep.mubr.msk.bf16.mxu1 %vm7838_vm3, %v9278_v13 }
 0x106   :  { %7017 = vmatprep.subr.bf16.mxu1 %v9278_v13 }
 0x10c   :  { %7008 = vmatmul.mubr.msk.bf16.vlgmr.msra.gmra.mxu1 %vm877_vm4, %v7998_v19 }
 0x10d   :  { %7018 = vmatpush3.bf16.msra.mxu1 %v7915_v7  ;;  %7019 = vmatprep.mubr.msk.bf16.mxu1 %vm7838_vm3, %v9278_v13 }
 0x10e   :  { %7029 = vmatprep.subr.bf16.mxu1 %v9278_v13 }
 0x114   :  { %7020 = vmatmul.mubr.msk.bf16.vlgmr.msra.gmra.mxu1 %vm877_vm4, %v8009_v20 }
 0x115   :  { %7030 = vmatpush3.bf16.msra.mxu1 %v7929_v9  ;;  %7031 = vmatprep.mubr.msk.bf16.mxu1 %vm7838_vm3, %v9278_v13 }
 0x116   :  { %7041 = vmatprep.subr.bf16.mxu1 %v9278_v13 }
 0x11c   :  { %7032 = vmatmul.mubr.msk.bf16.vlgmr.msra.gmra.mxu1 %vm877_vm4, %v8020_v21 }
 0x11d   :  { %7042 = vmatpush3.bf16.msra.mxu1 %v7887_v3  ;;  %7043 = vmatprep.mubr.msk.bf16.mxu1 %vm7838_vm3, %v9278_v13  ;;  %v8042_v3 = vld [vmem:[%s9266_s2 + $0x18] sm:$0xff]  }
 0x11e   :  { %7053 = vmatprep.subr.bf16.mxu1 %v9278_v13 }
 0x124   :  { %7044 = vmatmul.mubr.msk.bf16.vlgmr.msra.gmra.mxu1 %vm877_vm4, %v8031_v22 }
 0x125   :  { %7054 = vmatpush3.bf16.msra.mxu1 %v7901_v5  ;;  %7055 = vmatprep.mubr.msk.bf16.mxu1 %vm7838_vm3, %v9278_v13  ;;  %v8053_v5 = vld [vmem:[%s9266_s2 + $0x28] sm:$0xff]  }
 0x126   :  { %7065 = vmatprep.subr.bf16.mxu1 %v9278_v13 }
 0x12c   :  { %7056 = vmatmul.mubr.msk.bf16.vlgmr.msra.gmra.mxu1 %vm877_vm4, %v8042_v3 }
 0x12d   :  { %7066 = vmatpush3.bf16.msra.mxu1 %v7915_v7  ;;  %7067 = vmatprep.mubr.msk.bf16.mxu1 %vm7838_vm3, %v9278_v13  ;;  %v8063_v7 = vld [vmem:[%s9266_s2 + $0x38] sm:$0xff]  }
 0x12e   :  { %7077 = vmatprep.subr.bf16.mxu1 %v9278_v13 }
 0x134   :  { %7068 = vmatmul.mubr.msk.bf16.vlgmr.msra.gmra.mxu1 %vm877_vm4, %v8053_v5 }
 0x135   :  { %7078 = vmatpush3.bf16.msra.mxu1 %v7929_v9  ;;  %7079 = vmatprep.mubr.msk.bf16.mxu1 %vm7838_vm3, %v9278_v13 }
 0x13c   :  { %7080 = vmatmul.mubr.msk.bf16.vlgmr.msra.gmra.mxu1 %vm877_vm4, %v8063_v7 }
 0x194   :  { %v6953_v23 = vpop.f32.mrf.mxu1 }
 0x195   :  { %v635_v28 = vadd.f32 %v6953_v23, %v6340_v25 }
 0x196   :  { %v626_v24 = vpop.f32.mrf.mxu1 }
 0x197   :  { %v627_v27 = vadd.f32 %v6340_v25, %v626_v24  ;;  %v691_v35 = vmax.f32 %v635_v28, 0.0 }
 0x198   :  { %v6954_v26 = vpop.f32.mrf.mxu1 }
 0x199   :  { %v638_v9 = vadd.f32 %v6954_v26, %v6340_v25  ;;  %v689_v33 = vmax.f32 %v627_v27, 0.0 }
 0x19a   :  { %v629_v29 = vpop.f32.mrf.mxu1 }
 0x19b   :  { %v630_v30 = vadd.f32 %v6340_v25, %v629_v29  ;;  %v692_v31 = vmax.f32 %v638_v9, 0.0 }
 0x19c   :  { %v6957_v32 = vpop.f32.mrf.mxu1 }
 0x19d   :  { %v690_v34 = vmax.f32 %v630_v30, 0.0  ;;  %v706_v38 = vpack.c.bf16 %v692_v31, %v691_v35  ;;  %v651_v42 = vadd.f32 %v6957_v32, %v6340_v25  ;;  %v8085_v31 = vld [vmem:[%s9265_s1 + $0x20] sm:$0xff]  }
 0x19e   :  { %v642_v36 = vpop.f32.mrf.mxu1  ;;  %9334 = vst [vmem:[#allocation10_spill] sm:$0xff] %v8085_v31  ;;  %v8107_v32 = vld [vmem:[%s9266_s2] sm:$0xff]  }
 0x19f   :  { %v705_v37 = vpack.c.bf16 %v690_v34, %v689_v33  ;;  %v643_v40 = vadd.f32 %v6340_v25, %v642_v36  ;;  %v695_v49 = vmax.f32 %v651_v42, 0.0  ;;  %v8129_v35 = vld [vmem:[%s9266_s2 + $0x20] sm:$0xff]   ;;  %v8145_v42 = vld [vmem:[%s9266_s2 + $0x30] sm:$0xff]  }
 0x1a0   :  { %v6958_v39 = vpop.f32.mrf.mxu1 }
 0x1a1   :  { %v654_v41 = vadd.f32 %v6958_v39, %v6340_v25  ;;  %6971 = vmatprep.mubr.msk.bf16.mxu0 %vm567_vm2, %v705_v37  ;;  %v693_v47 = vmax.f32 %v643_v40, 0.0  ;;  %v1672_v39 = vld [vmem:[%s9267_s3 + $0x24] sm:$0xf] }
 0x1a2   :  { %v645_v43 = vpop.f32.mrf.mxu1  ;;  %6972 = vmatmul.mubr.msk.bf16.vlgmr.msra.gmra.mxu0 %vm567_vm2, %v706_v38  ;;  %7697 = vmatprep.subr.msk.bf16.mxu1 %vm421_vm0, %v1672_v39  ;;  %v1831_v40 = vsel %vm421_vm0, %v1672_v39, 0  ;;  %v8196_v39 = vld [vmem:[%s9268_s4 + $0x2] ss:$0 sm:$0xff] }
 0x1a3   :  { %v646_v44 = vadd.f32 %v6340_v25, %v645_v43  ;;  %7012 = vmatpush3.bf16.msra.mxu0 %v7906_v6  ;;  %v696_v45 = vmax.f32 %v654_v41, 0.0  ;;  %7102 = vmatpush3.bf16.msra.mxu1 %v1831_v40 }
 0x1a4   :  { %v6961_v46 = vpop.f32.mrf.mxu1  ;;  %7023 = vmatprep.subr.bf16.mxu0 %v9278_v13 }
 0x1a5   :  { %v694_v48 = vmax.f32 %v646_v44, 0.0  ;;  %v708_v52 = vpack.c.bf16 %v696_v45, %v695_v49  ;;  %v667_v56 = vadd.f32 %v6961_v46, %v6340_v25 }
 0x1a6   :  { %v658_v50 = vpop.f32.mrf.mxu1 }
 0x1a7   :  { %v707_v51 = vpack.c.bf16 %v694_v48, %v693_v47  ;;  %v659_v54 = vadd.f32 %v6340_v25, %v658_v50  ;;  %v699_v63 = vmax.f32 %v667_v56, 0.0 }
 0x1a8   :  { %v6962_v53 = vpop.f32.mrf.mxu1 }
 0x1a9   :  { %v670_v55 = vadd.f32 %v6962_v53, %v6340_v25  ;;  %6975 = vmatprep.mubr.msk.bf16.mxu0 %vm567_vm2, %v707_v51  ;;  %v697_v61 = vmax.f32 %v659_v54, 0.0 }
 0x1aa   :  { %v661_v57 = vpop.f32.mrf.mxu1  ;;  %6976 = vmatmul.mubr.msk.bf16.gmra.mxu0 %vm567_vm2, %v708_v52 }
 0x1ab   :  { %v662_v58 = vadd.f32 %v6340_v25, %v661_v57  ;;  %v700_v59 = vmax.f32 %v670_v55, 0.0 }
 0x1ac   :  { %v6965_v60 = vpop.f32.mrf.mxu1 }
 0x1ad   :  { %v698_v62 = vmax.f32 %v662_v58, 0.0  ;;  %v710_v10 = vpack.c.bf16 %v700_v59, %v699_v63  ;;  %v683_v16 = vadd.f32 %v6965_v60, %v6340_v25 }
 0x1ae   :  { %v674_v0 = vpop.f32.mrf.mxu1 }
 0x1af   :  { %v709_v2 = vpack.c.bf16 %v698_v62, %v697_v61  ;;  %v675_v12 = vadd.f32 %v6340_v25, %v674_v0  ;;  %v703_v28 = vmax.f32 %v683_v16, 0.0  ;;  %v1681_v16 = vld [vmem:[%s9267_s3 + $0x28] sm:$0xf] }
 0x1b0   :  { %v6966_v11 = vpop.f32.mrf.mxu1 }
 0x1b1   :  { %v686_v14 = vadd.f32 %v6966_v11, %v6340_v25  ;;  %6979 = vmatprep.mubr.msk.bf16.mxu0 %vm567_vm2, %v709_v2  ;;  %v701_v27 = vmax.f32 %v675_v12, 0.0 }
 0x1b2   :  { %v677_v23 = vpop.f32.mrf.mxu1  ;;  %6980 = vmatmul.mubr.msk.bf16.gmra.mxu0 %vm567_vm2, %v710_v10 }
 0x1b3   :  { %v678_v24 = vadd.f32 %v6340_v25, %v677_v23  ;;  %v704_v26 = vmax.f32 %v686_v14, 0.0  ;;  %v8095_v25 = vld [vmem:[%s9265_s1 + $0x30] sm:$0xff]   ;;  %v1707_v23 = vsel %vm421_vm0, %v1681_v16, 0 }
 0x1b4   :  { %9335 = vst [vmem:[#allocation11_spill] sm:$0xff] %v8095_v25  ;;  %v915_v33 = vpop.f32.mrf.mxu1 }
 0x1b5   :  { %v702_v9 = vmax.f32 %v678_v24, 0.0  ;;  %v712_v30 = vpack.c.bf16 %v704_v26, %v703_v28 }
 0x1b7   :  { %v711_v29 = vpack.c.bf16 %v702_v9, %v701_v27 }
 0x1b9   :  { %6983 = vmatprep.mubr.msk.bf16.mxu0 %vm567_vm2, %v711_v29 }
 0x1ba   :  { %6984 = vmatmul.mubr.msk.bf16.gmra.mxu0 %vm567_vm2, %v712_v30 }
 0x1bb   :  { %7013 = vmatprep.mubr.msk.bf16.mxu0 %vm7838_vm3, %v9278_v13 }
 0x1c2   :  { %7014 = vmatmul.mubr.msk.bf16.vlgmr.msra.gmra.mxu0 %vm877_vm4, %v8085_v31 }
 0x1c3   :  { %7024 = vmatpush3.bf16.msra.mxu0 %v7920_v8  ;;  %7025 = vmatprep.mubr.msk.bf16.mxu0 %vm7838_vm3, %v9278_v13 }
 0x1c4   :  { %7035 = vmatprep.subr.bf16.mxu0 %v9278_v13 }
 0x1ca   :  { %7026 = vmatmul.mubr.msk.bf16.vlgmr.msra.gmra.mxu0 %vm877_vm4, %v8095_v25 }
 0x1cb   :  { %7036 = vmatpush3.bf16.msra.mxu0 %v7878_v1  ;;  %7037 = vmatprep.mubr.msk.bf16.mxu0 %vm7838_vm3, %v9278_v13  ;;  %v8118_v1 = vld [vmem:[%s9266_s2 + $0x10] sm:$0xff]  }
 0x1cc   :  { %7047 = vmatprep.subr.bf16.mxu0 %v9278_v13 }
 0x1d2   :  { %7038 = vmatmul.mubr.msk.bf16.vlgmr.msra.gmra.mxu0 %vm877_vm4, %v8107_v32 }
 0x1d3   :  { %7048 = vmatpush3.bf16.msra.mxu0 %v7892_v4  ;;  %7049 = vmatprep.mubr.msk.bf16.mxu0 %vm7838_vm3, %v9278_v13  ;;  %v6991_v4 = vpop.f32.mrf.mxu1 }
 0x1d4   :  { %7059 = vmatprep.subr.bf16.mxu0 %v9278_v13 }
 0x1d5   :  { %v918_v34 = vpop.f32.mrf.mxu1 }
 0x1d6   :  { %v1664_v36 = vpack.c.bf16 %v918_v34, %v915_v33 }
 0x1d7   :  { %v6992_v37 = vpop.f32.mrf.mxu1 }
 0x1d8   :  { %7103 = vmatprep.mubr.msk.bf16.mxu1 %vm396_vm1, %v1664_v36 }
 0x1d9   :  { %v965_v38 = vpop.f32.mrf.mxu1 }
 0x1da   :  { %7050 = vmatmul.mubr.msk.bf16.vlgmr.msra.gmra.mxu0 %vm877_vm4, %v8118_v1 }
 0x1db   :  { %7060 = vmatpush3.bf16.msra.mxu0 %v7906_v6  ;;  %7061 = vmatprep.mubr.msk.bf16.mxu0 %vm7838_vm3, %v9278_v13  ;;  %v6997_v6 = vpop.f32.mrf.mxu1 }
 0x1dc   :  { %7071 = vmatprep.subr.bf16.mxu0 %v9278_v13 }
 0x1dd   :  { %v968_v41 = vpop.f32.mrf.mxu1 }
 0x1df   :  { %v6998_v43 = vpop.f32.mrf.mxu1 }
 0x1e1   :  { %v1015_v44 = vpop.f32.mrf.mxu1 }
 0x1e2   :  { %7062 = vmatmul.mubr.msk.bf16.vlgmr.msra.gmra.mxu0 %vm877_vm4, %v8129_v35 }
 0x1e3   :  { %7072 = vmatpush3.bf16.msra.mxu0 %v7920_v8  ;;  %7073 = vmatprep.mubr.msk.bf16.mxu0 %vm7838_vm3, %v9278_v13  ;;  %v1665_v8 = vpack.c.bf16 %v968_v41, %v965_v38  ;;  %v7003_v45 = vpop.f32.mrf.mxu1 }
 0x1e4   :  { %7696 = vmatprep.subr.msk.bf16.mxu0 %vm421_vm0, %v1681_v16 }
 0x1e5   :  { %7104 = vmatmul.mubr.msk.bf16.vlgmr.msra.gmra.mxu1 %vm396_vm1, %v1665_v8  ;;  %v1018_v46 = vpop.f32.mrf.mxu1 }
 0x1e6   :  { %v1666_v48 = vpack.c.bf16 %v1018_v46, %v1015_v44 }
 0x1e7   :  { %v7004_v47 = vpop.f32.mrf.mxu1 }
 0x1e8   :  { %7107 = vmatprep.mubr.msk.bf16.mxu1 %vm396_vm1, %v1666_v48 }
 0x1e9   :  { %v1065_v49 = vpop.f32.mrf.mxu1 }
 0x1ea   :  { %7074 = vmatmul.mubr.msk.bf16.vlgmr.msra.gmra.mxu0 %vm877_vm4, %v8145_v42 }
 0x1eb   :  { %v7009_v50 = vpop.f32.mrf.mxu1  ;;  %7084 = vmatpush3.bf16.msra.mxu0 %v1707_v23 }
 0x1ed   :  { %v1068_v51 = vpop.f32.mrf.mxu1 }
 0x1ee   :  { %v1667_v52 = vpack.c.bf16 %v1068_v51, %v1065_v49 }
 0x1ef   :  { %v7010_v53 = vpop.f32.mrf.mxu1 }
 0x1f0   :  { %7108 = vmatmul.mubr.msk.bf16.gmra.mxu1 %vm396_vm1, %v1667_v52 }
 0x1f1   :  { %v8152_v54 = vpop.f32.mrf.mxu1 }
 0x1f3   :  { %v7021_v55 = vpop.f32.mrf.mxu1 }
 0x1f5   :  { %v8154_v56 = vpop.f32.mrf.mxu1 }
 0x1f6   :  { %v1669_v58 = vpack.c.bf16 %v8154_v56, %v8152_v54 }
 0x1f7   :  { %v7022_v57 = vpop.f32.mrf.mxu1 }
 0x1f9   :  { %v8158_v59 = vpop.f32.mrf.mxu1 }
 0x1fb   :  { %v7033_v60 = vpop.f32.mrf.mxu1 }
 0x1fd   :  { %v8160_v61 = vpop.f32.mrf.mxu1 }
 0x1fe   :  { %v1671_v62 = vpack.c.bf16 %v8160_v61, %v8158_v59 }
 0x1ff   :  { %v7034_v63 = vpop.f32.mrf.mxu1 }
 0x201   :  { %v8164_v0 = vpop.f32.mrf.mxu1 }
 0x203   :  { %v7045_v2 = vpop.f32.mrf.mxu1 }
 0x205   :  { %v8166_v10 = vpop.f32.mrf.mxu1 }
 0x206   :  { %v1674_v11 = vpack.c.bf16 %v8166_v10, %v8164_v0 }
 0x207   :  { %v7046_v12 = vpop.f32.mrf.mxu1 }
 0x209   :  { %v8170_v14 = vpop.f32.mrf.mxu1 }
 0x20b   :  { %v7057_v24 = vpop.f32.mrf.mxu1 }
 0x20d   :  { %v8177_v26 = vpop.f32.mrf.mxu1 }
 0x20e   :  { %v1676_v27 = vpack.c.bf16 %v8177_v26, %v8170_v14  ;;  %v7759_v14 = vld [vmem:[%s9267_s3 + $0x34] sm:$0xff]   ;;  %v7760_v26 = vld [vmem:[%s9267_s3 + $0x2c] sm:$0xff]  }
 0x20f   :  { %v7058_v9 = vpop.f32.mrf.mxu1  ;;  %7119 = vmatprep.subr.bf16.mxu0 %v7759_v14 }
 0x211   :  { %v8181_v28 = vpop.f32.mrf.mxu1 }
 0x213   :  { %v7069_v29 = vpop.f32.mrf.mxu1 }
 0x215   :  { %v8183_v30 = vpop.f32.mrf.mxu1 }
 0x216   :  { %v1678_v33 = vpack.c.bf16 %v8183_v30, %v8181_v28 }
 0x217   :  { %v7070_v4 = vpop.f32.mrf.mxu1 }
 0x219   :  { %v8187_v34 = vpop.f32.mrf.mxu1 }
 0x21b   :  { %v7081_v36 = vpop.f32.mrf.mxu1 }
 0x21d   :  { %v8189_v37 = vpop.f32.mrf.mxu1 }
 0x21e   :  { %v1680_v38 = vpack.c.bf16 %v8189_v37, %v8187_v34 }
 0x21f   :  { %v7082_v6 = vpop.f32.mrf.mxu1 }
 0x262   :  { %v6973_v40 = vpop.f32.mrf.mxu0 }
 0x263   :  { %v8199_v41 = vadd.f32 %v6973_v40, %v8196_v39 }
 0x264   :  { %v8201_v8 = vpop.f32.mrf.mxu0 }
 0x266   :  { %v6974_v43 = vpop.f32.mrf.mxu0 }
 0x267   :  { %v8204_v44 = vadd.f32 %v6974_v43, %v8196_v39 }
 0x268   :  { %v8206_v45 = vpop.f32.mrf.mxu0 }
 0x26a   :  { %v6977_v46 = vpop.f32.mrf.mxu0 }
 0x26b   :  { %v8209_v47 = vadd.f32 %v6977_v46, %v8196_v39 }
 0x26c   :  { %v8211_v48 = vpop.f32.mrf.mxu0 }
 0x26e   :  { %v6978_v49 = vpop.f32.mrf.mxu0 }
 0x26f   :  { %v8214_v50 = vadd.f32 %v6978_v49, %v8196_v39 }
 0x270   :  { %v8216_v51 = vpop.f32.mrf.mxu0 }
 0x271   :  { %9336 = vst [vmem:[#allocation12_spill] sm:$0xff] %v8214_v50 }
 0x272   :  { %v6981_v52 = vpop.f32.mrf.mxu0 }
 0x273   :  { %v8219_v53 = vadd.f32 %v6981_v52, %v8196_v39 }
 0x274   :  { %v8221_v54 = vpop.f32.mrf.mxu0 }
 0x276   :  { %v6982_v55 = vpop.f32.mrf.mxu0 }
 0x277   :  { %v8224_v56 = vadd.f32 %v6982_v55, %v8196_v39 }
 0x278   :  { %v8226_v57 = vpop.f32.mrf.mxu0 }
 0x279   :  { %9337 = vst [vmem:[#allocation13_spill] sm:$0xff] %v8224_v56 }
 0x27a   :  { %v6985_v60 = vpop.f32.mrf.mxu0 }
 0x27b   :  { %v8229_v63 = vadd.f32 %v6985_v60, %v8196_v39 }
 0x27c   :  { %v8231_v2 = vpop.f32.mrf.mxu0 }
 0x27e   :  { %v6986_v12 = vpop.f32.mrf.mxu0 }
 0x27f   :  { %v8234_v16 = vadd.f32 %v6986_v12, %v8196_v39 }
 0x280   :  { %v8236_v23 = vpop.f32.mrf.mxu0 }
 0x281   :  { %9338 = vst [vmem:[#allocation14_spill] sm:$0xff] %v8234_v16 }
 0x282   :  { %v1115_v24 = vpop.f32.mrf.mxu0 }
 0x284   :  { %v7015_v9 = vpop.f32.mrf.mxu0 }
 0x286   :  { %v1118_v29 = vpop.f32.mrf.mxu0 }
 0x287   :  { %v1668_v4 = vpack.c.bf16 %v1118_v29, %v1115_v24 }
 0x288   :  { %v7016_v36 = vpop.f32.mrf.mxu0 }
 0x289   :  { %7111 = vmatprep.mubr.msk.bf16.mxu1 %vm396_vm1, %v1668_v4 }
 0x28a   :  { %v1215_v6 = vpop.f32.mrf.mxu0  ;;  %7112 = vmatmul.mubr.msk.bf16.gmra.mxu1 %vm396_vm1, %v1669_v58 }
 0x28c   :  { %v7027_v40 = vpop.f32.mrf.mxu0 }
 0x28e   :  { %v1218_v43 = vpop.f32.mrf.mxu0 }
 0x28f   :  { %v1670_v46 = vpack.c.bf16 %v1218_v43, %v1215_v6 }
 0x290   :  { %v7028_v49 = vpop.f32.mrf.mxu0 }
 0x291   :  { %7115 = vmatprep.mubr.msk.bf16.mxu1 %vm396_vm1, %v1670_v46 }
 0x292   :  { %v1314_v52 = vpop.f32.mrf.mxu0  ;;  %7116 = vmatmul.mubr.msk.bf16.gmra.mxu1 %vm396_vm1, %v1671_v62 }
 0x294   :  { %v7039_v55 = vpop.f32.mrf.mxu0 }
 0x296   :  { %v1317_v60 = vpop.f32.mrf.mxu0 }
 0x297   :  { %v1673_v12 = vpack.c.bf16 %v1317_v60, %v1314_v52 }
 0x298   :  { %v7040_v24 = vpop.f32.mrf.mxu0 }
 0x299   :  { %7085 = vmatprep.mubr.msk.bf16.mxu0 %vm396_vm1, %v1673_v12 }
 0x29a   :  { %v1412_v9 = vpop.f32.mrf.mxu0  ;;  %7086 = vmatmul.mubr.msk.bf16.vlgmr.msra.gmra.mxu0 %vm396_vm1, %v1674_v11 }
 0x29b   :  { %7120 = vmatpush3.bf16.msra.mxu0 %v7759_v14 }
 0x29c   :  { %v7051_v58 = vpop.f32.mrf.mxu0  ;;  %7121 = vmatprep.subr.bf16.mxu0 %v7760_v26 }
 0x29d   :  { %v8275_v58 = vld [vmem:[%s9268_s4 + $0x3] ss:$0 sm:$0xff] }
 0x29e   :  { %v1415_v29 = vpop.f32.mrf.mxu0 }
 0x29f   :  { %v1675_v4 = vpack.c.bf16 %v1415_v29, %v1412_v9  ;;  %7122 = vmatpush3.bf16.msra.mxu0 %v7760_v26 }
 0x2a0   :  { %v7052_v36 = vpop.f32.mrf.mxu0  ;;  %7159 = vmatprep.subr.bf16.mxu0 %v9278_v13 }
 0x2a1   :  { %7089 = vmatprep.mubr.msk.bf16.mxu0 %vm396_vm1, %v1675_v4 }
 0x2a2   :  { %v1510_v59 = vpop.f32.mrf.mxu0  ;;  %7090 = vmatmul.mubr.msk.bf16.gmra.mxu0 %vm396_vm1, %v1676_v27 }
 0x2a4   :  { %v7063_v61 = vpop.f32.mrf.mxu0 }
 0x2a5   :  { %v7105_v27 = vpop.f32.mrf.mxu1 }
 0x2a6   :  { %v1513_v62 = vpop.f32.mrf.mxu0 }
 0x2a7   :  { %v1677_v6 = vpack.c.bf16 %v1513_v62, %v1510_v59  ;;  %v1867_v28 = vpop.f32.mrf.mxu1  ;;  %v8279_v59 = vadd.f32 %v8196_v39, %v8206_v45 }
 0x2a8   :  { %v7064_v40 = vpop.f32.mrf.mxu0 }
 0x2a9   :  { %7093 = vmatprep.mubr.msk.bf16.mxu0 %vm396_vm1, %v1677_v6  ;;  %v7106_v30 = vpop.f32.mrf.mxu1  ;;  %v9276_v26 = vmax.f32 %v8279_v59, 0.0 }
 0x2aa   :  { %v1608_v0 = vpop.f32.mrf.mxu0  ;;  %7094 = vmatmul.mubr.msk.bf16.gmra.mxu0 %vm396_vm1, %v1678_v33 }
 0x2ab   :  { %v1870_v33 = vpop.f32.mrf.mxu1 }
 0x2ac   :  { %v7075_v10 = vpop.f32.mrf.mxu0 }
 0x2ad   :  { %v793_v10 = vadd.f32 %v8196_v39, %v8201_v8 }
 0x2ae   :  { %v1611_v11 = vpop.f32.mrf.mxu0 }
 0x2af   :  { %v1679_v43 = vpack.c.bf16 %v1611_v11, %v1608_v0 }
 0x2b0   :  { %v7076_v46 = vpop.f32.mrf.mxu0  ;;  %v7109_v34 = vpop.f32.mrf.mxu1 }
 0x2b1   :  { %7097 = vmatprep.mubr.msk.bf16.mxu0 %vm396_vm1, %v1679_v43 }
 0x2b2   :  { %7098 = vmatmul.mubr.msk.bf16.gmra.mxu0 %vm396_vm1, %v1680_v38  ;;  %v1883_v37 = vpop.f32.mrf.mxu1 }
 0x2b4   :  { %v7110_v38 = vpop.f32.mrf.mxu1 }
 0x2b6   :  { %v1886_v49 = vpop.f32.mrf.mxu1 }
 0x34a   :  { %v7113_v55 = vpop.f32.mrf.mxu1 }
 0x34c   :  { %v1899_v4 = vpop.f32.mrf.mxu1 }
 0x34e   :  { %v7114_v43 = vpop.f32.mrf.mxu1 }
 0x35a   :  { %v7087_v52 = vpop.f32.mrf.mxu0 }
 0x35b   :  { %v1876_v24 = vadd.f32 %v7105_v27, %v7087_v52 }
 0x35c   :  { %v1743_v60 = vpop.f32.mrf.mxu0 }
 0x35d   :  { %v1868_v12 = vadd.f32 %v1867_v28, %v1743_v60  ;;  %v1937_v40 = vadd.f32 %v8275_v58, %v1876_v24 }
 0x35e   :  { %v7088_v9 = vpop.f32.mrf.mxu0 }
 0x35f   :  { %v1879_v29 = vadd.f32 %v7106_v30, %v7088_v9  ;;  %v1935_v61 = vadd.f32 %v8275_v58, %v1868_v12  ;;  %v1953_v30 = vmax.f32 %v1937_v40, 0.0  ;;  %v1902_v9 = vpop.f32.mrf.mxu1 }
 0x360   :  { %v1746_v36 = vpop.f32.mrf.mxu0 }
 0x361   :  { %v1938_v62 = vadd.f32 %v8275_v58, %v1879_v29  ;;  %v1871_v6 = vadd.f32 %v1870_v33, %v1746_v36  ;;  %v1951_v45 = vmax.f32 %v1935_v61, 0.0  ;;  %v8288_v33 = vmax.f32 %v793_v10, 0.0  ;;  %v7117_v40 = vpop.f32.mrf.mxu1 }
 0x362   :  { %v7091_v0 = vpop.f32.mrf.mxu0 }
 0x363   :  { %v1936_v11 = vadd.f32 %v8275_v58, %v1871_v6  ;;  %v1954_v46 = vmax.f32 %v1938_v62, 0.0  ;;  %v1892_v52 = vadd.f32 %v7109_v34, %v7091_v0  ;;  %v8293_v36 = vpack.c.bf16 %v9276_v26, %v8288_v33 }
 0x364   :  { %v1759_v14 = vpop.f32.mrf.mxu0 }
 0x365   :  { %v1952_v27 = vmax.f32 %v1936_v11, 0.0  ;;  %v1884_v28 = vadd.f32 %v1883_v37, %v1759_v14  ;;  %v1968_v29 = vpack.c.bf16 %v1954_v46, %v1953_v30  ;;  %v1941_v34 = vadd.f32 %v8275_v58, %v1892_v52  ;;  %v1915_v52 = vpop.f32.mrf.mxu1 }
 0x366   :  { %v7092_v60 = vpop.f32.mrf.mxu0 }
 0x367   :  { %v1967_v12 = vpack.c.bf16 %v1952_v27, %v1951_v45  ;;  %v1895_v24 = vadd.f32 %v7110_v38, %v7092_v60  ;;  %v1939_v62 = vadd.f32 %v8275_v58, %v1884_v28 }
 0x368   :  { %v1762_v8 = vpop.f32.mrf.mxu0 }
 0x369   :  { %v1942_v61 = vadd.f32 %v8275_v58, %v1895_v24  ;;  %v1887_v37 = vadd.f32 %v1886_v49, %v1762_v8  ;;  %7123 = vmatprep.mubr.msk.bf16.mxu0 %vm567_vm2, %v1967_v12  ;;  %v1955_v11 = vmax.f32 %v1939_v62, 0.0  ;;  %v1957_v49 = vmax.f32 %v1941_v34, 0.0 }
 0x36a   :  { %v7095_v6 = vpop.f32.mrf.mxu0  ;;  %7124 = vmatmul.mubr.msk.bf16.vlgmr.msra.gmra.mxu0 %vm567_vm2, %v1968_v29 }
 0x36b   :  { %v1940_v38 = vadd.f32 %v8275_v58, %v1887_v37  ;;  %7160 = vmatpush3.bf16.msra.mxu0 %v8293_v36  ;;  %v1958_v0 = vmax.f32 %v1942_v61, 0.0  ;;  %v1908_v45 = vadd.f32 %v7113_v55, %v7095_v6 }
 0x36c   :  { %v1775_v10 = vpop.f32.mrf.mxu0  ;;  %7171 = vmatprep.subr.bf16.mxu0 %v9278_v13 }
 0x36d   :  { %v1956_v46 = vmax.f32 %v1940_v38, 0.0  ;;  %v1900_v14 = vadd.f32 %v1899_v4, %v1775_v10  ;;  %v1970_v60 = vpack.c.bf16 %v1958_v0, %v1957_v49  ;;  %v1945_v61 = vadd.f32 %v8275_v58, %v1908_v45  ;;  %v7118_v4 = vpop.f32.mrf.mxu1 }
 0x36e   :  { %v7096_v27 = vpop.f32.mrf.mxu0 }
 0x36f   :  { %v1969_v28 = vpack.c.bf16 %v1956_v46, %v1955_v11  ;;  %v1911_v30 = vadd.f32 %v7114_v43, %v7096_v27  ;;  %v1943_v24 = vadd.f32 %v8275_v58, %v1900_v14  ;;  %v1961_v0 = vmax.f32 %v1945_v61, 0.0  ;;  %v1918_v14 = vpop.f32.mrf.mxu1 }
 0x370   :  { %v1778_v12 = vpop.f32.mrf.mxu0 }
 0x371   :  { %v1946_v29 = vadd.f32 %v8275_v58, %v1911_v30  ;;  %v1903_v8 = vadd.f32 %v1902_v9, %v1778_v12  ;;  %7127 = vmatprep.mubr.msk.bf16.mxu0 %vm567_vm2, %v1969_v28  ;;  %v1959_v34 = vmax.f32 %v1943_v24, 0.0 }
 0x372   :  { %v7099_v62 = vpop.f32.mrf.mxu0  ;;  %7128 = vmatmul.mubr.msk.bf16.gmra.mxu0 %vm567_vm2, %v1970_v60 }
 0x373   :  { %v1944_v55 = vadd.f32 %v8275_v58, %v1903_v8  ;;  %v1962_v37 = vmax.f32 %v1946_v29, 0.0  ;;  %v1924_v10 = vadd.f32 %v7117_v40, %v7099_v62  ;;  %v8317_v62 = vadd.f32 %v8196_v39, %v8216_v51 }
 0x374   :  { %v1791_v43 = vpop.f32.mrf.mxu0  ;;  %v8335_v51 = vadd.f32 %v8196_v39, %v8226_v57 }
 0x375   :  { %v1960_v6 = vmax.f32 %v1944_v55, 0.0  ;;  %v1916_v38 = vadd.f32 %v1915_v52, %v1791_v43  ;;  %v1972_v49 = vpack.c.bf16 %v1962_v37, %v1961_v0  ;;  %v1949_v60 = vadd.f32 %v8275_v58, %v1924_v10  ;;  %9339 = vst [vmem:[#allocation15_spill] sm:$0xff] %v8317_v62  ;;  %v6411_v10 = vld [vmem:[%s9268_s4 + $0x4] ss:$0 sm:$0xff] }
 0x376   :  { %v7100_v11 = vpop.f32.mrf.mxu0  ;;  %v809_v55 = vadd.f32 %v8196_v39, %v8211_v48  ;;  %9341 = vst [vmem:[#allocation17_spill] sm:$0xff] %v8335_v51  ;;  %v825_v48 = vadd.f32 %v8196_v39, %v8221_v54  ;;  %v9272_v43 = vmax.f32 %v8335_v51, 0.0  ;;  %v841_v54 = vadd.f32 %v8196_v39, %v8231_v2 }
 0x377   :  { %v1971_v46 = vpack.c.bf16 %v1960_v6, %v1959_v34  ;;  %v1927_v9 = vadd.f32 %v7118_v4, %v7100_v11  ;;  %v1947_v45 = vadd.f32 %v8275_v58, %v1916_v38  ;;  %v1965_v29 = vmax.f32 %v1949_v60, 0.0 }
 0x378   :  { %v1794_v27 = vpop.f32.mrf.mxu0  ;;  %v8326_v4 = vmax.f32 %v809_v55, 0.0  ;;  %v8346_v34 = vmax.f32 %v825_v48, 0.0  ;;  %v8355_v6 = vadd.f32 %v8196_v39, %v8236_v23  ;;  %v8366_v0 = vmax.f32 %v841_v54, 0.0  ;;  %v7761_v39 = vld [vmem:[%s9267_s3 + $0x44] sm:$0xff]  }
 0x379   :  { %v1950_v28 = vadd.f32 %v8275_v58, %v1927_v9  ;;  %v1919_v30 = vadd.f32 %v1918_v14, %v1794_v27  ;;  %7131 = vmatprep.mubr.msk.bf16.mxu0 %vm567_vm2, %v1971_v46  ;;  %v1963_v12 = vmax.f32 %v1947_v45, 0.0  ;;  %7139 = vmatprep.subr.bf16.mxu1 %v7761_v39 }
 0x37a   :  { %7132 = vmatmul.mubr.msk.bf16.gmra.mxu0 %vm567_vm2, %v1972_v49  ;;  %9340 = vst [vmem:[#allocation16_spill] sm:$0xff] %v8326_v4  ;;  %9342 = vst [vmem:[#allocation18_spill] sm:$0xff] %v8346_v34  ;;  %v8351_v57 = vpack.c.bf16 %v9272_v43, %v8346_v34  ;;  %v9270_v38 = vmax.f32 %v8355_v6, 0.0  ;;  %7140 = vmatpush3.bf16.msra.mxu1 %v7761_v39  ;;  %v8706_v34 = vld [vmem:[%s9268_s4 + $0x6] ss:$0 sm:$0xff] }
 0x37b   :  { %v1948_v52 = vadd.f32 %v8275_v58, %v1919_v30  ;;  %v1966_v40 = vmax.f32 %v1950_v28, 0.0  ;;  %v9274_v58 = vmax.f32 %v8317_v62, 0.0  ;;  %9343 = vst [vmem:[#allocation19_spill] sm:$0xff] %v8355_v6  ;;  %9344 = vst [vmem:[#allocation20_spill] sm:$0xff] %v8366_v0  ;;  %v9277_v28 = vmax.f32 %v8204_v44, 0.0 }
 0x37c   :  { %v8371_v23 = vpack.c.bf16 %v9270_v38, %v8366_v0 }
 0x37d   :  { %v1964_v24 = vmax.f32 %v1948_v52, 0.0  ;;  %v1974_v61 = vpack.c.bf16 %v1966_v40, %v1965_v29  ;;  %v8331_v37 = vpack.c.bf16 %v9274_v58, %v8326_v4  ;;  %v8416_v40 = vmax.f32 %v8199_v41, 0.0  ;;  %v7800_v58 = vld [vmem:[%s9265_s1 + $0x8] sm:$0xff]  }
 0x37f   :  { %v1973_v8 = vpack.c.bf16 %v1964_v24, %v1963_v12 }
 0x381   :  { %7135 = vmatprep.mubr.msk.bf16.mxu0 %vm567_vm2, %v1973_v8  ;;  %v8421_v8 = vpack.c.bf16 %v9277_v28, %v8416_v40  ;;  %v7802_v28 = vld [vmem:[%s9265_s1 + $0x18] sm:$0xff]  }
 0x382   :  { %7136 = vmatmul.mubr.msk.bf16.gmra.mxu0 %vm567_vm2, %v1974_v61 }
 0x383   :  { %7161 = vmatprep.mubr.msk.bf16.mxu0 %vm7838_vm3, %v9278_v13 }
 0x38a   :  { %7162 = vmatmul.mubr.msk.bf16.vlgmr.msra.gmra.mxu0 %vm877_vm4, %v7955_v15 }
 0x38b   :  { %7172 = vmatpush3.bf16.msra.mxu0 %v8331_v37  ;;  %7173 = vmatprep.mubr.msk.bf16.mxu0 %vm7838_vm3, %v9278_v13 }
 0x38c   :  { %7183 = vmatprep.subr.bf16.mxu0 %v9278_v13 }
 0x392   :  { %7174 = vmatmul.mubr.msk.bf16.vlgmr.msra.gmra.mxu0 %vm877_vm4, %v7987_v18 }
 0x393   :  { %7184 = vmatpush3.bf16.msra.mxu0 %v8351_v57  ;;  %7185 = vmatprep.mubr.msk.bf16.mxu0 %vm7838_vm3, %v9278_v13 }
 0x394   :  { %7195 = vmatprep.subr.bf16.mxu0 %v9278_v13 }
 0x39a   :  { %7186 = vmatmul.mubr.msk.bf16.vlgmr.msra.gmra.mxu0 %vm877_vm4, %v8085_v31 }
 0x39b   :  { %7196 = vmatpush3.bf16.msra.mxu0 %v8371_v23  ;;  %7197 = vmatprep.mubr.msk.bf16.mxu0 %vm7838_vm3, %v9278_v13 }
 0x39c   :  { %7207 = vmatprep.subr.bf16.mxu0 %v9278_v13 }
 0x3a2   :  { %7198 = vmatmul.mubr.msk.bf16.vlgmr.msra.gmra.mxu0 %vm877_vm4, %v8095_v25 }
 0x3a3   :  { %7208 = vmatpush3.bf16.msra.mxu0 %v8293_v36  ;;  %7209 = vmatprep.mubr.msk.bf16.mxu0 %vm7838_vm3, %v9278_v13 }
 0x3a4   :  { %7219 = vmatprep.subr.bf16.mxu0 %v9278_v13 }
 0x3aa   :  { %7210 = vmatmul.mubr.msk.bf16.vlgmr.msra.gmra.mxu0 %vm877_vm4, %v8107_v32  ;;  %v7762_v32 = vld [vmem:[%s9267_s3 + $0x3c] sm:$0xff]  }
 0x3ab   :  { %7220 = vmatpush3.bf16.msra.mxu0 %v8331_v37  ;;  %7221 = vmatprep.mubr.msk.bf16.mxu0 %vm7838_vm3, %v9278_v13 }
 0x3ac   :  { %7231 = vmatprep.subr.bf16.mxu0 %v9278_v13  ;;  %7141 = vmatprep.subr.bf16.mxu1 %v7762_v32 }
 0x3ad   :  { %7142 = vmatpush3.bf16.msra.mxu1 %v7762_v32 }
 0x3ae   :  { %7165 = vmatprep.subr.bf16.mxu1 %v9278_v13 }
 0x3b2   :  { %7222 = vmatmul.mubr.msk.bf16.vlgmr.msra.gmra.mxu0 %vm877_vm4, %v8118_v1 }
 0x3b3   :  { %7232 = vmatpush3.bf16.msra.mxu0 %v8351_v57  ;;  %7233 = vmatprep.mubr.msk.bf16.mxu0 %vm7838_vm3, %v9278_v13 }
 0x3b4   :  { %7243 = vmatprep.subr.bf16.mxu0 %v9278_v13 }
 0x3ba   :  { %7234 = vmatmul.mubr.msk.bf16.vlgmr.msra.gmra.mxu0 %vm877_vm4, %v8129_v35 }
 0x3bb   :  { %7244 = vmatpush3.bf16.msra.mxu0 %v8371_v23  ;;  %7245 = vmatprep.mubr.msk.bf16.mxu0 %vm7838_vm3, %v9278_v13 }
 0x3c2   :  { %7246 = vmatmul.mubr.msk.bf16.vlgmr.msra.gmra.mxu0 %vm877_vm4, %v8145_v42 }
 0x42a   :  { %v7125_v1 = vpop.f32.mrf.mxu0 }
 0x42b   :  { %v2063_v14 = vadd.f32 %v7125_v1, %v6411_v10 }
 0x42c   :  { %v2054_v2 = vpop.f32.mrf.mxu0 }
 0x42d   :  { %v2055_v46 = vadd.f32 %v6411_v10, %v2054_v2  ;;  %v2119_v52 = vmax.f32 %v2063_v14, 0.0 }
 0x42e   :  { %v7126_v11 = vpop.f32.mrf.mxu0 }
 0x42f   :  { %v2066_v9 = vadd.f32 %v7126_v11, %v6411_v10  ;;  %v2117_v30 = vmax.f32 %v2055_v46, 0.0 }
 0x430   :  { %v2057_v49 = vpop.f32.mrf.mxu0 }
 0x431   :  { %v2058_v35 = vadd.f32 %v6411_v10, %v2057_v49  ;;  %v2120_v27 = vmax.f32 %v2066_v9, 0.0 }
 0x432   :  { %v7129_v45 = vpop.f32.mrf.mxu0 }
 0x433   :  { %v2118_v60 = vmax.f32 %v2058_v35, 0.0  ;;  %v2134_v24 = vpack.c.bf16 %v2120_v27, %v2119_v52  ;;  %v2079_v48 = vadd.f32 %v7129_v45, %v6411_v10 }
 0x434   :  { %v2070_v42 = vpop.f32.mrf.mxu0 }
 0x435   :  { %v2133_v12 = vpack.c.bf16 %v2118_v60, %v2117_v30  ;;  %v2071_v61 = vadd.f32 %v6411_v10, %v2070_v42  ;;  %v2123_v11 = vmax.f32 %v2079_v48, 0.0 }
 0x436   :  { %v7130_v29 = vpop.f32.mrf.mxu0 }
 0x437   :  { %v2082_v55 = vadd.f32 %v7130_v29, %v6411_v10  ;;  %7143 = vmatprep.mubr.msk.bf16.mxu1 %vm567_vm2, %v2133_v12  ;;  %v2121_v1 = vmax.f32 %v2071_v61, 0.0 }
 0x438   :  { %v2073_v54 = vpop.f32.mrf.mxu0  ;;  %7144 = vmatmul.mubr.msk.bf16.vlgmr.msra.gmra.mxu1 %vm567_vm2, %v2134_v24 }
 0x439   :  { %v2074_v39 = vadd.f32 %v6411_v10, %v2073_v54  ;;  %7166 = vmatpush3.bf16.msra.mxu1 %v8421_v8  ;;  %v2124_v41 = vmax.f32 %v2082_v55, 0.0 }
 0x43a   :  { %v7133_v32 = vpop.f32.mrf.mxu0  ;;  %7177 = vmatprep.subr.bf16.mxu1 %v9278_v13 }
 0x43b   :  { %v2122_v2 = vmax.f32 %v2074_v39, 0.0  ;;  %v2136_v14 = vpack.c.bf16 %v2124_v41, %v2123_v11  ;;  %v2095_v45 = vadd.f32 %v7133_v32, %v6411_v10 }
 0x43c   :  { %v2086_v46 = vpop.f32.mrf.mxu0 }
 0x43d   :  { %v2135_v9 = vpack.c.bf16 %v2122_v2, %v2121_v1  ;;  %v2087_v35 = vadd.f32 %v6411_v10, %v2086_v46  ;;  %v2127_v29 = vmax.f32 %v2095_v45, 0.0  ;;  %v8437_v45 = vmax.f32 %v8209_v47, 0.0 }
 0x43e   :  { %v7134_v49 = vpop.f32.mrf.mxu0  ;;  %v8452_v47 = vmax.f32 %v8219_v53, 0.0  ;;  %v8467_v53 = vmax.f32 %v8229_v63, 0.0 }
 0x43f   :  { %v2098_v27 = vadd.f32 %v7134_v49, %v6411_v10  ;;  %7147 = vmatprep.mubr.msk.bf16.mxu1 %vm567_vm2, %v2135_v9  ;;  %v2125_v12 = vmax.f32 %v2087_v35, 0.0  ;;  %9345 = vst [vmem:[#allocation21_spill] sm:$0xff] %v8437_v45 }
 0x440   :  { %v2089_v30 = vpop.f32.mrf.mxu0  ;;  %7148 = vmatmul.mubr.msk.bf16.gmra.mxu1 %vm567_vm2, %v2136_v14  ;;  %9346 = vst [vmem:[#allocation22_spill] sm:$0xff] %v8452_v47  ;;  %9347 = vst [vmem:[#allocation23_spill] sm:$0xff] %v8467_v53 }
 0x441   :  { %v2090_v60 = vadd.f32 %v6411_v10, %v2089_v30  ;;  %v2128_v52 = vmax.f32 %v2098_v27, 0.0  ;;  %v9275_v27 = vmax.f32 %v8214_v50, 0.0  ;;  %v9273_v30 = vmax.f32 %v8224_v56, 0.0 }
 0x442   :  { %v7137_v42 = vpop.f32.mrf.mxu0 }
 0x443   :  { %v2126_v24 = vmax.f32 %v2090_v60, 0.0  ;;  %v2138_v48 = vpack.c.bf16 %v2128_v52, %v2127_v29  ;;  %v2111_v1 = vadd.f32 %v7137_v42, %v6411_v10  ;;  %v8457_v60 = vpack.c.bf16 %v9273_v30, %v8452_v47 }
 0x444   :  { %v2102_v61 = vpop.f32.mrf.mxu0  ;;  %v9271_v52 = vmax.f32 %v8234_v16, 0.0 }
 0x445   :  { %v2137_v55 = vpack.c.bf16 %v2126_v24, %v2125_v12  ;;  %v2103_v39 = vadd.f32 %v6411_v10, %v2102_v61  ;;  %v2131_v14 = vmax.f32 %v2111_v1, 0.0 }
 0x446   :  { %v7138_v54 = vpop.f32.mrf.mxu0  ;;  %v8472_v42 = vpack.c.bf16 %v9271_v52, %v8467_v53 }
 0x447   :  { %v2114_v41 = vadd.f32 %v7138_v54, %v6411_v10  ;;  %7151 = vmatprep.mubr.msk.bf16.mxu1 %vm567_vm2, %v2137_v55  ;;  %v2129_v46 = vmax.f32 %v2103_v39, 0.0 }
 0x448   :  { %v2105_v2 = vpop.f32.mrf.mxu0  ;;  %7152 = vmatmul.mubr.msk.bf16.gmra.mxu1 %vm567_vm2, %v2138_v48 }
 0x449   :  { %v2106_v32 = vadd.f32 %v6411_v10, %v2105_v2  ;;  %v2132_v11 = vmax.f32 %v2114_v41, 0.0  ;;  %v8442_v10 = vpack.c.bf16 %v9275_v27, %v8437_v45  ;;  %v72_v27 = vunpack.c.l.bf16 %v7800_v58 }
 0x44a   :  { %v2343_v63 = vpop.f32.mrf.mxu0 }
 0x44b   :  { %v2130_v9 = vmax.f32 %v2106_v32, 0.0  ;;  %v2140_v35 = vpack.c.bf16 %v2132_v11, %v2131_v14  ;;  %118 = vxpose.xlu1.b32.start [1/2] (short) (narrow) %v72_v27, 16 }
 0x44c   :  { %v7163_v12 = vpop.f32.mrf.mxu0 }
 0x44d   :  { %v2139_v49 = vpack.c.bf16 %v2130_v9, %v2129_v46 }
 0x44e   :  { %v2346_v24 = vpop.f32.mrf.mxu0 }
 0x44f   :  { %7155 = vmatprep.mubr.msk.bf16.mxu1 %vm567_vm2, %v2139_v49  ;;  %v2977_v61 = vpack.c.bf16 %v2346_v24, %v2343_v63  ;;  %v8544_v24 = vld [vmem:[%s9267_s3 + $0x74] sm:$0xff]  }
 0x450   :  { %7156 = vmatmul.mubr.msk.bf16.gmra.mxu1 %vm567_vm2, %v2140_v35  ;;  %v7164_v29 = vpop.f32.mrf.mxu0 }
 0x451   :  { %7167 = vmatprep.mubr.msk.bf16.mxu1 %vm7838_vm3, %v9278_v13  ;;  %7259 = vmatprep.mubr.msk.bf16.mxu0 %vm567_vm2, %v2977_v61 }
 0x452   :  { %v8515_v55 = vpop.f32.mrf.mxu0 }
 0x454   :  { %v7175_v48 = vpop.f32.mrf.mxu0 }
 0x456   :  { %v8521_v54 = vpop.f32.mrf.mxu0 }
 0x458   :  { %7168 = vmatmul.mubr.msk.bf16.vlgmr.msra.gmra.mxu1 %vm877_vm4, %v7975_v17  ;;  %v7176_v41 = vpop.f32.mrf.mxu0 }
 0x459   :  { %7178 = vmatpush3.bf16.msra.mxu1 %v8442_v10  ;;  %7179 = vmatprep.mubr.msk.bf16.mxu1 %vm7838_vm3, %v9278_v13  ;;  %v78_v41 = vunpack.c.l.bf16 %v8085_v31 }
 0x45a   :  { %7189 = vmatprep.subr.bf16.mxu1 %v9278_v13  ;;  %v8525_v1 = vpop.f32.mrf.mxu0 }
 0x45c   :  { %v7187_v2 = vpop.f32.mrf.mxu0 }
 0x45e   :  { %v8527_v32 = vpop.f32.mrf.mxu0 }
 0x460   :  { %7180 = vmatmul.mubr.msk.bf16.vlgmr.msra.gmra.mxu1 %vm877_vm4, %v7998_v19  ;;  %v7188_v46 = vpop.f32.mrf.mxu0 }
 0x461   :  { %7190 = vmatpush3.bf16.msra.mxu1 %v8457_v60  ;;  %7191 = vmatprep.mubr.msk.bf16.mxu1 %vm7838_vm3, %v9278_v13 }
 0x462   :  { %7201 = vmatprep.subr.bf16.mxu1 %v9278_v13  ;;  %v8531_v9 = vpop.f32.mrf.mxu0 }
 0x464   :  { %v7199_v14 = vpop.f32.mrf.mxu0 }
 0x466   :  { %v8533_v49 = vpop.f32.mrf.mxu0 }
 0x468   :  { %7192 = vmatmul.mubr.msk.bf16.vlgmr.msra.gmra.mxu1 %vm877_vm4, %v8009_v20 }
 0x469   :  { %7202 = vmatpush3.bf16.msra.mxu1 %v8472_v42  ;;  %7203 = vmatprep.mubr.msk.bf16.mxu1 %vm7838_vm3, %v9278_v13 }
 0x46a   :  { %7213 = vmatprep.subr.bf16.mxu1 %v9278_v13 }
 0x470   :  { %7204 = vmatmul.mubr.msk.bf16.vlgmr.msra.gmra.mxu1 %vm877_vm4, %v8020_v21 }
 0x471   :  { %7214 = vmatpush3.bf16.msra.mxu1 %v8421_v8  ;;  %7215 = vmatprep.mubr.msk.bf16.mxu1 %vm7838_vm3, %v9278_v13 }
 0x472   :  { %7225 = vmatprep.subr.bf16.mxu1 %v9278_v13 }
 0x478   :  { %7216 = vmatmul.mubr.msk.bf16.vlgmr.msra.gmra.mxu1 %vm877_vm4, %v8031_v22  ;;  %v7763_v22 = vld [vmem:[%s9267_s3 + $0x54] sm:$0xff]  }
 0x479   :  { %7226 = vmatpush3.bf16.msra.mxu1 %v8442_v10  ;;  %7227 = vmatprep.mubr.msk.bf16.mxu1 %vm7838_vm3, %v9278_v13 }
 0x47a   :  { %7237 = vmatprep.subr.bf16.mxu1 %v9278_v13 }
 0x480   :  { %7228 = vmatmul.mubr.msk.bf16.vlgmr.msra.gmra.mxu1 %vm877_vm4, %v8042_v3  ;;  %v7764_v3 = vld [vmem:[%s9267_s3 + $0x4c] sm:$0xff]  }
 0x481   :  { %7238 = vmatpush3.bf16.msra.mxu1 %v8457_v60  ;;  %7239 = vmatprep.mubr.msk.bf16.mxu1 %vm7838_vm3, %v9278_v13 }
 0x482   :  { %7249 = vmatprep.subr.bf16.mxu1 %v9278_v13 }
 0x488   :  { %7240 = vmatmul.mubr.msk.bf16.vlgmr.msra.gmra.mxu1 %vm877_vm4, %v8053_v5  ;;  %v7765_v5 = vld [vmem:[%s9267_s3 + $0x64] sm:$0xff]  }
 0x489   :  { %7250 = vmatpush3.bf16.msra.mxu1 %v8472_v42  ;;  %7251 = vmatprep.mubr.msk.bf16.mxu1 %vm7838_vm3, %v9278_v13 }
 0x48a   :  { %7275 = vmatprep.subr.bf16.mxu1 %v7763_v22  ;;  %7255 = vmatprep.subr.bf16.mxu0 %v7765_v5 }
 0x48b   :  { %7256 = vmatpush3.bf16.msra.mxu0 %v7765_v5  ;;  %v79_v5 = vunpack.c.h.bf16 %v8085_v31  ;;  %v6422_v31 = vld [vmem:[%s9268_s4 + $0x5] ss:$0 sm:$0xff] }
 0x490   :  { %7252 = vmatmul.mubr.msk.bf16.vlgmr.msra.gmra.mxu1 %vm877_vm4, %v8063_v7  ;;  %v7766_v7 = vld [vmem:[%s9267_s3 + $0x5c] sm:$0xff]  }
 0x491   :  { %7276 = vmatpush3.bf16.msra.mxu1 %v7763_v22  ;;  %7257 = vmatprep.subr.bf16.mxu0 %v7766_v7  ;;  %v7200_v22 = vpop.f32.mrf.mxu0 }
 0x492   :  { %7277 = vmatprep.subr.bf16.mxu1 %v7764_v3  ;;  %7258 = vmatpush3.bf16.msra.mxu0 %v7766_v7 }
 0x493   :  { %7295 = vmatprep.subr.bf16.mxu0 %v8544_v24 }
 0x495   :  { %7278 = vmatpush3.bf16.msra.mxu1 %v7764_v3  ;;  %v8537_v3 = vpop.f32.mrf.mxu0 }
 0x496   :  { %7315 = vmatprep.subr.bf16.mxu1 %v9278_v13 }
 0x497   :  { %v7211_v63 = vpop.f32.mrf.mxu0 }
 0x499   :  { %v8539_v12 = vpop.f32.mrf.mxu0 }
 0x49b   :  { %v7212_v29 = vpop.f32.mrf.mxu0 }
 0x49d   :  { %v8549_v61 = vpop.f32.mrf.mxu0 }
 0x49f   :  { %v7223_v7 = vpop.f32.mrf.mxu0 }
 0x4a0   :  { %v76_v7 = vunpack.c.l.bf16 %v7802_v28 }
 0x4a1   :  { %v8551_v48 = vpop.f32.mrf.mxu0 }
 0x4a3   :  { %v7224_v2 = vpop.f32.mrf.mxu0 }
 0x4a4   :  { %v7799_v2 = vld [vmem:[%s9265_s1] sm:$0xff]  }
 0x4a5   :  { %v8555_v46 = vpop.f32.mrf.mxu0 }
 0x4a7   :  { %v7235_v14 = vpop.f32.mrf.mxu0 }
 0x4a8   :  { %v70_v14 = vunpack.c.l.bf16 %v7799_v2 }
 0x4a9   :  { %v8557_v22 = vpop.f32.mrf.mxu0 }
 0x4aa   :  { %86 = vxpose.xlu0.b32.start [1/2] (short) (narrow) %v70_v14, 16  ;;  %v82_v14 = vunpack.c.l.bf16 %v8095_v25 }
 0x4ab   :  { %v7236_v29 = vpop.f32.mrf.mxu0 }
 0x4ac   :  { %v71_v29 = vunpack.c.h.bf16 %v7799_v2  ;;  %v77_v2 = vunpack.c.h.bf16 %v7802_v28 }
 0x4ad   :  { %v8561_v38 = vpop.f32.mrf.mxu0 }
 0x4ae   :  { %87 = vxpose.xlu0.b32.end [2/2] (short) (narrow) %v71_v29, 16  ;;  %v7804_v29 = vld [vmem:[%s9265_s1 + $0x38] sm:$0xff]  }
 0x4af   :  { %v7247_v52 = vpop.f32.mrf.mxu0  ;;  %v85_v11 = vunpack.c.h.bf16 %v7804_v29 }
 0x4b0   :  { %v73_v52 = vunpack.c.h.bf16 %v7800_v58  ;;  %v7803_v58 = vld [vmem:[%s9265_s1 + $0x28] sm:$0xff]  }
 0x4b1   :  { %v8563_v43 = vpop.f32.mrf.mxu0  ;;  %v80_v27 = vunpack.c.l.bf16 %v7803_v58 }
 0x4b2   :  { %119 = vxpose.xlu1.b32.end [2/2] (short) (narrow) %v73_v52, 16  ;;  %v84_v52 = vunpack.c.l.bf16 %v7804_v29 }
 0x4b3   :  { %v7248_v30 = vpop.f32.mrf.mxu0  ;;  %v7703_v35 = vpack.i.bf16 %v80_v27, %v78_v41 }
 0x4b4   :  { %v7801_v30 = vld [vmem:[%s9265_s1 + $0x10] sm:$0xff]  }
 0x4b5   :  { %v74_v26 = vunpack.c.l.bf16 %v7801_v30  ;;  %v75_v63 = vunpack.c.h.bf16 %v7801_v30  ;;  %v81_v30 = vunpack.c.h.bf16 %v7803_v58 }
 0x4b6   :  { %182 = vxpose.xlu1.b32.start [1/2] (short) (narrow) %v76_v7, 16  ;;  %v83_v7 = vunpack.c.h.bf16 %v8095_v25 }
 0x4b7   :  { %150 = vxpose.xlu0.b32.start [1/2] (short) (narrow) %v74_v26, 16  ;;  %v7717_v26 = vpack.i.bf16 %v84_v52, %v82_v14  ;;  %v7705_v39 = vpack.i.bf16 %v81_v30, %v79_v5 }
 0x4b8   :  { %v7719_v28 = vpack.i.bf16 %v85_v11, %v83_v7 }
 0x4ba   :  { %183 = vxpose.xlu1.b32.end [2/2] (short) (narrow) %v77_v2, 16 }
 0x4bb   :  { %151 = vxpose.xlu0.b32.end [2/2] (short) (narrow) %v75_v63, 16 }
 0x4be   :  { %7718 = vxpose.xlu1.b32.start [1/2] (short) (narrow) %v7717_v26, 16 }
 0x4bf   :  { %7704 = vxpose.xlu0.b32.start [1/2] (short) (narrow) %v7703_v35, 16 }
 0x4c2   :  { %7720 = vxpose.xlu1.b32.end [2/2] (short) (narrow) %v7719_v28, 16 }
 0x4c3   :  { %7706 = vxpose.xlu0.b32.end [2/2] (short) (narrow) %v7705_v39, 16 }
 0x4f8   :  { %v7145_v13 = vpop.f32.mrf.mxu1 }
 0x4f9   :  { %v2229_v27 = vadd.f32 %v7145_v13, %v6422_v31 }
 0x4fa   :  { %v2220_v21 = vpop.f32.mrf.mxu1 }
 0x4fb   :  { %v2221_v63 = vadd.f32 %v6422_v31, %v2220_v21  ;;  %v2285_v30 = vmax.f32 %v2229_v27, 0.0 }
 0x4fc   :  { %v7146_v58 = vpop.f32.mrf.mxu1 }
 0x4fd   :  { %v2232_v41 = vadd.f32 %v7146_v58, %v6422_v31  ;;  %v2283_v35 = vmax.f32 %v2221_v63, 0.0 }
 0x4fe   :  { %v2223_v2 = vpop.f32.mrf.mxu1 }
 0x4ff   :  { %v2224_v14 = vadd.f32 %v6422_v31, %v2223_v2  ;;  %v2286_v52 = vmax.f32 %v2232_v41, 0.0 }
 0x500   :  { %v7149_v29 = vpop.f32.mrf.mxu1 }
 0x501   :  { %v2284_v5 = vmax.f32 %v2224_v14, 0.0  ;;  %v8594_v26 = vpack.c.bf16 %v2286_v52, %v2285_v30  ;;  %v2245_v21 = vadd.f32 %v7149_v29, %v6422_v31 }
 0x502   :  { %v2236_v11 = vpop.f32.mrf.mxu1 }
 0x503   :  { %v8592_v39 = vpack.c.bf16 %v2284_v5, %v2283_v35  ;;  %9349 = vst [vmem:[#allocation25_spill] sm:$0xff] %v8594_v26  ;;  %v2237_v28 = vadd.f32 %v6422_v31, %v2236_v11  ;;  %v2289_v14 = vmax.f32 %v2245_v21, 0.0 }
 0x504   :  { %v7150_v7 = vpop.f32.mrf.mxu1 }
 0x505   :  { %9348 = vst [vmem:[#allocation24_spill] sm:$0xff] %v8592_v39  ;;  %v2248_v25 = vadd.f32 %v7150_v7, %v6422_v31  ;;  %7279 = vmatprep.mubr.msk.bf16.mxu1 %vm567_vm2, %v8592_v39  ;;  %v2287_v27 = vmax.f32 %v2237_v28, 0.0 }
 0x506   :  { %v2239_v13 = vpop.f32.mrf.mxu1  ;;  %7280 = vmatmul.mubr.msk.bf16.vlgmr.msra.gmra.mxu1 %vm567_vm2, %v8594_v26 }
 0x507   :  { %v2240_v58 = vadd.f32 %v6422_v31, %v2239_v13  ;;  %v2290_v63 = vmax.f32 %v2248_v25, 0.0 }
 0x508   :  { %v7153_v41 = vpop.f32.mrf.mxu1 }
 0x509   :  { %v2288_v2 = vmax.f32 %v2240_v58, 0.0  ;;  %v8602_v5 = vpack.c.bf16 %v2290_v63, %v2289_v14  ;;  %v2261_v29 = vadd.f32 %v7153_v41, %v6422_v31 }
 0x50a   :  { %v2252_v35 = vpop.f32.mrf.mxu1 }
 0x50b   :  { %v8600_v52 = vpack.c.bf16 %v2288_v2, %v2287_v27  ;;  %9351 = vst [vmem:[#allocation27_spill] sm:$0xff] %v8602_v5  ;;  %v2253_v11 = vadd.f32 %v6422_v31, %v2252_v35  ;;  %v2293_v27 = vmax.f32 %v2261_v29, 0.0 }
 0x50c   :  { %v7154_v30 = vpop.f32.mrf.mxu1 }
 0x50d   :  { %9350 = vst [vmem:[#allocation26_spill] sm:$0xff] %v8600_v52  ;;  %v2264_v7 = vadd.f32 %v7154_v30, %v6422_v31  ;;  %7283 = vmatprep.mubr.msk.bf16.mxu1 %vm567_vm2, %v8600_v52  ;;  %v2291_v21 = vmax.f32 %v2253_v11, 0.0 }
 0x50e   :  { %v2255_v39 = vpop.f32.mrf.mxu1  ;;  %7284 = vmatmul.mubr.msk.bf16.gmra.mxu1 %vm567_vm2, %v8602_v5 }
 0x50f   :  { %v2256_v25 = vadd.f32 %v6422_v31, %v2255_v39  ;;  %v2294_v28 = vmax.f32 %v2264_v7, 0.0 }
 0x510   :  { %v7157_v13 = vpop.f32.mrf.mxu1 }
 0x511   :  { %v2292_v58 = vmax.f32 %v2256_v25, 0.0  ;;  %v8610_v14 = vpack.c.bf16 %v2294_v28, %v2293_v27  ;;  %v2277_v41 = vadd.f32 %v7157_v13, %v6422_v31  ;;  %v7768_v13 = vld [vmem:[%s9267_s3 + $0x6c] sm:$0xff]  }
 0x512   :  { %v2268_v2 = vpop.f32.mrf.mxu1 }
 0x513   :  { %v8608_v63 = vpack.c.bf16 %v2292_v58, %v2291_v21  ;;  %9353 = vst [vmem:[#allocation29_spill] sm:$0xff] %v8610_v14  ;;  %v2269_v30 = vadd.f32 %v6422_v31, %v2268_v2  ;;  %v2297_v21 = vmax.f32 %v2277_v41, 0.0 }
 0x514   :  { %v7158_v35 = vpop.f32.mrf.mxu1 }
 0x515   :  { %9352 = vst [vmem:[#allocation28_spill] sm:$0xff] %v8608_v63  ;;  %v2280_v26 = vadd.f32 %v7158_v35, %v6422_v31  ;;  %7287 = vmatprep.mubr.msk.bf16.mxu1 %vm567_vm2, %v8608_v63  ;;  %v2295_v29 = vmax.f32 %v2269_v30, 0.0  ;;  %v9357_v30 = vpack.c.bf16 %v8521_v54, %v8515_v55 }
 0x516   :  { %v2271_v52 = vpop.f32.mrf.mxu1  ;;  %7288 = vmatmul.mubr.msk.bf16.gmra.mxu1 %vm567_vm2, %v8610_v14 }
 0x517   :  { %v2272_v39 = vadd.f32 %v6422_v31, %v2271_v52  ;;  %v2298_v11 = vmax.f32 %v2280_v26, 0.0  ;;  %v9356_v26 = vmov 0.0  }
 0x518   :  { %v2384_v7 = vpop.f32.mrf.mxu1 }
 0x519   :  { %v2296_v25 = vmax.f32 %v2272_v39, 0.0  ;;  %v8618_v27 = vpack.c.bf16 %v2298_v11, %v2297_v21 }
 0x51a   :  { %v7169_v58 = vpop.f32.mrf.mxu1 }
 0x51b   :  { %v8616_v28 = vpack.c.bf16 %v2296_v25, %v2295_v29  ;;  %9355 = vst [vmem:[#allocation31_spill] sm:$0xff] %v8618_v27  ;;  %v9358_v25 = vpack.c.bf16 %v8527_v32, %v8525_v1  ;;  %v9360_v32 = vpack.c.bf16 %v8539_v12, %v8537_v3  ;;  %v9362_v12 = vpack.c.bf16 %v8557_v22, %v8555_v46 }
 0x51c   :  { %v2387_v2 = vpop.f32.mrf.mxu1 }
 0x51d   :  { %9354 = vst [vmem:[#allocation30_spill] sm:$0xff] %v8616_v28  ;;  %v2978_v35 = vpack.c.bf16 %v2387_v2, %v2384_v7  ;;  %7291 = vmatprep.mubr.msk.bf16.mxu1 %vm567_vm2, %v8616_v28  ;;  %v9359_v2 = vpack.c.bf16 %v8533_v49, %v8531_v9  ;;  %v9361_v49 = vpack.c.bf16 %v8551_v48, %v8549_v61 }
 0x51e   :  { %v7170_v31 = vpop.f32.mrf.mxu1  ;;  %7292 = vmatmul.mubr.msk.bf16.gmra.mxu1 %vm567_vm2, %v8618_v27  ;;  %v9363_v48 = vpack.c.bf16 %v8563_v43, %v8561_v38 }
 0x51f   :  { %7260 = vmatmul.mubr.msk.bf16.vlgmr.msra.gmra.mxu0 %vm567_vm2, %v2978_v35  ;;  %7317 = vmatprep.mubr.msk.bf16.mxu1 %vm7838_vm3, %v9356_v26 }
 0x520   :  { %v2466_v52 = vpop.f32.mrf.mxu1  ;;  %7263 = vmatprep.mubr.msk.bf16.mxu0 %vm567_vm2, %v9357_v30  ;;  %7296 = vmatpush3.bf16.msra.mxu0 %v8544_v24 }
 0x521   :  { %7297 = vmatprep.subr.bf16.mxu0 %v7768_v13 }
 0x522   :  { %v7181_v41 = vpop.f32.mrf.mxu1 }
 0x524   :  { %v2469_v39 = vpop.f32.mrf.mxu1  ;;  %7298 = vmatpush3.bf16.msra.mxu0 %v7768_v13 }
 0x525   :  { %v2980_v11 = vpack.c.bf16 %v2469_v39, %v2466_v52  ;;  %7339 = vmatprep.subr.bf16.mxu0 %v9356_v26 }
 0x526   :  { %v7182_v7 = vpop.f32.mrf.mxu1  ;;  %v102_v46 = vpop.trf.xlu0 }
 0x527   :  { %7264 = vmatmul.mubr.msk.bf16.gmra.mxu0 %vm567_vm2, %v2980_v11 }
 0x528   :  { %v2548_v29 = vpop.f32.mrf.mxu1  ;;  %7267 = vmatprep.mubr.msk.bf16.mxu0 %vm567_vm2, %v9358_v25 }
 0x52a   :  { %v7193_v55 = vpop.f32.mrf.mxu1  ;;  %v103_v22 = vpop.trf.xlu0 }
 0x52c   :  { %v2551_v54 = vpop.f32.mrf.mxu1 }
 0x52d   :  { %v2982_v21 = vpack.c.bf16 %v2551_v54, %v2548_v29 }
 0x52e   :  { %v7194_v24 = vpop.f32.mrf.mxu1 }
 0x52f   :  { %7268 = vmatmul.mubr.msk.bf16.gmra.mxu0 %vm567_vm2, %v2982_v21 }
 0x530   :  { %v2630_v58 = vpop.f32.mrf.mxu1  ;;  %7271 = vmatprep.mubr.msk.bf16.mxu0 %vm567_vm2, %v9359_v2 }
 0x532   :  { %v7205_v35 = vpop.f32.mrf.mxu1 }
 0x533   :  { %v166_v43 = vpop.trf.xlu0 }
 0x534   :  { %v2633_v13 = vpop.f32.mrf.mxu1 }
 0x535   :  { %v2984_v31 = vpack.c.bf16 %v2633_v13, %v2630_v58 }
 0x536   :  { %v7206_v52 = vpop.f32.mrf.mxu1 }
 0x537   :  { %7272 = vmatmul.mubr.msk.bf16.gmra.mxu0 %vm567_vm2, %v2984_v31  ;;  %v8669_v52 = vpack.c.bf16 %v103_v22, %v102_v46  ;;  %v167_v38 = vpop.trf.xlu0 }
 0x538   :  { %v2712_v1 = vpop.f32.mrf.mxu1  ;;  %7299 = vmatprep.mubr.msk.bf16.mxu0 %vm567_vm2, %v9360_v32 }
 0x53a   :  { %v7217_v30 = vpop.f32.mrf.mxu1 }
 0x53c   :  { %v2715_v41 = vpop.f32.mrf.mxu1 }
 0x53d   :  { %v3256_v39 = vpack.c.bf16 %v2715_v41, %v2712_v1  ;;  %v134_v1 = vpop.trf.xlu1  ;;  %v8673_v41 = vpack.c.bf16 %v167_v38, %v166_v43 }
 0x53e   :  { %v7218_v11 = vpop.f32.mrf.mxu1 }
 0x53f   :  { %7300 = vmatmul.mubr.msk.bf16.vlgmr.msra.gmra.mxu0 %vm567_vm2, %v3256_v39  ;;  %v7707_v11 = vpop.trf.xlu0 }
 0x540   :  { %v2794_v9 = vpop.f32.mrf.mxu1  ;;  %7303 = vmatprep.mubr.msk.bf16.mxu0 %vm567_vm2, %v9361_v49  ;;  %v7708_v49 = vunpack.i.l.bf16 %v7707_v11 }
 0x541   :  { %v135_v32 = vpop.trf.xlu1 }
 0x542   :  { %v7229_v7 = vpop.f32.mrf.mxu1  ;;  %v8671_v30 = vpack.c.bf16 %v135_v32, %v134_v1 }
 0x544   :  { %v2797_v29 = vpop.f32.mrf.mxu1 }
 0x545   :  { %v3258_v25 = vpack.c.bf16 %v2797_v29, %v2794_v9  ;;  %v198_v39 = vpop.trf.xlu1  ;;  %v7711_v9 = vunpack.i.h.bf16 %v7707_v11  ;;  %v7712_v29 = vpop.trf.xlu0 }
 0x546   :  { %v7230_v55 = vpop.f32.mrf.mxu1 }
 0x547   :  { %7304 = vmatmul.mubr.msk.bf16.gmra.mxu0 %vm567_vm2, %v3258_v25  ;;  %v7713_v25 = vunpack.i.l.bf16 %v7712_v29 }
 0x548   :  { %v2876_v3 = vpop.f32.mrf.mxu1  ;;  %7307 = vmatprep.mubr.msk.bf16.mxu0 %vm567_vm2, %v9362_v12 }
 0x549   :  { %v199_v7 = vpop.trf.xlu1  ;;  %v8677_v12 = vpack.c.bf16 %v7713_v25, %v7708_v49 }
 0x54a   :  { %v7241_v54 = vpop.f32.mrf.mxu1  ;;  %v8675_v55 = vpack.c.bf16 %v199_v7, %v198_v39 }
 0x54c   :  { %v2879_v21 = vpop.f32.mrf.mxu1 }
 0x54d   :  { %v3260_v24 = vpack.c.bf16 %v2879_v21, %v2876_v3  ;;  %v7716_v3 = vunpack.i.h.bf16 %v7712_v29  ;;  %v7721_v21 = vpop.trf.xlu1 }
 0x54e   :  { %v7242_v58 = vpop.f32.mrf.mxu1 }
 0x54f   :  { %7308 = vmatmul.mubr.msk.bf16.gmra.mxu0 %vm567_vm2, %v3260_v24  ;;  %v8679_v54 = vpack.c.bf16 %v7716_v3, %v7711_v9  ;;  %v7725_v24 = vunpack.i.h.bf16 %v7721_v21  ;;  %v7722_v58 = vunpack.i.l.bf16 %v7721_v21 }
 0x550   :  { %v2958_v61 = vpop.f32.mrf.mxu1  ;;  %7311 = vmatprep.mubr.msk.bf16.mxu0 %vm567_vm2, %v9363_v48 }
 0x552   :  { %v7253_v2 = vpop.f32.mrf.mxu1 }
 0x554   :  { %v2961_v35 = vpop.f32.mrf.mxu1 }
 0x555   :  { %v3262_v13 = vpack.c.bf16 %v2961_v35, %v2958_v61  ;;  %v7726_v61 = vpop.trf.xlu1 }
 0x556   :  { %v7254_v31 = vpop.f32.mrf.mxu1  ;;  %v7730_v48 = vunpack.i.h.bf16 %v7726_v61  ;;  %v7727_v2 = vunpack.i.l.bf16 %v7726_v61 }
 0x557   :  { %7312 = vmatmul.mubr.msk.bf16.gmra.mxu0 %vm567_vm2, %v3262_v13 }
 0x558   :  { %7341 = vmatprep.mubr.msk.bf16.mxu0 %vm7838_vm3, %v9356_v26  ;;  %v8681_v35 = vpack.c.bf16 %v7727_v2, %v7722_v58  ;;  %v8683_v13 = vpack.c.bf16 %v7730_v48, %v7725_v24 }
 0x5c6   :  { %v7281_v31 = vpop.f32.mrf.mxu1 }
 0x5c8   :  { %v3192_v1 = vpop.f32.mrf.mxu1 }
 0x5ca   :  { %v7282_v38 = vpop.f32.mrf.mxu1 }
 0x5cc   :  { %v3195_v9 = vpop.f32.mrf.mxu1 }
 0x5ce   :  { %v8687_v29 = vpop.f32.mrf.mxu1 }
 0x5d0   :  { %v3208_v21 = vpop.f32.mrf.mxu1 }
 0x5d2   :  { %v7286_v61 = vpop.f32.mrf.mxu1 }
 0x5d4   :  { %v3211_v27 = vpop.f32.mrf.mxu1 }
 0x5d6   :  { %v8701_v63 = vpop.f32.mrf.mxu1 }
 0x5d8   :  { %v3224_v53 = vpop.f32.mrf.mxu1 }
 0x5da   :  { %v7290_v45 = vpop.f32.mrf.mxu1 }
 0x5df   :  { %v7261_v46 = vpop.f32.mrf.mxu0 }
 0x5e0   :  { %v3201_v51 = vadd.f32 %v7281_v31, %v7261_v46  ;;  %v3227_v46 = vpop.f32.mrf.mxu1 }
 0x5e1   :  { %v3059_v22 = vpop.f32.mrf.mxu0 }
 0x5e2   :  { %v3193_v6 = vadd.f32 %v3192_v1, %v3059_v22  ;;  %v8712_v15 = vpop.f32.mrf.mxu1 }
 0x5e3   :  { %v7262_v32 = vpop.f32.mrf.mxu0 }
 0x5e4   :  { %v3204_v0 = vadd.f32 %v7282_v38, %v7262_v32 }
 0x5e5   :  { %v3062_v43 = vpop.f32.mrf.mxu0 }
 0x5e6   :  { %v3196_v19 = vadd.f32 %v3195_v9, %v3062_v43 }
 0x5e7   :  { %v8685_v39 = vpop.f32.mrf.mxu0 }
 0x5e9   :  { %v3075_v11 = vpop.f32.mrf.mxu0 }
 0x5ea   :  { %v3209_v43 = vadd.f32 %v3208_v21, %v3075_v11  ;;  %v3240_v21 = vpop.f32.mrf.mxu1 }
 0x5eb   :  { %v7266_v49 = vpop.f32.mrf.mxu0 }
 0x5ed   :  { %v3078_v7 = vpop.f32.mrf.mxu0 }
 0x5ee   :  { %v3212_v38 = vadd.f32 %v3211_v27, %v3078_v7  ;;  %v3220_v27 = vadd.f32 %v7286_v61, %v7266_v49 }
 0x5ef   :  { %v8689_v25 = vpop.f32.mrf.mxu0 }
 0x5f1   :  { %v3091_v3 = vpop.f32.mrf.mxu0 }
 0x5f3   :  { %v8691_v24 = vpop.f32.mrf.mxu0 }
 0x5f5   :  { %v3094_v58 = vpop.f32.mrf.mxu0 }
 0x5f7   :  { %v8693_v48 = vpop.f32.mrf.mxu0 }
 0x5f9   :  { %v8695_v2 = vpop.f32.mrf.mxu0 }
 0x5fb   :  { %v8697_v28 = vpop.f32.mrf.mxu0 }
 0x5fd   :  { %v8699_v14 = vpop.f32.mrf.mxu0 }
 0x5ff   :  { %v7301_v5 = vpop.f32.mrf.mxu0 }
 0x600   :  { %v3402_v62 = vadd.f32 %v7301_v5, %v3201_v51 }
 0x601   :  { %v3337_v20 = vpop.f32.mrf.mxu0 }
 0x602   :  { %v3400_v16 = vadd.f32 %v3337_v20, %v3193_v6  ;;  %v3422_v31 = vadd.f32 %v8706_v34, %v3402_v62 }
 0x603   :  { %v7302_v18 = vpop.f32.mrf.mxu0 }
 0x604   :  { %v3403_v56 = vadd.f32 %v7302_v18, %v3204_v0  ;;  %v3420_v50 = vadd.f32 %v8706_v34, %v3400_v16  ;;  %v3438_v16 = vmax.f32 %v3422_v31, 0.0 }
 0x605   :  { %v3340_v47 = vpop.f32.mrf.mxu0 }
 0x606   :  { %v3401_v4 = vadd.f32 %v3340_v47, %v3196_v19  ;;  %v3423_v1 = vadd.f32 %v8706_v34, %v3403_v56  ;;  %v3436_v18 = vmax.f32 %v3420_v50, 0.0 }
 0x607   :  { %v7305_v22 = vpop.f32.mrf.mxu0 }
 0x608   :  { %v3421_v20 = vadd.f32 %v8706_v34, %v3401_v4  ;;  %v3439_v9 = vmax.f32 %v3423_v1, 0.0  ;;  %v3225_v4 = vadd.f32 %v3224_v53, %v3091_v3  ;;  %v3217_v53 = vadd.f32 %v8687_v29, %v8685_v39 }
 0x609   :  { %v3353_v6 = vpop.f32.mrf.mxu0  ;;  %v3228_v3 = vadd.f32 %v3227_v46, %v3094_v58  ;;  %v3236_v39 = vadd.f32 %v7290_v45, %v8691_v24 }
 0x60a   :  { %v3437_v0 = vmax.f32 %v3421_v20, 0.0  ;;  %v3404_v19 = vadd.f32 %v3353_v6, %v3209_v43  ;;  %v3453_v62 = vpack.c.bf16 %v3439_v9, %v3438_v16 }
 0x60b   :  { %v7306_v32 = vpop.f32.mrf.mxu0 }
 0x60c   :  { %v3452_v51 = vpack.c.bf16 %v3437_v0, %v3436_v18  ;;  %v3424_v11 = vadd.f32 %v8706_v34, %v3404_v19  ;;  %v3407_v6 = vadd.f32 %v7306_v32, %v3220_v27  ;;  %v3406_v0 = vadd.f32 %v7305_v22, %v3217_v53 }
 0x60d   :  { %v3356_v5 = vpop.f32.mrf.mxu0 }
 0x60e   :  { %v3405_v47 = vadd.f32 %v3356_v5, %v3212_v38  ;;  %7316 = vmatpush3.bf16.msra.mxu1 %v3452_v51  ;;  %v3440_v49 = vmax.f32 %v3424_v11, 0.0  ;;  %v7294_v38 = vpop.f32.mrf.mxu1  ;;  %v3241_v51 = vadd.f32 %v3240_v21, %v8695_v2  ;;  %v3427_v5 = vadd.f32 %v8706_v34, %v3407_v6 }
 0x60f   :  { %v7309_v56 = vpop.f32.mrf.mxu0  ;;  %7321 = vmatprep.subr.bf16.mxu1 %v9356_v26  ;;  %v3426_v58 = vadd.f32 %v8706_v34, %v3406_v0  ;;  %v3249_v6 = vadd.f32 %v8712_v15, %v8693_v48 }
 0x610   :  { %v3425_v50 = vadd.f32 %v8706_v34, %v3405_v47  ;;  %v3243_v2 = vpop.f32.mrf.mxu1  ;;  %v3233_v47 = vadd.f32 %v8701_v63, %v8689_v25  ;;  %v3443_v24 = vmax.f32 %v3427_v5, 0.0  ;;  %v7771_v5 = vld [vmem:[%s9267_s3 + $0x94] sm:$0xff]  }
 0x611   :  { %v3369_v20 = vpop.f32.mrf.mxu0  ;;  %7318 = vmatmul.mubr.msk.bf16.vlgmr.msra.gmra.mxu1 %vm877_vm4, %v8669_v52  ;;  %v3244_v45 = vadd.f32 %v3243_v2, %v8699_v14  ;;  %v3442_v27 = vmax.f32 %v3426_v58, 0.0  ;;  %v3252_v14 = vadd.f32 %v7294_v38, %v8697_v28 }
 0x612   :  { %v3408_v7 = vadd.f32 %v3369_v20, %v3225_v4  ;;  %7322 = vmatpush3.bf16.msra.mxu1 %v3453_v62  ;;  %7323 = vmatprep.mubr.msk.bf16.mxu1 %vm7838_vm3, %v9356_v26  ;;  %v3441_v31 = vmax.f32 %v3425_v50, 0.0  ;;  %v3410_v11 = vadd.f32 %v7309_v56, %v3233_v47 }
 0x613   :  { %v7310_v1 = vpop.f32.mrf.mxu0  ;;  %7327 = vmatprep.subr.bf16.mxu1 %v9356_v26  ;;  %v3455_v53 = vpack.c.bf16 %v3443_v24, %v3442_v27 }
 0x614   :  { %v3428_v61 = vadd.f32 %v8706_v34, %v3408_v7  ;;  %v3454_v16 = vpack.c.bf16 %v3441_v31, %v3440_v49  ;;  %v3411_v62 = vadd.f32 %v7310_v1, %v3236_v39  ;;  %v3430_v56 = vadd.f32 %v8706_v34, %v3410_v11 }
 0x615   :  { %v3372_v18 = vpop.f32.mrf.mxu0 }
 0x616   :  { %v3409_v43 = vadd.f32 %v3372_v18, %v3228_v3  ;;  %v3444_v22 = vmax.f32 %v3428_v61, 0.0  ;;  %v3431_v63 = vadd.f32 %v8706_v34, %v3411_v62  ;;  %v3446_v28 = vmax.f32 %v3430_v56, 0.0 }
 0x617   :  { %v7313_v9 = vpop.f32.mrf.mxu0 }
 0x618   :  { %v3429_v19 = vadd.f32 %v8706_v34, %v3409_v43  ;;  %v3447_v31 = vmax.f32 %v3431_v63, 0.0  ;;  %v3414_v49 = vadd.f32 %v7313_v9, %v3249_v6  ;;  %v7769_v9 = vld [vmem:[%s9267_s3 + $0x84] sm:$0xff]  }
 0x619   :  { %v3385_v29 = vpop.f32.mrf.mxu0  ;;  %7324 = vmatmul.mubr.msk.bf16.vlgmr.msra.gmra.mxu1 %vm877_vm4, %v8671_v30 }
 0x61a   :  { %v3445_v46 = vmax.f32 %v3429_v19, 0.0  ;;  %v3412_v32 = vadd.f32 %v3385_v29, %v3241_v51  ;;  %7328 = vmatpush3.bf16.msra.mxu1 %v3454_v16  ;;  %7329 = vmatprep.mubr.msk.bf16.mxu1 %vm7838_vm3, %v9356_v26  ;;  %v3457_v61 = vpack.c.bf16 %v3447_v31, %v3446_v28  ;;  %v3434_v38 = vadd.f32 %v8706_v34, %v3414_v49  ;;  %v7772_v16 = vld [vmem:[%s9267_s3 + $0x8c] sm:$0xff]  }
 0x61b   :  { %v7314_v4 = vpop.f32.mrf.mxu0  ;;  %7333 = vmatprep.subr.bf16.mxu1 %v9356_v26 }
 0x61c   :  { %v3456_v50 = vpack.c.bf16 %v3445_v46, %v3444_v22  ;;  %v3432_v7 = vadd.f32 %v8706_v34, %v3412_v32  ;;  %v3415_v18 = vadd.f32 %v7314_v4, %v3252_v14  ;;  %v3450_v48 = vmax.f32 %v3434_v38, 0.0 }
 0x61d   :  { %v3388_v20 = vpop.f32.mrf.mxu0 }
 0x61e   :  { %v3413_v21 = vadd.f32 %v3388_v20, %v3244_v45  ;;  %7340 = vmatpush3.bf16.msra.mxu0 %v3456_v50  ;;  %v3448_v1 = vmax.f32 %v3432_v7, 0.0  ;;  %v3435_v43 = vadd.f32 %v8706_v34, %v3415_v18 }
 0x61f   :  { %7351 = vmatprep.subr.bf16.mxu0 %v9356_v26 }
 0x620   :  { %v3433_v25 = vadd.f32 %v8706_v34, %v3413_v21  ;;  %v3451_v15 = vmax.f32 %v3435_v43, 0.0  ;;  %v7770_v34 = vld [vmem:[%s9267_s3 + $0x7c] sm:$0xff]  }
 0x621   :  { %7330 = vmatmul.mubr.msk.bf16.vlgmr.msra.gmra.mxu1 %vm877_vm4, %v8673_v41  ;;  %7342 = vmatmul.mubr.msk.bf16.vlgmr.msra.gmra.mxu0 %vm877_vm4, %v8677_v12 }
 0x622   :  { %v3449_v3 = vmax.f32 %v3433_v25, 0.0  ;;  %7334 = vmatpush3.bf16.msra.mxu1 %v3455_v53  ;;  %7335 = vmatprep.mubr.msk.bf16.mxu1 %vm7838_vm3, %v9356_v26  ;;  %v3459_v51 = vpack.c.bf16 %v3451_v15, %v3450_v48 }
 0x623   :  { %7345 = vmatprep.subr.bf16.mxu1 %v9356_v26  ;;  %7353 = vmatprep.mubr.msk.bf16.mxu0 %vm7838_vm3, %v9356_v26 }
 0x624   :  { %v3458_v0 = vpack.c.bf16 %v3449_v3, %v3448_v1 }
 0x626   :  { %7352 = vmatpush3.bf16.msra.mxu0 %v3458_v0 }
 0x627   :  { %7363 = vmatprep.subr.bf16.mxu0 %v7771_v5 }
 0x629   :  { %7336 = vmatmul.mubr.msk.bf16.vlgmr.msra.gmra.mxu1 %vm877_vm4, %v8675_v55  ;;  %7354 = vmatmul.mubr.msk.bf16.vlgmr.msra.gmra.mxu0 %vm877_vm4, %v8681_v35 }
 0x62a   :  { %7346 = vmatpush3.bf16.msra.mxu1 %v3457_v61  ;;  %7347 = vmatprep.mubr.msk.bf16.mxu1 %vm7838_vm3, %v9356_v26 }
 0x62b   :  { %7357 = vmatprep.subr.bf16.mxu1 %v9356_v26  ;;  %7364 = vmatpush3.bf16.msra.mxu0 %v7771_v5 }
 0x62c   :  { %7365 = vmatprep.subr.bf16.mxu0 %v7772_v16 }
 0x62f   :  { %7366 = vmatpush3.bf16.msra.mxu0 %v7772_v16 }
 0x630   :  { %7403 = vmatprep.subr.bf16.mxu0 %v9356_v26 }
 0x631   :  { %7348 = vmatmul.mubr.msk.bf16.vlgmr.msra.gmra.mxu1 %vm877_vm4, %v8679_v54 }
 0x632   :  { %7358 = vmatpush3.bf16.msra.mxu1 %v3459_v51  ;;  %7359 = vmatprep.mubr.msk.bf16.mxu1 %vm7838_vm3, %v9356_v26 }
 0x633   :  { %7383 = vmatprep.subr.bf16.mxu1 %v7769_v9 }
 0x639   :  { %7360 = vmatmul.mubr.msk.bf16.vlgmr.msra.gmra.mxu1 %vm877_vm4, %v8683_v13 }
 0x63a   :  { %7384 = vmatpush3.bf16.msra.mxu1 %v7769_v9  ;;  %7387 = vmatprep.mubr.msk.bf16.mxu1 %vm567_vm2, %v8293_v36 }
 0x63b   :  { %7385 = vmatprep.subr.bf16.mxu1 %v7770_v34 }
 0x63e   :  { %7386 = vmatpush3.bf16.msra.mxu1 %v7770_v34 }
 0x63f   :  { %7409 = vmatprep.subr.bf16.mxu1 %v9356_v26 }
 0x641   :  { %7388 = vmatmul.mubr.msk.bf16.vlgmr.msra.gmra.mxu1 %vm567_vm2, %v8421_v8 }
 0x642   :  { %7391 = vmatprep.mubr.msk.bf16.mxu1 %vm567_vm2, %v8331_v37 }
 0x649   :  { %7392 = vmatmul.mubr.msk.bf16.gmra.mxu1 %vm567_vm2, %v8442_v10 }
 0x64a   :  { %7395 = vmatprep.mubr.msk.bf16.mxu1 %vm567_vm2, %v8351_v57 }
 0x651   :  { %7396 = vmatmul.mubr.msk.bf16.gmra.mxu1 %vm567_vm2, %v8457_v60 }
 0x652   :  { %7399 = vmatprep.mubr.msk.bf16.mxu1 %vm567_vm2, %v8371_v23 }
 0x659   :  { %7400 = vmatmul.mubr.msk.bf16.gmra.mxu1 %vm567_vm2, %v8472_v42 }
 0x65a   :  { %7411 = vmatprep.mubr.msk.bf16.mxu1 %vm7838_vm3, %v9356_v26 }
 0x6d1   :  { %v3497_v19 = vpop.f32.mrf.mxu1 }
 0x6d3   :  { %v7319_v39 = vpop.f32.mrf.mxu1 }
 0x6d5   :  { %v3500_v29 = vpop.f32.mrf.mxu1 }
 0x6d6   :  { %v3816_v58 = vpack.c.bf16 %v3500_v29, %v3497_v19 }
 0x6d7   :  { %v7320_v22 = vpop.f32.mrf.mxu1 }
 0x6d8   :  { %7367 = vmatprep.mubr.msk.bf16.mxu0 %vm567_vm2, %v3816_v58  ;;  %v8815_v22 = vld [vmem:[%s9268_s4 + $0x7] ss:$0 sm:$0xff] }
 0x6d9   :  { %v3541_v46 = vpop.f32.mrf.mxu1 }
 0x6db   :  { %v7325_v32 = vpop.f32.mrf.mxu1 }
 0x6dd   :  { %v3544_v2 = vpop.f32.mrf.mxu1 }
 0x6de   :  { %v3817_v47 = vpack.c.bf16 %v3544_v2, %v3541_v46 }
 0x6df   :  { %v7326_v4 = vpop.f32.mrf.mxu1 }
 0x6e0   :  { %7368 = vmatmul.mubr.msk.bf16.vlgmr.msra.gmra.mxu0 %vm567_vm2, %v3817_v47 }
 0x6e1   :  { %v3585_v45 = vpop.f32.mrf.mxu1  ;;  %v3673_v24 = vpop.f32.mrf.mxu0 }
 0x6e3   :  { %v7331_v62 = vpop.f32.mrf.mxu1  ;;  %v7343_v50 = vpop.f32.mrf.mxu0 }
 0x6e5   :  { %v3588_v20 = vpop.f32.mrf.mxu1  ;;  %v3676_v27 = vpop.f32.mrf.mxu0 }
 0x6e6   :  { %v3818_v11 = vpack.c.bf16 %v3588_v20, %v3585_v45  ;;  %v3820_v6 = vpack.c.bf16 %v3676_v27, %v3673_v24 }
 0x6e7   :  { %v7332_v7 = vpop.f32.mrf.mxu1  ;;  %v7344_v21 = vpop.f32.mrf.mxu0 }
 0x6e8   :  { %7371 = vmatprep.mubr.msk.bf16.mxu0 %vm567_vm2, %v3818_v11 }
 0x6e9   :  { %v3629_v53 = vpop.f32.mrf.mxu1  ;;  %v3761_v63 = vpop.f32.mrf.mxu0 }
 0x6eb   :  { %v7337_v25 = vpop.f32.mrf.mxu1  ;;  %v7355_v14 = vpop.f32.mrf.mxu0 }
 0x6ed   :  { %v3632_v56 = vpop.f32.mrf.mxu1  ;;  %v3764_v1 = vpop.f32.mrf.mxu0 }
 0x6ee   :  { %v3819_v3 = vpack.c.bf16 %v3632_v56, %v3629_v53  ;;  %v3822_v43 = vpack.c.bf16 %v3764_v1, %v3761_v63  ;;  %v9366_v63 = vmax.f32 %v8204_v44, 0.0 }
 0x6ef   :  { %v7338_v31 = vpop.f32.mrf.mxu1  ;;  %v7356_v18 = vpop.f32.mrf.mxu0 }
 0x6f0   :  { %7372 = vmatmul.mubr.msk.bf16.gmra.mxu0 %vm567_vm2, %v3819_v3 }
 0x6f1   :  { %v3717_v0 = vpop.f32.mrf.mxu1  ;;  %7375 = vmatprep.mubr.msk.bf16.mxu0 %vm567_vm2, %v3820_v6  ;;  %v9367_v6 = vmax.f32 %v8279_v59, 0.0 }
 0x6f3   :  { %v7349_v28 = vpop.f32.mrf.mxu1 }
 0x6f5   :  { %v3720_v49 = vpop.f32.mrf.mxu1 }
 0x6f6   :  { %v3821_v61 = vpack.c.bf16 %v3720_v49, %v3717_v0 }
 0x6f7   :  { %v7350_v38 = vpop.f32.mrf.mxu1 }
 0x6f8   :  { %7376 = vmatmul.mubr.msk.bf16.gmra.mxu0 %vm567_vm2, %v3821_v61 }
 0x6f9   :  { %v3805_v15 = vpop.f32.mrf.mxu1  ;;  %7379 = vmatprep.mubr.msk.bf16.mxu0 %vm567_vm2, %v3822_v43 }
 0x6fb   :  { %v7361_v48 = vpop.f32.mrf.mxu1 }
 0x6fd   :  { %v3808_v9 = vpop.f32.mrf.mxu1 }
 0x6fe   :  { %v3823_v51 = vpack.c.bf16 %v3808_v9, %v3805_v15 }
 0x6ff   :  { %v7362_v34 = vpop.f32.mrf.mxu1 }
 0x700   :  { %7380 = vmatmul.mubr.msk.bf16.gmra.mxu0 %vm567_vm2, %v3823_v51  ;;  %v9368_v51 = vld [vmem:[#allocation5_spill] sm:$0xff] }
 0x701   :  { %7405 = vmatprep.mubr.msk.bf16.mxu0 %vm7838_vm3, %v9356_v26  ;;  %v7389_v5 = vpop.f32.mrf.mxu1 }
 0x703   :  { %v4031_v16 = vpop.f32.mrf.mxu1 }
 0x705   :  { %v7390_v19 = vpop.f32.mrf.mxu1 }
 0x707   :  { %v4034_v39 = vpop.f32.mrf.mxu1 }
 0x709   :  { %v7393_v29 = vpop.f32.mrf.mxu1 }
 0x70b   :  { %v4047_v58 = vpop.f32.mrf.mxu1 }
 0x70d   :  { %v7394_v47 = vpop.f32.mrf.mxu1 }
 0x70f   :  { %v4050_v27 = vpop.f32.mrf.mxu1 }
 0x711   :  { %v7397_v56 = vpop.f32.mrf.mxu1 }
 0x713   :  { %v4063_v49 = vpop.f32.mrf.mxu1 }
 0x715   :  { %v7398_v38 = vpop.f32.mrf.mxu1 }
 0x7a0   :  { %v7369_v46 = vpop.f32.mrf.mxu0 }
 0x7a1   :  { %v4040_v32 = vadd.f32 %v7389_v5, %v7369_v46 }
 0x7a2   :  { %v3898_v2 = vpop.f32.mrf.mxu0 }
 0x7a3   :  { %v4100_v4 = vadd.f32 %v8815_v22, %v4040_v32  ;;  %v4032_v45 = vadd.f32 %v4031_v16, %v3898_v2  ;;  %v4066_v16 = vpop.f32.mrf.mxu1  ;;  %v9371_v32 = vld [vmem:[#allocation16_spill] sm:$0xff] }
 0x7a4   :  { %v7370_v24 = vpop.f32.mrf.mxu0 }
 0x7a5   :  { %v4098_v62 = vadd.f32 %v8815_v22, %v4032_v45  ;;  %v4043_v50 = vadd.f32 %v7390_v19, %v7370_v24  ;;  %v8820_v11 = vadd.f32 %v4100_v4, %v8416_v40  ;;  %v9369_v19 = vld [vmem:[#allocation21_spill] sm:$0xff]  ;;  %v9373_v4 = vld [vmem:[#allocation12_spill] sm:$0xff] }
 0x7a6   :  { %v3901_v20 = vpop.f32.mrf.mxu0  ;;  %v9374_v45 = vmax.f32 %v9373_v4, 0.0 }
 0x7a7   :  { %9364 = vst [vmem:[#allocation32_spill] sm:$0xff] %v8820_v11  ;;  %v4101_v7 = vadd.f32 %v8815_v22, %v4043_v50  ;;  %v4035_v21 = vadd.f32 %v4034_v39, %v3901_v20  ;;  %v8824_v53 = vadd.f32 %v4098_v62, %v8288_v33  ;;  %v9320_v1 = vmax.f32 %v8820_v11, 0.0  ;;  %v7401_v20 = vpop.f32.mrf.mxu1 }
 0x7a9   :  { %9365 = vst [vmem:[#allocation33_spill] sm:$0xff] %v8824_v53  ;;  %v4117_v25 = vadd.f32 %v4101_v7, %v9366_v63  ;;  %v4099_v14 = vadd.f32 %v8815_v22, %v4035_v21  ;;  %v9319_v18 = vmax.f32 %v8824_v53, 0.0  ;;  %v9375_v63 = vld [vmem:[#allocation15_spill] sm:$0xff]  ;;  %v9078_v53 = vld [vmem:[%s9268_s4 + $0x6] ss:$0 sm:$0xff] }
 0x7ab   :  { %v4133_v3 = vmax.f32 %v4117_v25, 0.0  ;;  %v4115_v31 = vadd.f32 %v4099_v14, %v9367_v6  ;;  %v9376_v25 = vmax.f32 %v9375_v63, 0.0 }
 0x7ad   :  { %v8835_v0 = vpack.c.bf16 %v4133_v3, %v9320_v1  ;;  %v4131_v28 = vmax.f32 %v4115_v31, 0.0 }
 0x7af   :  { %7410 = vmatpush3.bf16.msra.mxu1 %v8835_v0  ;;  %v8840_v44 = vpack.c.bf16 %v4131_v28, %v9319_v18 }
 0x7b0   :  { %v7373_v61 = vpop.f32.mrf.mxu0  ;;  %7421 = vmatprep.subr.bf16.mxu1 %v9356_v26 }
 0x7b1   :  { %v4056_v43 = vadd.f32 %v7393_v29, %v7373_v61  ;;  %7404 = vmatpush3.bf16.msra.mxu0 %v8840_v44 }
 0x7b2   :  { %v3914_v59 = vpop.f32.mrf.mxu0  ;;  %7412 = vmatmul.mubr.msk.bf16.vlgmr.msra.gmra.mxu1 %vm877_vm4, %v7975_v17  ;;  %7415 = vmatprep.subr.bf16.mxu0 %v9356_v26 }
 0x7b3   :  { %v4104_v15 = vadd.f32 %v8815_v22, %v4056_v43  ;;  %v4048_v48 = vadd.f32 %v4047_v58, %v3914_v59  ;;  %7423 = vmatprep.mubr.msk.bf16.mxu1 %vm7838_vm3, %v9356_v26 }
 0x7b4   :  { %v7374_v9 = vpop.f32.mrf.mxu0  ;;  %7406 = vmatmul.mubr.msk.bf16.vlgmr.msra.gmra.mxu0 %vm877_vm4, %v9368_v51 }
 0x7b5   :  { %v4102_v34 = vadd.f32 %v8815_v22, %v4048_v48  ;;  %v4059_v5 = vadd.f32 %v7394_v47, %v7374_v9  ;;  %7417 = vmatprep.mubr.msk.bf16.mxu0 %vm7838_vm3, %v9356_v26  ;;  %v8856_v39 = vadd.f32 %v4104_v15, %v9369_v19  ;;  %v4079_v15 = vpop.f32.mrf.mxu1  ;;  %v9377_v9 = vld [vmem:[#allocation22_spill] sm:$0xff] }
 0x7b6   :  { %v3917_v17 = vpop.f32.mrf.mxu0 }
 0x7b7   :  { %9370 = vst [vmem:[#allocation5_spill] sm:$0xff] %v8856_v39  ;;  %v4105_v29 = vadd.f32 %v8815_v22, %v4059_v5  ;;  %v4051_v58 = vadd.f32 %v4050_v27, %v3917_v17  ;;  %v8860_v2 = vadd.f32 %v4102_v34, %v9371_v32  ;;  %v9318_v7 = vmax.f32 %v8856_v39, 0.0  ;;  %v9379_v17 = vld [vmem:[#allocation18_spill] sm:$0xff] }
 0x7b8   :  { %v7377_v46 = vpop.f32.mrf.mxu0 }
 0x7b9   :  { %9372 = vst [vmem:[#allocation21_spill] sm:$0xff] %v8860_v2  ;;  %v4121_v24 = vadd.f32 %v4105_v29, %v9374_v45  ;;  %v4103_v47 = vadd.f32 %v8815_v22, %v4051_v58  ;;  %v4072_v62 = vadd.f32 %v7397_v56, %v7377_v46  ;;  %v9317_v31 = vmax.f32 %v8860_v2, 0.0  ;;  %v9381_v58 = vld [vmem:[#allocation13_spill] sm:$0xff] }
 0x7ba   :  { %v3930_v50 = vpop.f32.mrf.mxu0  ;;  %v9382_v46 = vmax.f32 %v9381_v58, 0.0 }
 0x7bb   :  { %v4137_v21 = vmax.f32 %v4121_v24, 0.0  ;;  %v4119_v14 = vadd.f32 %v4103_v47, %v9376_v25  ;;  %v4064_v3 = vadd.f32 %v4063_v49, %v3930_v50  ;;  %v4108_v27 = vadd.f32 %v8815_v22, %v4072_v62  ;;  %v9383_v24 = vld [vmem:[#allocation7_spill] sm:$0xff]  ;;  %v7402_v47 = vpop.f32.mrf.mxu1  ;;  %v9384_v62 = vld [vmem:[#allocation17_spill] sm:$0xff] }
 0x7bc   :  { %v7378_v6 = vpop.f32.mrf.mxu0  ;;  %v9385_v50 = vmax.f32 %v9384_v62, 0.0 }
 0x7bd   :  { %v8872_v28 = vpack.c.bf16 %v4137_v21, %v9318_v7  ;;  %v4135_v61 = vmax.f32 %v4119_v14, 0.0  ;;  %v4106_v56 = vadd.f32 %v8815_v22, %v4064_v3  ;;  %v4075_v43 = vadd.f32 %v7398_v38, %v7378_v6 }
 0x7be   :  { %v3933_v59 = vpop.f32.mrf.mxu0  ;;  %v8881_v51 = vadd.f32 %v4108_v27, %v9377_v9  ;;  %v9386_v27 = vld [vmem:[#allocation6_spill] sm:$0xff] }
 0x7bf   :  { %v4067_v48 = vadd.f32 %v4066_v16, %v3933_v59  ;;  %7422 = vmatpush3.bf16.msra.mxu1 %v8872_v28  ;;  %v8878_v49 = vpack.c.bf16 %v4135_v61, %v9317_v31  ;;  %v4109_v34 = vadd.f32 %v8815_v22, %v4075_v43  ;;  %v8886_v29 = vadd.f32 %v4106_v56, %v9379_v17 }
 0x7c0   :  { %9378 = vst [vmem:[#allocation16_spill] sm:$0xff] %v8881_v51  ;;  %v7381_v5 = vpop.f32.mrf.mxu0  ;;  %7433 = vmatprep.subr.bf16.mxu1 %v9356_v26 }
 0x7c1   :  { %9380 = vst [vmem:[#allocation12_spill] sm:$0xff] %v8886_v29  ;;  %v4107_v38 = vadd.f32 %v8815_v22, %v4067_v48  ;;  %v4088_v16 = vadd.f32 %v7401_v20, %v7381_v5  ;;  %7416 = vmatpush3.bf16.msra.mxu0 %v8878_v49  ;;  %v4125_v4 = vadd.f32 %v4109_v34, %v9382_v46  ;;  %v9316_v20 = vmax.f32 %v8881_v51, 0.0  ;;  %v4082_v48 = vpop.f32.mrf.mxu1  ;;  %v9387_v5 = vld [vmem:[#allocation23_spill] sm:$0xff]  ;;  %v9389_v46 = vld [vmem:[#allocation14_spill] sm:$0xff] }
 0x7c2   :  { %v3946_v45 = vpop.f32.mrf.mxu0  ;;  %7424 = vmatmul.mubr.msk.bf16.vlgmr.msra.gmra.mxu1 %vm877_vm4, %v9383_v24  ;;  %7427 = vmatprep.subr.bf16.mxu0 %v9356_v26  ;;  %v9315_v6 = vmax.f32 %v8886_v29, 0.0  ;;  %v9391_v24 = vld [vmem:[#allocation20_spill] sm:$0xff] }
 0x7c3   :  { %v4123_v21 = vadd.f32 %v4107_v38, %v9385_v50  ;;  %v4112_v63 = vadd.f32 %v8815_v22, %v4088_v16  ;;  %v4080_v25 = vadd.f32 %v4079_v15, %v3946_v45  ;;  %7435 = vmatprep.mubr.msk.bf16.mxu1 %vm7838_vm3, %v9356_v26  ;;  %v4141_v14 = vmax.f32 %v4125_v4, 0.0 }
 0x7c4   :  { %v7382_v3 = vpop.f32.mrf.mxu0  ;;  %7418 = vmatmul.mubr.msk.bf16.vlgmr.msra.gmra.mxu0 %vm877_vm4, %v9386_v27  ;;  %v9390_v4 = vmax.f32 %v9389_v46, 0.0  ;;  %v9396_v27 = vld [vmem:[#allocation10_spill] sm:$0xff]  ;;  %v7811_v46 = vld [vmem:[%s9266_s2 + $0x38] sm:$0xff]  }
 0x7c5   :  { %v4139_v61 = vmax.f32 %v4123_v21, 0.0  ;;  %v4091_v56 = vadd.f32 %v7402_v47, %v7382_v3  ;;  %7429 = vmatprep.mubr.msk.bf16.mxu0 %vm7838_vm3, %v9356_v26  ;;  %v4151_v43 = vpack.c.bf16 %v4141_v14, %v9316_v20  ;;  %v4110_v59 = vadd.f32 %v8815_v22, %v4080_v25  ;;  %v9394_v25 = vld [vmem:[#allocation19_spill] sm:$0xff] }
 0x7c6   :  { %v3949_v15 = vpop.f32.mrf.mxu0  ;;  %v8912_v38 = vadd.f32 %v4112_v63, %v9387_v5  ;;  %v9393_v63 = vld [vmem:[#allocation8_spill] sm:$0xff]  ;;  %v9395_v14 = vmax.f32 %v9394_v25, 0.0  ;;  %v9401_v25 = vld [vmem:[#allocation26_spill] sm:$0xff] }
 0x7c7   :  { %v4150_v34 = vpack.c.bf16 %v4139_v61, %v9315_v6  ;;  %v4113_v16 = vadd.f32 %v8815_v22, %v4091_v56  ;;  %v4083_v58 = vadd.f32 %v4082_v48, %v3949_v15  ;;  %7434 = vmatpush3.bf16.msra.mxu1 %v4151_v43  ;;  %v8919_v47 = vadd.f32 %v4110_v59, %v9391_v24  ;;  %v9397_v15 = vld [vmem:[#allocation9_spill] sm:$0xff]  ;;  %v9398_v48 = vld [vmem:[#allocation11_spill] sm:$0xff] }
 0x7c8   :  { %9388 = vst [vmem:[#allocation15_spill] sm:$0xff] %v8912_v38  ;;  %7445 = vmatprep.subr.bf16.mxu1 %v9356_v26  ;;  %v9314_v50 = vmax.f32 %v8912_v38, 0.0 }
 0x7c9   :  { %v4129_v45 = vadd.f32 %v4113_v16, %v9390_v4  ;;  %7428 = vmatpush3.bf16.msra.mxu0 %v4150_v34  ;;  %9392 = vst [vmem:[#allocation18_spill] sm:$0xff] %v8919_v47  ;;  %v4111_v62 = vadd.f32 %v8815_v22, %v4083_v58  ;;  %v9313_v61 = vmax.f32 %v8919_v47, 0.0  ;;  %v7805_v16 = vld [vmem:[%s9266_s2 + $0x8] sm:$0xff]   ;;  %v9399_v4 = vld [vmem:[#allocation24_spill] sm:$0xff] }
 0x7ca   :  { %7439 = vmatprep.subr.bf16.mxu0 %v9356_v26  ;;  %7436 = vmatmul.mubr.msk.bf16.vlgmr.msra.gmra.mxu1 %vm877_vm4, %v9393_v63  ;;  %v7774_v58 = vld [vmem:[%s9267_s3 + $0x4c] sm:$0xff]   ;;  %v9400_v63 = vld [vmem:[#allocation25_spill] sm:$0xff] }
 0x7cb   :  { %v4145_v21 = vmax.f32 %v4129_v45, 0.0  ;;  %v4127_v3 = vadd.f32 %v4111_v62, %v9395_v14  ;;  %7447 = vmatprep.mubr.msk.bf16.mxu1 %vm7838_vm3, %v9356_v26  ;;  %v7775_v45 = vld [vmem:[%s9267_s3 + $0x64] sm:$0xff]   ;;  %v7812_v62 = vld [vmem:[%s9266_s2 + $0x30] sm:$0xff]  }
 0x7cc   :  { %7430 = vmatmul.mubr.msk.bf16.vlgmr.msra.gmra.mxu0 %vm877_vm4, %v9396_v27  ;;  %v9402_v14 = vld [vmem:[#allocation27_spill] sm:$0xff]  ;;  %v9404_v27 = vld [vmem:[#allocation29_spill] sm:$0xff] }
 0x7cd   :  { %v4153_v22 = vpack.c.bf16 %v4145_v21, %v9314_v50  ;;  %7441 = vmatprep.mubr.msk.bf16.mxu0 %vm7838_vm3, %v9356_v26  ;;  %v4143_v56 = vmax.f32 %v4127_v3, 0.0  ;;  %v7776_v21 = vld [vmem:[%s9267_s3 + $0x5c] sm:$0xff]  }
 0x7ce   :  { %v9403_v3 = vld [vmem:[#allocation28_spill] sm:$0xff] }
 0x7cf   :  { %7446 = vmatpush3.bf16.msra.mxu1 %v4153_v22  ;;  %v4152_v59 = vpack.c.bf16 %v4143_v56, %v9313_v61  ;;  %v9406_v56 = vld [vmem:[#allocation31_spill] sm:$0xff] }
 0x7d0   :  { %7457 = vmatprep.subr.bf16.mxu1 %v9356_v26 }
 0x7d1   :  { %7440 = vmatpush3.bf16.msra.mxu0 %v4152_v59 }
 0x7d2   :  { %7448 = vmatmul.mubr.msk.bf16.vlgmr.msra.gmra.mxu1 %vm877_vm4, %v9397_v15  ;;  %7451 = vmatprep.subr.bf16.mxu0 %v9356_v26 }
 0x7d3   :  { %7458 = vmatpush3.bf16.msra.mxu1 %v8835_v0  ;;  %7459 = vmatprep.mubr.msk.bf16.mxu1 %vm7838_vm3, %v9356_v26  ;;  %v7806_v0 = vld [vmem:[%s9266_s2] sm:$0xff]  }
 0x7d4   :  { %7442 = vmatmul.mubr.msk.bf16.vlgmr.msra.gmra.mxu0 %vm877_vm4, %v9398_v48  ;;  %7469 = vmatprep.subr.bf16.mxu1 %v9356_v26 }
 0x7d5   :  { %7452 = vmatpush3.bf16.msra.mxu0 %v8840_v44  ;;  %7453 = vmatprep.mubr.msk.bf16.mxu0 %vm7838_vm3, %v9356_v26  ;;  %v7807_v44 = vld [vmem:[%s9266_s2 + $0x18] sm:$0xff]  }
 0x7d6   :  { %7463 = vmatprep.subr.bf16.mxu0 %v9356_v26 }
 0x7da   :  { %7460 = vmatmul.mubr.msk.bf16.vlgmr.msra.gmra.mxu1 %vm877_vm4, %v7805_v16 }
 0x7db   :  { %7470 = vmatpush3.bf16.msra.mxu1 %v8872_v28  ;;  %7471 = vmatprep.mubr.msk.bf16.mxu1 %vm7838_vm3, %v9356_v26  ;;  %v7808_v28 = vld [vmem:[%s9266_s2 + $0x10] sm:$0xff]  }
 0x7dc   :  { %7454 = vmatmul.mubr.msk.bf16.vlgmr.msra.gmra.mxu0 %vm877_vm4, %v7806_v0  ;;  %7481 = vmatprep.subr.bf16.mxu1 %v9356_v26 }
 0x7dd   :  { %7464 = vmatpush3.bf16.msra.mxu0 %v8878_v49  ;;  %7465 = vmatprep.mubr.msk.bf16.mxu0 %vm7838_vm3, %v9356_v26  ;;  %v7773_v49 = vld [vmem:[%s9267_s3 + $0x54] sm:$0xff]  }
 0x7de   :  { %7475 = vmatprep.subr.bf16.mxu0 %v9356_v26 }
 0x7e2   :  { %7472 = vmatmul.mubr.msk.bf16.vlgmr.msra.gmra.mxu1 %vm877_vm4, %v7807_v44 }
 0x7e3   :  { %7482 = vmatpush3.bf16.msra.mxu1 %v4151_v43  ;;  %7483 = vmatprep.mubr.msk.bf16.mxu1 %vm7838_vm3, %v9356_v26  ;;  %v7809_v43 = vld [vmem:[%s9266_s2 + $0x28] sm:$0xff]  }
 0x7e4   :  { %7466 = vmatmul.mubr.msk.bf16.vlgmr.msra.gmra.mxu0 %vm877_vm4, %v7808_v28  ;;  %7493 = vmatprep.subr.bf16.mxu1 %v9356_v26 }
 0x7e5   :  { %7476 = vmatpush3.bf16.msra.mxu0 %v4150_v34  ;;  %7477 = vmatprep.mubr.msk.bf16.mxu0 %vm7838_vm3, %v9356_v26  ;;  %v7810_v34 = vld [vmem:[%s9266_s2 + $0x20] sm:$0xff]  }
 0x7e6   :  { %7487 = vmatprep.subr.bf16.mxu0 %v9356_v26 }
 0x7ea   :  { %7484 = vmatmul.mubr.msk.bf16.vlgmr.msra.gmra.mxu1 %vm877_vm4, %v7809_v43 }
 0x7eb   :  { %7494 = vmatpush3.bf16.msra.mxu1 %v4153_v22  ;;  %7495 = vmatprep.mubr.msk.bf16.mxu1 %vm7838_vm3, %v9356_v26  ;;  %v9405_v22 = vld [vmem:[#allocation30_spill] sm:$0xff] }
 0x7ec   :  { %7478 = vmatmul.mubr.msk.bf16.vlgmr.msra.gmra.mxu0 %vm877_vm4, %v7810_v34  ;;  %7519 = vmatprep.subr.bf16.mxu1 %v7773_v49 }
 0x7ed   :  { %7488 = vmatpush3.bf16.msra.mxu0 %v4152_v59  ;;  %7489 = vmatprep.mubr.msk.bf16.mxu0 %vm7838_vm3, %v9356_v26  ;;  %v7777_v59 = vld [vmem:[%s9267_s3 + $0x74] sm:$0xff]  }
 0x7ee   :  { %7499 = vmatprep.subr.bf16.mxu0 %v7775_v45 }
 0x7f2   :  { %7496 = vmatmul.mubr.msk.bf16.vlgmr.msra.gmra.mxu1 %vm877_vm4, %v7811_v46  ;;  %v7778_v46 = vld [vmem:[%s9267_s3 + $0x6c] sm:$0xff]  }
 0x7f3   :  { %7520 = vmatpush3.bf16.msra.mxu1 %v7773_v49  ;;  %7523 = vmatprep.mubr.msk.bf16.mxu1 %vm567_vm2, %v9399_v4 }
 0x7f4   :  { %7490 = vmatmul.mubr.msk.bf16.vlgmr.msra.gmra.mxu0 %vm877_vm4, %v7812_v62  ;;  %7521 = vmatprep.subr.bf16.mxu1 %v7774_v58 }
 0x7f5   :  { %7500 = vmatpush3.bf16.msra.mxu0 %v7775_v45 }
 0x7f6   :  { %7501 = vmatprep.subr.bf16.mxu0 %v7776_v21 }
 0x7f7   :  { %7522 = vmatpush3.bf16.msra.mxu1 %v7774_v58 }
 0x7f8   :  { %7559 = vmatprep.subr.bf16.mxu1 %v9356_v26 }
 0x7f9   :  { %7502 = vmatpush3.bf16.msra.mxu0 %v7776_v21 }
 0x7fa   :  { %7524 = vmatmul.mubr.msk.bf16.vlgmr.msra.gmra.mxu1 %vm567_vm2, %v9400_v63  ;;  %7539 = vmatprep.subr.bf16.mxu0 %v7777_v59 }
 0x7fb   :  { %7527 = vmatprep.mubr.msk.bf16.mxu1 %vm567_vm2, %v9401_v25 }
 0x802   :  { %7528 = vmatmul.mubr.msk.bf16.gmra.mxu1 %vm567_vm2, %v9402_v14 }
 0x803   :  { %7531 = vmatprep.mubr.msk.bf16.mxu1 %vm567_vm2, %v9403_v3 }
 0x80a   :  { %7532 = vmatmul.mubr.msk.bf16.gmra.mxu1 %vm567_vm2, %v9404_v27 }
 0x80b   :  { %7535 = vmatprep.mubr.msk.bf16.mxu1 %vm567_vm2, %v9405_v22 }
 0x812   :  { %7536 = vmatmul.mubr.msk.bf16.gmra.mxu1 %vm567_vm2, %v9406_v56 }
 0x813   :  { %7561 = vmatprep.mubr.msk.bf16.mxu1 %vm7838_vm3, %v9356_v26 }
 0x872   :  { %v4229_v15 = vpop.f32.mrf.mxu1 }
 0x874   :  { %v4188_v48 = vpop.f32.mrf.mxu0  ;;  %v7413_v16 = vpop.f32.mrf.mxu1 }
 0x876   :  { %v7407_v0 = vpop.f32.mrf.mxu0  ;;  %v4232_v44 = vpop.f32.mrf.mxu1 }
 0x877   :  { %v4815_v49 = vpack.c.bf16 %v4232_v44, %v4229_v15 }
 0x878   :  { %v4191_v28 = vpop.f32.mrf.mxu0  ;;  %v7414_v43 = vpop.f32.mrf.mxu1 }
 0x879   :  { %v4814_v34 = vpack.c.bf16 %v4191_v28, %v4188_v48 }
 0x87a   :  { %v7408_v58 = vpop.f32.mrf.mxu0 }
 0x87b   :  { %7503 = vmatprep.mubr.msk.bf16.mxu0 %vm567_vm2, %v4814_v34 }
 0x87c   :  { %7504 = vmatmul.mubr.msk.bf16.vlgmr.msra.gmra.mxu0 %vm567_vm2, %v4815_v49 }
 0x87d   :  { %7540 = vmatpush3.bf16.msra.mxu0 %v7777_v59 }
 0x87e   :  { %7541 = vmatprep.subr.bf16.mxu0 %v7778_v46 }
 0x881   :  { %7542 = vmatpush3.bf16.msra.mxu0 %v7778_v46 }
 0x882   :  { %v4311_v4 = vpop.f32.mrf.mxu1  ;;  %7583 = vmatprep.subr.bf16.mxu0 %v9356_v26 }
 0x884   :  { %v4270_v45 = vpop.f32.mrf.mxu0  ;;  %v7425_v62 = vpop.f32.mrf.mxu1 }
 0x886   :  { %v7419_v21 = vpop.f32.mrf.mxu0  ;;  %v4314_v63 = vpop.f32.mrf.mxu1 }
 0x887   :  { %v4817_v27 = vpack.c.bf16 %v4314_v63, %v4311_v4 }
 0x888   :  { %v4273_v25 = vpop.f32.mrf.mxu0  ;;  %v7426_v14 = vpop.f32.mrf.mxu1 }
 0x889   :  { %v4816_v3 = vpack.c.bf16 %v4273_v25, %v4270_v45 }
 0x88a   :  { %v7420_v22 = vpop.f32.mrf.mxu0  ;;  %v4393_v56 = vpop.f32.mrf.mxu1 }
 0x88b   :  { %7507 = vmatprep.mubr.msk.bf16.mxu0 %vm567_vm2, %v4816_v3 }
 0x88c   :  { %v4352_v15 = vpop.f32.mrf.mxu0  ;;  %7508 = vmatmul.mubr.msk.bf16.gmra.mxu0 %vm567_vm2, %v4817_v27  ;;  %v7437_v59 = vpop.f32.mrf.mxu1 }
 0x88e   :  { %v7431_v48 = vpop.f32.mrf.mxu0  ;;  %v4396_v16 = vpop.f32.mrf.mxu1 }
 0x88f   :  { %v4819_v49 = vpack.c.bf16 %v4396_v16, %v4393_v56 }
 0x890   :  { %v4355_v0 = vpop.f32.mrf.mxu0  ;;  %v7438_v28 = vpop.f32.mrf.mxu1 }
 0x891   :  { %v4818_v44 = vpack.c.bf16 %v4355_v0, %v4352_v15 }
 0x892   :  { %v7432_v43 = vpop.f32.mrf.mxu0  ;;  %v4475_v34 = vpop.f32.mrf.mxu1 }
 0x893   :  { %7511 = vmatprep.mubr.msk.bf16.mxu0 %vm567_vm2, %v4818_v44 }
 0x894   :  { %7512 = vmatmul.mubr.msk.bf16.gmra.mxu0 %vm567_vm2, %v4819_v49  ;;  %v4434_v58 = vpop.f32.mrf.mxu0  ;;  %v7449_v46 = vpop.f32.mrf.mxu1 }
 0x896   :  { %v7443_v4 = vpop.f32.mrf.mxu0  ;;  %v4478_v45 = vpop.f32.mrf.mxu1 }
 0x897   :  { %v4821_v25 = vpack.c.bf16 %v4478_v45, %v4475_v34 }
 0x898   :  { %v4437_v62 = vpop.f32.mrf.mxu0  ;;  %v7450_v21 = vpop.f32.mrf.mxu1 }
 0x899   :  { %v4820_v63 = vpack.c.bf16 %v4437_v62, %v4434_v58 }
 0x89a   :  { %v7444_v14 = vpop.f32.mrf.mxu0  ;;  %v4557_v3 = vpop.f32.mrf.mxu1 }
 0x89b   :  { %7515 = vmatprep.mubr.msk.bf16.mxu0 %vm567_vm2, %v4820_v63 }
 0x89c   :  { %v4516_v27 = vpop.f32.mrf.mxu0  ;;  %v7461_v22 = vpop.f32.mrf.mxu1  ;;  %7516 = vmatmul.mubr.msk.bf16.gmra.mxu0 %vm567_vm2, %v4821_v25 }
 0x89e   :  { %v7455_v56 = vpop.f32.mrf.mxu0  ;;  %v4560_v15 = vpop.f32.mrf.mxu1 }
 0x89f   :  { %v5069_v0 = vpack.c.bf16 %v4560_v15, %v4557_v3 }
 0x8a0   :  { %v4519_v59 = vpop.f32.mrf.mxu0  ;;  %v7462_v48 = vpop.f32.mrf.mxu1 }
 0x8a1   :  { %v5068_v16 = vpack.c.bf16 %v4519_v59, %v4516_v27 }
 0x8a2   :  { %v7456_v44 = vpop.f32.mrf.mxu0  ;;  %v4639_v28 = vpop.f32.mrf.mxu1 }
 0x8a3   :  { %7543 = vmatprep.mubr.msk.bf16.mxu0 %vm567_vm2, %v5068_v16 }
 0x8a4   :  { %v4598_v49 = vpop.f32.mrf.mxu0  ;;  %v7473_v43 = vpop.f32.mrf.mxu1  ;;  %7544 = vmatmul.mubr.msk.bf16.vlgmr.msra.gmra.mxu0 %vm567_vm2, %v5069_v0 }
 0x8a6   :  { %v7467_v34 = vpop.f32.mrf.mxu0  ;;  %v4642_v58 = vpop.f32.mrf.mxu1 }
 0x8a7   :  { %v5071_v46 = vpack.c.bf16 %v4642_v58, %v4639_v28 }
 0x8a8   :  { %v4601_v4 = vpop.f32.mrf.mxu0  ;;  %v7474_v45 = vpop.f32.mrf.mxu1 }
 0x8a9   :  { %v5070_v62 = vpack.c.bf16 %v4601_v4, %v4598_v49 }
 0x8aa   :  { %v7468_v21 = vpop.f32.mrf.mxu0  ;;  %v4721_v63 = vpop.f32.mrf.mxu1 }
 0x8ab   :  { %7547 = vmatprep.mubr.msk.bf16.mxu0 %vm567_vm2, %v5070_v62 }
 0x8ac   :  { %v4680_v25 = vpop.f32.mrf.mxu0  ;;  %v7485_v14 = vpop.f32.mrf.mxu1  ;;  %7548 = vmatmul.mubr.msk.bf16.gmra.mxu0 %vm567_vm2, %v5071_v46 }
 0x8ae   :  { %v7479_v3 = vpop.f32.mrf.mxu0  ;;  %v4724_v27 = vpop.f32.mrf.mxu1 }
 0x8af   :  { %v5073_v22 = vpack.c.bf16 %v4724_v27, %v4721_v63 }
 0x8b0   :  { %v4683_v56 = vpop.f32.mrf.mxu0  ;;  %v7486_v15 = vpop.f32.mrf.mxu1 }
 0x8b1   :  { %v5072_v59 = vpack.c.bf16 %v4683_v56, %v4680_v25 }
 0x8b2   :  { %v7480_v48 = vpop.f32.mrf.mxu0  ;;  %v4803_v16 = vpop.f32.mrf.mxu1 }
 0x8b3   :  { %7551 = vmatprep.mubr.msk.bf16.mxu0 %vm567_vm2, %v5072_v59 }
 0x8b4   :  { %v4762_v0 = vpop.f32.mrf.mxu0  ;;  %v7497_v44 = vpop.f32.mrf.mxu1  ;;  %7552 = vmatmul.mubr.msk.bf16.gmra.mxu0 %vm567_vm2, %v5073_v22 }
 0x8b6   :  { %v7491_v28 = vpop.f32.mrf.mxu0  ;;  %v4806_v49 = vpop.f32.mrf.mxu1 }
 0x8b7   :  { %v5075_v43 = vpack.c.bf16 %v4806_v49, %v4803_v16 }
 0x8b8   :  { %v4765_v34 = vpop.f32.mrf.mxu0  ;;  %v7498_v58 = vpop.f32.mrf.mxu1 }
 0x8b9   :  { %v5074_v46 = vpack.c.bf16 %v4765_v34, %v4762_v0 }
 0x8ba   :  { %v7492_v4 = vpop.f32.mrf.mxu0  ;;  %v7525_v21 = vpop.f32.mrf.mxu1 }
 0x8bb   :  { %7555 = vmatprep.mubr.msk.bf16.mxu0 %vm567_vm2, %v5074_v46 }
 0x8bc   :  { %7556 = vmatmul.mubr.msk.bf16.gmra.mxu0 %vm567_vm2, %v5075_v43  ;;  %v5005_v25 = vpop.f32.mrf.mxu1 }
 0x8bd   :  { %7585 = vmatprep.mubr.msk.bf16.mxu0 %vm7838_vm3, %v9356_v26 }
 0x8be   :  { %v7526_v27 = vpop.f32.mrf.mxu1 }
 0x8c0   :  { %v5008_v15 = vpop.f32.mrf.mxu1 }
 0x8c2   :  { %v7529_v16 = vpop.f32.mrf.mxu1 }
 0x8c4   :  { %v5021_v28 = vpop.f32.mrf.mxu1 }
 0x8c6   :  { %v7530_v43 = vpop.f32.mrf.mxu1 }
 0x8c8   :  { %v5024_v46 = vpop.f32.mrf.mxu1 }
 0x8ca   :  { %v9073_v50 = vpop.f32.mrf.mxu1 }
 0x8cc   :  { %v5037_v1 = vpop.f32.mrf.mxu1 }
 0x8ce   :  { %v7534_v24 = vpop.f32.mrf.mxu1 }
 0x93c   :  { %v7505_v45 = vpop.f32.mrf.mxu0 }
 0x93d   :  { %v5014_v38 = vadd.f32 %v7525_v21, %v7505_v45 }
 0x93e   :  { %v4896_v62 = vpop.f32.mrf.mxu0 }
 0x93f   :  { %v5006_v20 = vadd.f32 %v5005_v25, %v4896_v62 }
 0x940   :  { %v7506_v63 = vpop.f32.mrf.mxu0 }
 0x941   :  { %v5017_v7 = vadd.f32 %v7526_v27, %v7506_v63 }
 0x942   :  { %v4899_v14 = vpop.f32.mrf.mxu0 }
 0x943   :  { %v5009_v29 = vadd.f32 %v5008_v15, %v4899_v14 }
 0x94c   :  { %v9059_v3 = vpop.f32.mrf.mxu0 }
 0x94e   :  { %v4912_v22 = vpop.f32.mrf.mxu0 }
 0x94f   :  { %v5022_v21 = vadd.f32 %v5021_v28, %v4912_v22 }
 0x950   :  { %v7510_v56 = vpop.f32.mrf.mxu0 }
 0x951   :  { %v5033_v22 = vadd.f32 %v7530_v43, %v7510_v56 }
 0x952   :  { %v4915_v59 = vpop.f32.mrf.mxu0 }
 0x953   :  { %v5025_v25 = vadd.f32 %v5024_v46, %v4915_v59 }
 0x954   :  { %v9061_v48 = vpop.f32.mrf.mxu0 }
 0x956   :  { %v4928_v0 = vpop.f32.mrf.mxu0 }
 0x958   :  { %v9063_v44 = vpop.f32.mrf.mxu0 }
 0x95a   :  { %v4931_v49 = vpop.f32.mrf.mxu0 }
 0x95c   :  { %v9065_v34 = vpop.f32.mrf.mxu0 }
 0x95e   :  { %v9067_v58 = vpop.f32.mrf.mxu0 }
 0x960   :  { %v9069_v4 = vpop.f32.mrf.mxu0 }
 0x962   :  { %v9071_v61 = vpop.f32.mrf.mxu0 }
 0x964   :  { %v7545_v6 = vpop.f32.mrf.mxu0 }
 0x965   :  { %v5215_v39 = vadd.f32 %v7545_v6, %v5014_v38  ;;  %v5040_v6 = vpop.f32.mrf.mxu1 }
 0x966   :  { %v5150_v31 = vpop.f32.mrf.mxu0 }
 0x967   :  { %v5213_v18 = vadd.f32 %v5150_v31, %v5006_v20  ;;  %v5231_v45 = vadd.f32 %v9078_v53, %v5215_v39  ;;  %v9084_v9 = vpop.f32.mrf.mxu1 }
 0x968   :  { %v7546_v47 = vpop.f32.mrf.mxu0 }
 0x969   :  { %v5216_v51 = vadd.f32 %v7546_v47, %v5017_v7  ;;  %v5229_v11 = vadd.f32 %v9078_v53, %v5213_v18  ;;  %v5247_v18 = vmax.f32 %v5231_v45, 0.0  ;;  %v5053_v46 = vpop.f32.mrf.mxu1 }
 0x96a   :  { %v5153_v2 = vpop.f32.mrf.mxu0 }
 0x96b   :  { %v5214_v5 = vadd.f32 %v5153_v2, %v5009_v29  ;;  %v5232_v63 = vadd.f32 %v9078_v53, %v5216_v51  ;;  %v5245_v7 = vmax.f32 %v5229_v11, 0.0 }
 0x96c   :  { %v7549_v62 = vpop.f32.mrf.mxu0 }
 0x96d   :  { %v5230_v31 = vadd.f32 %v9078_v53, %v5214_v5  ;;  %v5248_v14 = vmax.f32 %v5232_v63, 0.0  ;;  %v5038_v5 = vadd.f32 %v5037_v1, %v4928_v0  ;;  %v5030_v1 = vadd.f32 %v7529_v16, %v9059_v3 }
 0x96e   :  { %v5166_v20 = vpop.f32.mrf.mxu0  ;;  %v5041_v0 = vadd.f32 %v5040_v6, %v4931_v49  ;;  %v5049_v3 = vadd.f32 %v7534_v24, %v9063_v44 }
 0x96f   :  { %v5246_v47 = vmax.f32 %v5230_v31, 0.0  ;;  %v5217_v2 = vadd.f32 %v5166_v20, %v5022_v21  ;;  %v5262_v39 = vpack.c.bf16 %v5248_v14, %v5247_v18  ;;  %v7538_v21 = vpop.f32.mrf.mxu1  ;;  %v5054_v14 = vadd.f32 %v5053_v46, %v9067_v58 }
 0x970   :  { %v7550_v38 = vpop.f32.mrf.mxu0 }
 0x971   :  { %v5261_v27 = vpack.c.bf16 %v5246_v47, %v5245_v7  ;;  %v5233_v59 = vadd.f32 %v9078_v53, %v5217_v2  ;;  %v5220_v20 = vadd.f32 %v7550_v38, %v5033_v22  ;;  %v5219_v47 = vadd.f32 %v7549_v62, %v5030_v1  ;;  %v5056_v58 = vpop.f32.mrf.mxu1 }
 0x972   :  { %v5169_v15 = vpop.f32.mrf.mxu0  ;;  %v5046_v2 = vadd.f32 %v9073_v50, %v9061_v48  ;;  %v5057_v24 = vadd.f32 %v5056_v58, %v9071_v61  ;;  %v5065_v61 = vadd.f32 %v7538_v21, %v9069_v4 }
 0x973   :  { %v5218_v29 = vadd.f32 %v5169_v15, %v5025_v25  ;;  %7560 = vmatpush3.bf16.msra.mxu1 %v5261_v27  ;;  %v5236_v27 = vadd.f32 %v9078_v53, %v5220_v20  ;;  %v5235_v49 = vadd.f32 %v9078_v53, %v5219_v47 }
 0x974   :  { %v7553_v51 = vpop.f32.mrf.mxu0  ;;  %7565 = vmatprep.subr.bf16.mxu1 %v9356_v26 }
 0x975   :  { %v5234_v11 = vadd.f32 %v9078_v53, %v5218_v29  ;;  %v5252_v44 = vmax.f32 %v5236_v27, 0.0 }
 0x976   :  { %v5182_v31 = vpop.f32.mrf.mxu0  ;;  %7562 = vmatmul.mubr.msk.bf16.vlgmr.msra.gmra.mxu1 %vm877_vm4, %v8669_v52  ;;  %v5249_v52 = vmax.f32 %v5233_v59, 0.0 }
 0x977   :  { %v5221_v28 = vadd.f32 %v5182_v31, %v5038_v5  ;;  %7566 = vmatpush3.bf16.msra.mxu1 %v5262_v39  ;;  %7567 = vmatprep.mubr.msk.bf16.mxu1 %vm7838_vm3, %v9356_v26  ;;  %v5250_v45 = vmax.f32 %v5234_v11, 0.0  ;;  %v5251_v11 = vmax.f32 %v5235_v49, 0.0  ;;  %v5223_v31 = vadd.f32 %v7553_v51, %v5046_v2 }
 0x978   :  { %v7554_v63 = vpop.f32.mrf.mxu0  ;;  %7571 = vmatprep.subr.bf16.mxu1 %v9356_v26 }
 0x979   :  { %v5237_v56 = vadd.f32 %v9078_v53, %v5221_v28  ;;  %v5263_v15 = vpack.c.bf16 %v5250_v45, %v5249_v52  ;;  %v5264_v28 = vpack.c.bf16 %v5252_v44, %v5251_v11  ;;  %v5239_v51 = vadd.f32 %v9078_v53, %v5223_v31  ;;  %v7779_v52 = vld [vmem:[%s9267_s3 + $0x84] sm:$0xff]  }
 0x97a   :  { %v5185_v7 = vpop.f32.mrf.mxu0 }
 0x97b   :  { %v5222_v43 = vadd.f32 %v5185_v7, %v5041_v0  ;;  %v5253_v62 = vmax.f32 %v5237_v56, 0.0  ;;  %v5255_v4 = vmax.f32 %v5239_v51, 0.0 }
 0x97c   :  { %v7557_v25 = vpop.f32.mrf.mxu0 }
 0x97d   :  { %v5238_v18 = vadd.f32 %v9078_v53, %v5222_v43 }
 0x97e   :  { %v5198_v16 = vpop.f32.mrf.mxu0  ;;  %7568 = vmatmul.mubr.msk.bf16.vlgmr.msra.gmra.mxu1 %vm877_vm4, %v8671_v30  ;;  %v5224_v30 = vadd.f32 %v7554_v63, %v5049_v3 }
 0x97f   :  { %v5254_v6 = vmax.f32 %v5238_v18, 0.0  ;;  %v5225_v38 = vadd.f32 %v5198_v16, %v5054_v14  ;;  %7572 = vmatpush3.bf16.msra.mxu1 %v5263_v15  ;;  %7573 = vmatprep.mubr.msk.bf16.mxu1 %vm7838_vm3, %v9356_v26 }
 0x980   :  { %v7558_v29 = vpop.f32.mrf.mxu0  ;;  %7577 = vmatprep.subr.bf16.mxu1 %v9356_v26  ;;  %v5240_v50 = vadd.f32 %v9078_v53, %v5224_v30 }
 0x981   :  { %v5265_v5 = vpack.c.bf16 %v5254_v6, %v5253_v62  ;;  %v5241_v22 = vadd.f32 %v9078_v53, %v5225_v38 }
 0x982   :  { %v5201_v39 = vpop.f32.mrf.mxu0  ;;  %v5256_v1 = vmax.f32 %v5240_v50, 0.0 }
 0x983   :  { %v5226_v59 = vadd.f32 %v5201_v39, %v5057_v24  ;;  %7584 = vmatpush3.bf16.msra.mxu0 %v5265_v5  ;;  %v5257_v46 = vmax.f32 %v5241_v22, 0.0 }
 0x984   :  { %7595 = vmatprep.subr.bf16.mxu0 %v9356_v26  ;;  %v5266_v45 = vpack.c.bf16 %v5256_v1, %v5255_v4 }
 0x985   :  { %v5242_v48 = vadd.f32 %v9078_v53, %v5226_v59 }
 0x986   :  { %7574 = vmatmul.mubr.msk.bf16.vlgmr.msra.gmra.mxu1 %vm877_vm4, %v8673_v41  ;;  %7586 = vmatmul.mubr.msk.bf16.vlgmr.msra.gmra.mxu0 %vm877_vm4, %v8677_v12  ;;  %v5062_v41 = vadd.f32 %v9084_v9, %v9065_v34  ;;  %v5228_v12 = vadd.f32 %v7558_v29, %v5065_v61 }
 0x987   :  { %v5258_v63 = vmax.f32 %v5242_v48, 0.0  ;;  %7578 = vmatpush3.bf16.msra.mxu1 %v5264_v28  ;;  %7579 = vmatprep.mubr.msk.bf16.mxu1 %vm7838_vm3, %v9356_v26 }
 0x988   :  { %7589 = vmatprep.subr.bf16.mxu1 %v9356_v26  ;;  %7597 = vmatprep.mubr.msk.bf16.mxu0 %vm7838_vm3, %v9356_v26  ;;  %v5227_v20 = vadd.f32 %v7557_v25, %v5062_v41  ;;  %v5244_v7 = vadd.f32 %v9078_v53, %v5228_v12 }
 0x989   :  { %v5267_v0 = vpack.c.bf16 %v5258_v63, %v5257_v46 }
 0x98a   :  { %v5243_v47 = vadd.f32 %v9078_v53, %v5227_v20  ;;  %v5260_v9 = vmax.f32 %v5244_v7, 0.0 }
 0x98b   :  { %7596 = vmatpush3.bf16.msra.mxu0 %v5267_v0 }
 0x98c   :  { %v5259_v34 = vmax.f32 %v5243_v47, 0.0 }
 0x98e   :  { %7580 = vmatmul.mubr.msk.bf16.vlgmr.msra.gmra.mxu1 %vm877_vm4, %v8675_v55  ;;  %7598 = vmatmul.mubr.msk.bf16.vlgmr.msra.gmra.mxu0 %vm877_vm4, %v8681_v35  ;;  %v5268_v56 = vpack.c.bf16 %v5260_v9, %v5259_v34  ;;  %v7780_v55 = vld [vmem:[%s9267_s3 + $0x7c] sm:$0xff]  }
 0x98f   :  { %7590 = vmatpush3.bf16.msra.mxu1 %v5266_v45  ;;  %7591 = vmatprep.mubr.msk.bf16.mxu1 %vm7838_vm3, %v9356_v26 }
 0x990   :  { %7601 = vmatprep.subr.bf16.mxu1 %v9356_v26 }
 0x996   :  { %7592 = vmatmul.mubr.msk.bf16.vlgmr.msra.gmra.mxu1 %vm877_vm4, %v8679_v54  ;;  %v7781_v54 = vld [vmem:[%s9267_s3 + $0xa4] sm:$0xff]  }
 0x997   :  { %7602 = vmatpush3.bf16.msra.mxu1 %v5268_v56  ;;  %7603 = vmatprep.mubr.msk.bf16.mxu1 %vm7838_vm3, %v9356_v26  ;;  %v7782_v26 = vld [vmem:[%s9267_s3 + $0x9c] sm:$0xff]  }
 0x998   :  { %7627 = vmatprep.subr.bf16.mxu1 %v7779_v52 }
 0x99e   :  { %7604 = vmatmul.mubr.msk.bf16.vlgmr.msra.gmra.mxu1 %vm877_vm4, %v8683_v13 }
 0x99f   :  { %7628 = vmatpush3.bf16.msra.mxu1 %v7779_v52  ;;  %7631 = vmatprep.mubr.msk.bf16.mxu1 %vm567_vm2, %v8293_v36  ;;  %v7783_v36 = vld [vmem:[%s9267_s3 + $0x94] sm:$0xff]  }
 0x9a0   :  { %7629 = vmatprep.subr.bf16.mxu1 %v7780_v55  ;;  %7607 = vmatprep.subr.bf16.mxu0 %v7783_v36 }
 0x9a1   :  { %7608 = vmatpush3.bf16.msra.mxu0 %v7783_v36 }
 0x9a3   :  { %7630 = vmatpush3.bf16.msra.mxu1 %v7780_v55 }
 0x9a4   :  { %7659 = vmatprep.subr.bf16.mxu1 %v7781_v54 }
 0x9a6   :  { %7632 = vmatmul.mubr.msk.bf16.vlgmr.msra.gmra.mxu1 %vm567_vm2, %v8421_v8  ;;  %v9407_v8 = vld [vmem:[#allocation22_spill] sm:$0xff] }
 0x9a7   :  { %7635 = vmatprep.mubr.msk.bf16.mxu1 %vm567_vm2, %v8331_v37  ;;  %7660 = vmatpush3.bf16.msra.mxu1 %v7781_v54  ;;  %v5863_v37 = vpack.c.bf16 %v8416_v40, %v8288_v33  ;;  %v9408_v33 = vld [vmem:[#allocation20_spill] sm:$0xff]  ;;  %v9409_v40 = vld [vmem:[#allocation23_spill] sm:$0xff] }
 0x9a8   :  { %7661 = vmatprep.subr.bf16.mxu1 %v7782_v26 }
 0x9ab   :  { %7662 = vmatpush3.bf16.msra.mxu1 %v7782_v26 }
 0x9ae   :  { %7636 = vmatmul.mubr.msk.bf16.gmra.mxu1 %vm567_vm2, %v8442_v10  ;;  %v5865_v10 = vpack.c.bf16 %v9407_v8, %v9379_v17 }
 0x9af   :  { %7639 = vmatprep.mubr.msk.bf16.mxu1 %vm567_vm2, %v8351_v57  ;;  %v7784_v57 = vld [vmem:[%s9267_s3 + $0x8c] sm:$0xff]  }
 0x9b0   :  { %7609 = vmatprep.subr.bf16.mxu0 %v7784_v57 }
 0x9b1   :  { %7610 = vmatpush3.bf16.msra.mxu0 %v7784_v57  ;;  %v7786_v57 = vld [vmem:[%s9267_s3 + $0xac] sm:$0xff]  }
 0x9b6   :  { %7640 = vmatmul.mubr.msk.bf16.gmra.mxu1 %vm567_vm2, %v8457_v60  ;;  %v5866_v60 = vpack.c.bf16 %v9409_v40, %v9408_v33  ;;  %v7814_v33 = vld [vmem:[%s9268_s4 + $0x7] ss:$0 sm:$0xff] }
 0x9b7   :  { %7643 = vmatprep.mubr.msk.bf16.mxu1 %vm567_vm2, %v8371_v23  ;;  %v5864_v23 = vpack.c.bf16 %v9369_v19, %v9371_v32 }
 0x9be   :  { %7644 = vmatmul.mubr.msk.bf16.gmra.mxu1 %vm567_vm2, %v8472_v42 }
 0x9bf   :  { %7663 = vmatprep.mubr.msk.bf16.mxu1 %vm567_vm2, %v5863_v37  ;;  %v7785_v37 = vld [vmem:[%s9267_s3 + $0xb4] sm:$0xff]  }
 0x9c0   :  { %7647 = vmatprep.subr.bf16.mxu0 %v7785_v37 }
 0x9c6   :  { %7664 = vmatmul.mubr.msk.bf16.vlgmr.msra.gmra.mxu1 %vm567_vm2, %v5864_v23 }
 0x9c7   :  { %7667 = vmatprep.mubr.msk.bf16.mxu1 %vm567_vm2, %v5865_v10 }
 0x9ce   :  { %7668 = vmatmul.mubr.msk.bf16.gmra.mxu1 %vm567_vm2, %v5866_v60 }
 0xa36   :  { %v5303_v42 = vpop.f32.mrf.mxu1 }
 0xa38   :  { %v7563_v35 = vpop.f32.mrf.mxu1 }
 0xa39   :  { %v9410_v35 = vld [vmem:[#allocation32_spill] sm:$0xff] }
 0xa3a   :  { %v5306_v13 = vpop.f32.mrf.mxu1 }
 0xa3b   :  { %v5601_v53 = vpack.c.bf16 %v5306_v13, %v5303_v42  ;;  %v9411_v13 = vmax.f32 %v9410_v35, 0.0 }
 0xa3c   :  { %v7564_v43 = vpop.f32.mrf.mxu1 }
 0xa3d   :  { %7611 = vmatprep.mubr.msk.bf16.mxu0 %vm567_vm2, %v5601_v53 }
 0xa3e   :  { %v5344_v19 = vpop.f32.mrf.mxu1 }
 0xa40   :  { %v7569_v32 = vpop.f32.mrf.mxu1 }
 0xa41   :  { %v9412_v32 = vld [vmem:[#allocation33_spill] sm:$0xff] }
 0xa42   :  { %v5347_v21 = vpop.f32.mrf.mxu1 }
 0xa43   :  { %v5602_v17 = vpack.c.bf16 %v5347_v21, %v5344_v19  ;;  %v9413_v21 = vmax.f32 %v9412_v32, 0.0 }
 0xa44   :  { %v7570_v25 = vpop.f32.mrf.mxu1 }
 0xa45   :  { %7612 = vmatmul.mubr.msk.bf16.vlgmr.msra.gmra.mxu0 %vm567_vm2, %v5602_v17 }
 0xa46   :  { %v5385_v14 = vpop.f32.mrf.mxu1  ;;  %v5467_v27 = vpop.f32.mrf.mxu0  ;;  %7648 = vmatpush3.bf16.msra.mxu0 %v7785_v37 }
 0xa47   :  { %7649 = vmatprep.subr.bf16.mxu0 %v7786_v57 }
 0xa48   :  { %v7575_v15 = vpop.f32.mrf.mxu1  ;;  %v7587_v18 = vpop.f32.mrf.mxu0 }
 0xa4a   :  { %v5388_v3 = vpop.f32.mrf.mxu1  ;;  %v5470_v16 = vpop.f32.mrf.mxu0  ;;  %7650 = vmatpush3.bf16.msra.mxu0 %v7786_v57 }
 0xa4b   :  { %v5603_v49 = vpack.c.bf16 %v5388_v3, %v5385_v14  ;;  %v5605_v5 = vpack.c.bf16 %v5470_v16, %v5467_v27 }
 0xa4c   :  { %v7576_v62 = vpop.f32.mrf.mxu1  ;;  %v7588_v6 = vpop.f32.mrf.mxu0 }
 0xa4d   :  { %7615 = vmatprep.mubr.msk.bf16.mxu0 %vm567_vm2, %v5603_v49  ;;  %v9414_v6 = vld [vmem:[#allocation5_spill] sm:$0xff] }
 0xa4e   :  { %v5426_v38 = vpop.f32.mrf.mxu1  ;;  %v5549_v58 = vpop.f32.mrf.mxu0 }
 0xa50   :  { %v7581_v2 = vpop.f32.mrf.mxu1  ;;  %v7599_v29 = vpop.f32.mrf.mxu0 }
 0xa52   :  { %v5429_v24 = vpop.f32.mrf.mxu1  ;;  %v5552_v44 = vpop.f32.mrf.mxu0 }
 0xa53   :  { %v5604_v30 = vpack.c.bf16 %v5429_v24, %v5426_v38  ;;  %v5607_v50 = vpack.c.bf16 %v5552_v44, %v5549_v58  ;;  %v9415_v38 = vmax.f32 %v9414_v6, 0.0  ;;  %v9416_v24 = vld [vmem:[#allocation21_spill] sm:$0xff] }
 0xa54   :  { %v7582_v39 = vpop.f32.mrf.mxu1  ;;  %v7600_v11 = vpop.f32.mrf.mxu0  ;;  %v9417_v44 = vmax.f32 %v9416_v24, 0.0 }
 0xa55   :  { %7616 = vmatmul.mubr.msk.bf16.gmra.mxu0 %vm567_vm2, %v5604_v30 }
 0xa56   :  { %v5508_v31 = vpop.f32.mrf.mxu1  ;;  %7619 = vmatprep.mubr.msk.bf16.mxu0 %vm567_vm2, %v5605_v5 }
 0xa58   :  { %v7593_v22 = vpop.f32.mrf.mxu1 }
 0xa5a   :  { %v5511_v59 = vpop.f32.mrf.mxu1 }
 0xa5b   :  { %v5606_v28 = vpack.c.bf16 %v5511_v59, %v5508_v31 }
 0xa5c   :  { %v7594_v48 = vpop.f32.mrf.mxu1 }
 0xa5d   :  { %7620 = vmatmul.mubr.msk.bf16.gmra.mxu0 %vm567_vm2, %v5606_v28 }
 0xa5e   :  { %v5590_v61 = vpop.f32.mrf.mxu1  ;;  %7623 = vmatprep.mubr.msk.bf16.mxu0 %vm567_vm2, %v5607_v50 }
 0xa60   :  { %v7605_v51 = vpop.f32.mrf.mxu1 }
 0xa62   :  { %v5593_v46 = vpop.f32.mrf.mxu1 }
 0xa63   :  { %v5608_v63 = vpack.c.bf16 %v5593_v46, %v5590_v61  ;;  %v9418_v61 = vld [vmem:[#allocation16_spill] sm:$0xff] }
 0xa64   :  { %v7606_v41 = vpop.f32.mrf.mxu1  ;;  %v9419_v51 = vmax.f32 %v9418_v61, 0.0 }
 0xa65   :  { %7624 = vmatmul.mubr.msk.bf16.gmra.mxu0 %vm567_vm2, %v5608_v63 }
 0xa66   :  { %v7633_v1 = vpop.f32.mrf.mxu1 }
 0xa68   :  { %v5784_v12 = vpop.f32.mrf.mxu1 }
 0xa6a   :  { %v7634_v0 = vpop.f32.mrf.mxu1 }
 0xa6c   :  { %v5787_v4 = vpop.f32.mrf.mxu1 }
 0xa6e   :  { %v7637_v20 = vpop.f32.mrf.mxu1 }
 0xa70   :  { %v5798_v45 = vpop.f32.mrf.mxu1 }
 0xa72   :  { %v7638_v7 = vpop.f32.mrf.mxu1 }
 0xa74   :  { %v5801_v47 = vpop.f32.mrf.mxu1 }
 0xa76   :  { %v7641_v9 = vpop.f32.mrf.mxu1 }
 0xa78   :  { %v5812_v34 = vpop.f32.mrf.mxu1 }
 0xa7a   :  { %v7642_v52 = vpop.f32.mrf.mxu1 }
 0xa7c   :  { %v5815_v56 = vpop.f32.mrf.mxu1 }
 0xa7e   :  { %v7645_v55 = vpop.f32.mrf.mxu1 }
 0xa80   :  { %v5826_v54 = vpop.f32.mrf.mxu1 }
 0xa82   :  { %v7646_v26 = vpop.f32.mrf.mxu1 }
 0xa83   :  { %v9422_v26 = vld [vmem:[#allocation15_spill] sm:$0xff] }
 0xa84   :  { %v5829_v36 = vpop.f32.mrf.mxu1 }
 0xa85   :  { %v9423_v36 = vmax.f32 %v9422_v26, 0.0 }
 0xb05   :  { %v7613_v23 = vpop.f32.mrf.mxu0 }
 0xb06   :  { %v5792_v8 = vadd.f32 %v7633_v1, %v7613_v23  ;;  %v9420_v1 = vld [vmem:[#allocation12_spill] sm:$0xff] }
 0xb07   :  { %v5683_v10 = vpop.f32.mrf.mxu0 }
 0xb08   :  { %v5840_v40 = vadd.f32 %v7814_v33, %v5792_v8  ;;  %v5785_v60 = vadd.f32 %v5784_v12, %v5683_v10  ;;  %v9421_v12 = vmax.f32 %v9420_v1, 0.0  ;;  %v9424_v8 = vld [vmem:[#allocation18_spill] sm:$0xff] }
 0xb09   :  { %v7614_v42 = vpop.f32.mrf.mxu0  ;;  %v9425_v10 = vmax.f32 %v9424_v8, 0.0 }
 0xb0a   :  { %v5848_v53 = vadd.f32 %v5840_v40, %v9411_v13  ;;  %v5839_v43 = vadd.f32 %v7814_v33, %v5785_v60 }
 0xb0b   :  { %v5686_v19 = vpop.f32.mrf.mxu0 }
 0xb0c   :  { %v5847_v17 = vadd.f32 %v5839_v43, %v9413_v21  ;;  %v5856_v25 = vmax.f32 %v5848_v53, 0.0 }
 0xb0e   :  { %v5855_v14 = vmax.f32 %v5847_v17, 0.0 }
 0xb10   :  { %v5871_v27 = vpack.c.bf16 %v5856_v25, %v5855_v14  ;;  %v6595_v25 = vld [vmem:[%s9268_s4 + $0x8] ss:$0 sm:$0xff] }
 0xb12   :  { %7651 = vmatprep.mubr.msk.bf16.mxu0 %vm567_vm2, %v5871_v27 }
 0xb15   :  { %v7617_v15 = vpop.f32.mrf.mxu0 }
 0xb16   :  { %v5806_v18 = vadd.f32 %v7637_v20, %v7617_v15 }
 0xb17   :  { %v5697_v3 = vpop.f32.mrf.mxu0 }
 0xb18   :  { %v5842_v16 = vadd.f32 %v7814_v33, %v5806_v18  ;;  %v5799_v49 = vadd.f32 %v5798_v45, %v5697_v3 }
 0xb19   :  { %v7618_v62 = vpop.f32.mrf.mxu0 }
 0xb1a   :  { %v5850_v58 = vadd.f32 %v5842_v16, %v9415_v38  ;;  %v5841_v2 = vadd.f32 %v7814_v33, %v5799_v49 }
 0xb1b   :  { %v5700_v29 = vpop.f32.mrf.mxu0 }
 0xb1c   :  { %v5849_v30 = vadd.f32 %v5841_v2, %v9417_v44  ;;  %v5858_v39 = vmax.f32 %v5850_v58, 0.0 }
 0xb1d   :  { %v7621_v5 = vpop.f32.mrf.mxu0 }
 0xb1e   :  { %v5857_v11 = vmax.f32 %v5849_v30, 0.0  ;;  %v5820_v31 = vadd.f32 %v7641_v9, %v7621_v5 }
 0xb1f   :  { %v5711_v22 = vpop.f32.mrf.mxu0 }
 0xb20   :  { %v5872_v59 = vpack.c.bf16 %v5858_v39, %v5857_v11  ;;  %v5844_v28 = vadd.f32 %v7814_v33, %v5820_v31  ;;  %v5813_v50 = vadd.f32 %v5812_v34, %v5711_v22 }
 0xb21   :  { %v7622_v48 = vpop.f32.mrf.mxu0 }
 0xb22   :  { %v5852_v46 = vadd.f32 %v5844_v28, %v9419_v51  ;;  %v5843_v63 = vadd.f32 %v7814_v33, %v5813_v50  ;;  %7652 = vmatmul.mubr.msk.bf16.vlgmr.msra.gmra.mxu0 %vm567_vm2, %v5872_v59 }
 0xb23   :  { %v5714_v41 = vpop.f32.mrf.mxu0 }
 0xb24   :  { %v5851_v0 = vadd.f32 %v5843_v63, %v9421_v12  ;;  %v5860_v20 = vmax.f32 %v5852_v46, 0.0 }
 0xb25   :  { %v7625_v4 = vpop.f32.mrf.mxu0 }
 0xb26   :  { %v5859_v45 = vmax.f32 %v5851_v0, 0.0  ;;  %v5834_v7 = vadd.f32 %v7645_v55, %v7625_v4  ;;  %v7787_v55 = vld [vmem:[%s9267_s3 + $0xc4] sm:$0xff]  }
 0xb27   :  { %v5725_v47 = vpop.f32.mrf.mxu0  ;;  %7671 = vmatprep.subr.bf16.mxu0 %v7787_v55 }
 0xb28   :  { %v5873_v9 = vpack.c.bf16 %v5860_v20, %v5859_v45  ;;  %v5846_v52 = vadd.f32 %v7814_v33, %v5834_v7  ;;  %v5827_v56 = vadd.f32 %v5826_v54, %v5725_v47  ;;  %7672 = vmatpush3.bf16.msra.mxu0 %v7787_v55  ;;  %v7788_v54 = vld [vmem:[%s9267_s3 + $0xbc] sm:$0xff]   ;;  %v7789_v7 = vld [vmem:[%s9267_s3 + $0xd4] sm:$0xff]   ;;  %v7790_v47 = vld [vmem:[%s9267_s3 + $0xcc] sm:$0xff]  }
 0xb29   :  { %v7626_v34 = vpop.f32.mrf.mxu0  ;;  %7673 = vmatprep.subr.bf16.mxu0 %v7788_v54  ;;  %7683 = vmatprep.subr.bf16.mxu1 %v7789_v7 }
 0xb2a   :  { %v5854_v37 = vadd.f32 %v5846_v52, %v9423_v36  ;;  %v5845_v57 = vadd.f32 %v7814_v33, %v5827_v56  ;;  %7655 = vmatprep.mubr.msk.bf16.mxu0 %vm567_vm2, %v5873_v9  ;;  %v7665_v33 = vpop.f32.mrf.mxu1  ;;  %7684 = vmatpush3.bf16.msra.mxu1 %v7789_v7  ;;  %v6596_v56 = vld [vmem:[%s9268_s4 + $0x9] ss:$0 sm:$0xff] }
 0xb2b   :  { %v5728_v23 = vpop.f32.mrf.mxu0  ;;  %7685 = vmatprep.subr.bf16.mxu1 %v7790_v47 }
 0xb2c   :  { %v5853_v40 = vadd.f32 %v5845_v57, %v9425_v10  ;;  %v5862_v60 = vmax.f32 %v5854_v37, 0.0  ;;  %7674 = vmatpush3.bf16.msra.mxu0 %v7788_v54  ;;  %v6026_v13 = vpop.f32.mrf.mxu1 }
 0xb2e   :  { %v5861_v42 = vmax.f32 %v5853_v40, 0.0  ;;  %v7666_v43 = vpop.f32.mrf.mxu1  ;;  %7686 = vmatpush3.bf16.msra.mxu1 %v7790_v47 }
 0xb30   :  { %v5874_v35 = vpack.c.bf16 %v5862_v60, %v5861_v42  ;;  %v6029_v27 = vpop.f32.mrf.mxu1 }
 0xb32   :  { %7656 = vmatmul.mubr.msk.bf16.gmra.mxu0 %vm567_vm2, %v5874_v35  ;;  %v7669_v6 = vpop.f32.mrf.mxu1 }
 0xb34   :  { %v6042_v44 = vpop.f32.mrf.mxu1 }
 0xb36   :  { %v7670_v39 = vpop.f32.mrf.mxu1 }
 0xb38   :  { %v6045_v50 = vpop.f32.mrf.mxu1 }
 0xbe2   :  { %v7653_v53 = vpop.f32.mrf.mxu0 }
 0xbe3   :  { %v6035_v21 = vadd.f32 %v7665_v33, %v7653_v53 }
 0xbe4   :  { %v5937_v19 = vpop.f32.mrf.mxu0 }
 0xbe5   :  { %v6027_v32 = vadd.f32 %v6026_v13, %v5937_v19  ;;  %v6064_v49 = vadd.f32 %v6595_v25, %v6035_v21 }
 0xbe6   :  { %v7654_v17 = vpop.f32.mrf.mxu0 }
 0xbe7   :  { %v6038_v14 = vadd.f32 %v7666_v43, %v7654_v17  ;;  %v6062_v18 = vadd.f32 %v6595_v25, %v6027_v32  ;;  %v6072_v29 = vmax.f32 %v6064_v49, 0.0 }
 0xbe8   :  { %v5940_v15 = vpop.f32.mrf.mxu0 }
 0xbe9   :  { %v6065_v3 = vadd.f32 %v6595_v25, %v6038_v14  ;;  %v6030_v16 = vadd.f32 %v6029_v27, %v5940_v15  ;;  %v6070_v58 = vmax.f32 %v6062_v18, 0.0  ;;  %v6603_v18 = vld [vmem:[%s9268_s4 + $0xa] ss:$0 sm:$0xff]  ;;  %s7839_s4 = smov [#allocation2]  }
 0xbea   :  { %s6312_s11 = sshll.u32 %s7839_s4, 4  ;;  %s6313_s11 = int_to_ptr.vmem [resolvable:$true] %s6312_s11 }
 0xbeb   :  { %v6063_v62 = vadd.f32 %v6595_v25, %v6030_v16  ;;  %v6073_v38 = vmax.f32 %v6065_v3, 0.0  ;;  %s7815_s12 = scalar_lea.vmem %s6313_s11, 512  ;;  %p7820_p1 = scmp.lt.s32.totalorder %s6313_s11, %s6313_s11 }
 0xbec   :  { %p7816_p0 = scmp.ne.s32.totalorder %s6313_s11, %s7815_s12  ;;  %p7821_p2 = scmp.lt.s32.totalorder %s7815_s12, %s7815_s12 }
 0xbed   :  { %v6071_v2 = vmax.f32 %v6063_v62, 0.0  ;;  %v6079_v30 = vpack.c.bf16 %v6073_v38, %v6072_v29 }
 0xbee   :  { %p7822_p3 = por %p7821_p2, %p7820_p1 }
 0xbef   :  { %v6078_v24 = vpack.c.bf16 %v6071_v2, %v6070_v58 }
 0xbf0   :  { %p7823_p4 = pnand %p7822_p3, %p7816_p0 }
 0xbf1   :  { %7675 = vmatprep.mubr.msk.bf16.mxu0 %vm567_vm2, %v6078_v24 }
 0xbf2   :  { %v7657_v5 = vpop.f32.mrf.mxu0  ;;  %7676 = vmatmul.mubr.msk.bf16.vlgmr.msra.gmra.mxu0 %vm567_vm2, %v6079_v30 }
 0xbf3   :  { %v6051_v22 = vadd.f32 %v7669_v6, %v7657_v5 }
 0xbf4   :  { %v5953_v11 = vpop.f32.mrf.mxu0 }
 0xbf5   :  { %v6043_v31 = vadd.f32 %v6042_v44, %v5953_v11  ;;  %v6068_v63 = vadd.f32 %v6595_v25, %v6051_v22 }
 0xbf6   :  { %v7658_v59 = vpop.f32.mrf.mxu0 }
 0xbf7   :  { %v6054_v28 = vadd.f32 %v7670_v39, %v7658_v59  ;;  %v6066_v61 = vadd.f32 %v6595_v25, %v6043_v31  ;;  %v6076_v4 = vmax.f32 %v6068_v63, 0.0 }
 0xbf8   :  { %v5956_v48 = vpop.f32.mrf.mxu0 }
 0xbf9   :  { %v6069_v51 = vadd.f32 %v6595_v25, %v6054_v28  ;;  %v6046_v46 = vadd.f32 %v6045_v50, %v5956_v48  ;;  %v6074_v12 = vmax.f32 %v6066_v61, 0.0 }
 0xbfb   :  { %v6067_v41 = vadd.f32 %v6595_v25, %v6046_v46  ;;  %v6077_v1 = vmax.f32 %v6069_v51, 0.0 }
 0xbfd   :  { %v6075_v0 = vmax.f32 %v6067_v41, 0.0  ;;  %v6081_v45 = vpack.c.bf16 %v6077_v1, %v6076_v4 }
 0xbff   :  { %v6080_v20 = vpack.c.bf16 %v6075_v0, %v6074_v12 }
 0xc01   :  { %7679 = vmatprep.mubr.msk.bf16.mxu0 %vm567_vm2, %v6080_v20 }
 0xc02   :  { %7680 = vmatmul.mubr.msk.bf16.gmra.mxu0 %vm567_vm2, %v6081_v45 }
 0xcb2   :  { %v7677_v9 = vpop.f32.mrf.mxu0 }
 0xcb3   :  { %v6158_v37 = vadd.f32 %v7677_v9, %v6596_v56 }
 0xcb4   :  { %v6149_v52 = vpop.f32.mrf.mxu0 }
 0xcb5   :  { %v6150_v26 = vadd.f32 %v6596_v56, %v6149_v52  ;;  %v6182_v60 = vmax.f32 %v6158_v37, 0.0 }
 0xcb6   :  { %v7678_v34 = vpop.f32.mrf.mxu0 }
 0xcb7   :  { %v6161_v36 = vadd.f32 %v7678_v34, %v6596_v56  ;;  %v6180_v10 = vmax.f32 %v6150_v26, 0.0 }
 0xcb8   :  { %v6152_v57 = vpop.f32.mrf.mxu0 }
 0xcb9   :  { %v6153_v23 = vadd.f32 %v6596_v56, %v6152_v57  ;;  %v6183_v8 = vmax.f32 %v6161_v36, 0.0 }
 0xcbb   :  { %v6181_v40 = vmax.f32 %v6153_v23, 0.0  ;;  %v6189_v35 = vpack.c.bf16 %v6183_v8, %v6182_v60 }
 0xcbd   :  { %v6188_v42 = vpack.c.bf16 %v6181_v40, %v6180_v10 }
 0xcbf   :  { %7687 = vmatprep.mubr.msk.bf16.mxu1 %vm567_vm2, %v6188_v42 }
 0xcc0   :  { %7688 = vmatmul.mubr.msk.bf16.vlgmr.msra.gmra.mxu1 %vm567_vm2, %v6189_v35 }
 0xcc2   :  { %v7681_v55 = vpop.f32.mrf.mxu0 }
 0xcc3   :  { %v6174_v43 = vadd.f32 %v7681_v55, %v6596_v56 }
 0xcc4   :  { %v6165_v54 = vpop.f32.mrf.mxu0 }
 0xcc5   :  { %v6166_v13 = vadd.f32 %v6596_v56, %v6165_v54  ;;  %v6186_v14 = vmax.f32 %v6174_v43, 0.0 }
 0xcc6   :  { %v7682_v33 = vpop.f32.mrf.mxu0 }
 0xcc7   :  { %v6177_v53 = vadd.f32 %v7682_v33, %v6596_v56  ;;  %v6184_v17 = vmax.f32 %v6166_v13, 0.0 }
 0xcc8   :  { %v6168_v19 = vpop.f32.mrf.mxu0 }
 0xcc9   :  { %v6169_v32 = vadd.f32 %v6596_v56, %v6168_v19  ;;  %v6187_v21 = vmax.f32 %v6177_v53, 0.0 }
 0xccb   :  { %v6185_v25 = vmax.f32 %v6169_v32, 0.0  ;;  %v6191_v15 = vpack.c.bf16 %v6187_v21, %v6186_v14 }
 0xccd   :  { %v6190_v27 = vpack.c.bf16 %v6185_v25, %v6184_v17 }
 0xccf   :  { %7691 = vmatprep.mubr.msk.bf16.mxu1 %vm567_vm2, %v6190_v27 }
 0xcd0   :  { %7692 = vmatmul.mubr.msk.bf16.gmra.mxu1 %vm567_vm2, %v6191_v15 }
 0xd80   :  { %v7689_v3 = vpop.f32.mrf.mxu1 }
 0xd81   :  { %v6268_v16 = vadd.f32 %v7689_v3, %v6603_v18 }
 0xd82   :  { %v6259_v49 = vpop.f32.mrf.mxu1 }
 0xd83   :  { %v6292_v62 = vpack.c.bf16 %v6268_v16, %v6268_v16  ;;  %v6260_v6 = vadd.f32 %v6603_v18, %v6259_v49 }
 0xd84   :  { %v7690_v38 = vpop.f32.mrf.mxu1 }
 0xd85   :  { %6301 = vst.msk [vmem:[#allocation2 + $0x8] sm:$0xf] %vm6298_vm5, %v6292_v62  ;;  %v6290_v58 = vpack.c.bf16 %v6260_v6, %v6260_v6  ;;  %v6271_v2 = vadd.f32 %v7690_v38, %v6603_v18 }
 0xd86   :  { %v6262_v29 = vpop.f32.mrf.mxu1 }
 0xd87   :  { %6299 = vst.msk [vmem:[#allocation2] sm:$0xf] %vm6298_vm5, %v6290_v58  ;;  %v6293_v24 = vpack.c.bf16 %v6271_v2, %v6271_v2  ;;  %v6263_v44 = vadd.f32 %v6603_v18, %v6262_v29 }
 0xd89   :  { %6302 = vst.msk [vmem:[#allocation2 + $0xc] sm:$0xf] %vm6298_vm5, %v6293_v24  ;;  %v6291_v30 = vpack.c.bf16 %v6263_v44, %v6263_v44 }
 0xd8b   :  { %6300 = vst.msk [vmem:[#allocation2 + $0x4] sm:$0xf] %vm6298_vm5, %v6291_v30 }
 0xd90   :  { %v7693_v5 = vpop.f32.mrf.mxu1 }
 0xd91   :  { %v6284_v39 = vadd.f32 %v7693_v5, %v6603_v18 }
 0xd92   :  { %v6275_v11 = vpop.f32.mrf.mxu1 }
 0xd93   :  { %v6296_v31 = vpack.c.bf16 %v6284_v39, %v6284_v39  ;;  %v6276_v22 = vadd.f32 %v6603_v18, %v6275_v11 }
 0xd94   :  { %v7694_v59 = vpop.f32.mrf.mxu1 }
 0xd95   :  { %6305 = vst.msk [vmem:[#allocation2 + $0x18] sm:$0xf] %vm6298_vm5, %v6296_v31  ;;  %v6294_v28 = vpack.c.bf16 %v6276_v22, %v6276_v22  ;;  %v6287_v50 = vadd.f32 %v7694_v59, %v6603_v18 }
 0xd96   :  { %v6278_v48 = vpop.f32.mrf.mxu1 }
 0xd97   :  { %6303 = vst.msk [vmem:[#allocation2 + $0x10] sm:$0xf] %vm6298_vm5, %v6294_v28  ;;  %v6297_v61 = vpack.c.bf16 %v6287_v50, %v6287_v50  ;;  %v6279_v51 = vadd.f32 %v6603_v18, %v6278_v48 }
 0xd99   :  { %6306 = vst.msk [vmem:[#allocation2 + $0x1c] sm:$0xf] %vm6298_vm5, %v6297_v61  ;;  %v6295_v46 = vpack.c.bf16 %v6279_v51, %v6279_v51 }
 0xd9b   :  { %6304 = vst.msk [vmem:[#allocation2 + $0x14] sm:$0xf] %vm6298_vm5, %v6295_v46 }
 0xd9c   :  { %7826 = shalt.err (!%p7823_p4)
}
 0xd9d   :  { %s7840_s13 = smov 64   ;;  %s7841_s14 = smov 4  }
 0xd9e   :  { %6318 = dma.vmem_to_hbm [thread:$0]  %s6313_s11, 512, %s9269_s5, [#allocation3], %s7840_s13, %s7840_s13, %s7841_s14  }
 0xd9f   :  { %7835 = dma.done.wait [#allocation3], 512  }
 0xda0   :  { %7836 = vsyncadd [#allocation3], 4294966784 }
 0xda1   :  { %6322 = vsyncpa [#allocation3], 1 }

</bundles_post_ra>
